<compile_context>
chip_gen: v7x
topology: tpu7x:2x2x1
jax: 0.10.0
libtpu: 0.0.40
codegen_flags: <defaults>
</compile_context>

<pallas_src>
import functools

import jax
import jax.numpy as jnp
from jax import lax
from jax.experimental import pallas as pl
from jax.experimental.pallas import tpu as pltpu


# ------------------------------ small helpers -------------------------------

def _rup(x, m):
    return (x + m - 1) // m * m


def _pad2d(a, rows, cols):
    return jnp.pad(a, ((0, rows - a.shape[0]), (0, cols - a.shape[1])))


def _pick_tile(dim, candidates):
    for c in candidates:
        if dim % c == 0:
            return c
    return dim


def _vmem_cap_bytes():
    # ~3/4 of physical VMEM: ~96 MiB on v5e/v6e (128 MiB), ~48 MiB on v7x (64 MiB).
    try:
        return int(pltpu.get_tpu_info().vmem_capacity_bytes) * 3 // 4
    except Exception:
        return 48 * 1024 * 1024


def _compiler_params(dim_sem, tile_bytes):
    vmem = int(min(max(3 * tile_bytes, 16 * 1024 * 1024), _vmem_cap_bytes()))
    return pltpu.CompilerParams(dimension_semantics=dim_sem,
                                vmem_limit_bytes=vmem)


def fold_bn(bn, eps=1e-5):
    gamma, beta, mean, var = bn
    scale = gamma * lax.rsqrt(var + eps)
    bias = beta - mean * scale
    return scale.reshape(1, -1), bias.reshape(1, -1)


# --------------------- kernel 1: tiled matmul + BN (+ReLU) ------------------
# Used for conv1 (1x1 conv). Grid (M/tm, N/tn, K/tk), f32 accumulator scratch.

def _mm_bn_kernel(relu, x_ref, w_ref, s_ref, b_ref, o_ref, acc_ref):
    @pl.when(pl.program_id(2) == 0)
    def _():
        acc_ref[...] = jnp.zeros_like(acc_ref)

    acc_ref[...] += jnp.dot(x_ref[...], w_ref[...],
                            preferred_element_type=jnp.float32)

    @pl.when(pl.program_id(2) == pl.num_programs(2) - 1)
    def _():
        y = acc_ref[...] * s_ref[...] + b_ref[...]
        if relu:
            y = jnp.maximum(y, 0.0)
        o_ref[...] = y.astype(o_ref.dtype)


def matmul_bn(x, w, scale, bias, *, relu, out_dtype, tm=512):
    M, K = x.shape
    Kw, N = w.shape
    assert K == Kw and K % 128 == 0 and N % 128 == 0

    tm = min(tm, _rup(M, 8))
    Mp = _rup(M, tm)
    if Mp != M:
        x = jnp.pad(x, ((0, Mp - M), (0, 0)))
    tk = _pick_tile(K, (512, 256, 128))
    tn = _pick_tile(N, (256, 128))
    grid = (Mp // tm, N // tn, K // tk)

    xb = x.dtype.itemsize
    ob = jnp.dtype(out_dtype).itemsize
    tile_bytes = (2 * tm * tk * xb + 2 * tk * tn * w.dtype.itemsize
                  + tm * tn * 4 + 2 * tm * tn * ob + 4 * tn * 4)

    out = pl.pallas_call(
        functools.partial(_mm_bn_kernel, relu),
        out_shape=jax.ShapeDtypeStruct((Mp, N), out_dtype),
        grid_spec=pltpu.PrefetchScalarGridSpec(
            num_scalar_prefetch=0,
            grid=grid,
            in_specs=[
                pl.BlockSpec((tm, tk), lambda i, j, k: (i, k)),
                pl.BlockSpec((tk, tn), lambda i, j, k: (k, j)),
                pl.BlockSpec((1, tn), lambda i, j, k: (0, j)),
                pl.BlockSpec((1, tn), lambda i, j, k: (0, j)),
            ],
            out_specs=pl.BlockSpec((tm, tn), lambda i, j, k: (i, j)),
            scratch_shapes=[pltpu.VMEM((tm, tn), jnp.float32)],
        ),
        compiler_params=_compiler_params(
            ("parallel", "parallel", "arbitrary"), tile_bytes),
    )(x, w, scale, bias)
    return out[:M] if Mp != M else out


# ----------- kernel 2: direct 3x3 conv + BN + ReLU (width-concat form) ------
# The kernel receives the raw (1, H, W, P) activation block (no HBM spatial
# padding pass).  At the first Cout tile it writes a zero-padded width-concat
# activation into a VMEM scratch xcat of shape (R, 3*P), R = (H+2)*Wp,
# Wp = round_up(W+2, 8):
#     xcat[r, dw*P:(dw+1)*P] = padded_act[r + dw]      (flat r = h'*Wp + w')
# For output row r = h*Wp + w the conv is then 3 matmuls with K = 3*P:
#     acc[r] = sum_dh  xcat[r + dh*Wp, :] @ Wcat[dh]
# Padding rows are plain zeros (no roll wraparound to reason about), and the
# dh shifts are contiguous sublane-aligned ref slices (Wp % 8 == 0).

def _conv3x3_bn_relu_kernel(H, W, Wp, P, x_ref, w_ref, s_ref, b_ref, o_ref,
                            xcat_ref, acc_ref):
    Racc = H * Wp

    @pl.when(pl.program_id(1) == 0)
    def _build():
        xcat_ref[...] = jnp.zeros_like(xcat_ref)
        for h in range(H):
            v = x_ref[0, h]                              # (W, P) bf16
            base = (h + 1) * Wp + 1                      # flat idx of (h+1, 1)
            for dw in range(3):
                xcat_ref[pl.ds(base - dw, W), pl.ds(dw * P, P)] = v

    # 3 matmuls with K = 3*P; accumulator initialised with the dh = 0 product.
    acc_ref[...] = jnp.dot(xcat_ref[pl.ds(0, Racc), :], w_ref[0],
                           preferred_element_type=jnp.float32)
    for dh in (1, 2):
        acc_ref[...] += jnp.dot(xcat_ref[pl.ds(dh * Wp, Racc), :], w_ref[dh],
                                preferred_element_type=jnp.float32)

    # Row-chunked BN + ReLU epilogue (crops Wp -> W, drops spatial pad rows).
    scale = s_ref[...]
    bias = b_ref[...]
    for h in range(H):
        v = acc_ref[pl.ds(h * Wp, W), :] * scale + bias
        o_ref[0, h] = jnp.maximum(v, 0.0).astype(o_ref.dtype)


def conv3x3_bn_relu(x, w_cat, scale, bias, *, out_dtype):
    N, H, W, P = x.shape
    Cout = w_cat.shape[2]
    Wp = _rup(W + 2, 8)
    assert Wp >= W + 2
    R = (H + 2) * Wp
    tcout = _pick_tile(Cout, (256, 128))
    nj = Cout // tcout

    tile_bytes = (2 * H * W * P * 2              # x block (double buffered)
                  + 2 * 3 * 3 * P * tcout * 2    # weight block
                  + 2 * H * W * tcout * 2        # out block
                  + R * 3 * P * 2                # xcat scratch
                  + H * Wp * tcout * 4           # acc scratch
                  + 4 * tcout * 4)

    return pl.pallas_call(
        functools.partial(_conv3x3_bn_relu_kernel, H, W, Wp, P),
        out_shape=jax.ShapeDtypeStruct((N, H, W, Cout), out_dtype),
        grid_spec=pltpu.PrefetchScalarGridSpec(
            num_scalar_prefetch=0,
            grid=(N, nj),
            in_specs=[
                pl.BlockSpec((1, H, W, P), lambda b, j: (b, 0, 0, 0)),
                pl.BlockSpec((3, 3 * P, tcout), lambda b, j: (0, 0, j)),
                pl.BlockSpec((1, tcout), lambda b, j: (0, j)),
                pl.BlockSpec((1, tcout), lambda b, j: (0, j)),
            ],
            out_specs=pl.BlockSpec((1, H, W, tcout), lambda b, j: (b, 0, 0, j)),
            scratch_shapes=[
                pltpu.VMEM((R, 3 * P), jnp.bfloat16),
                pltpu.VMEM((H * Wp, tcout), jnp.float32),
            ],
        ),
        compiler_params=_compiler_params(("parallel", "arbitrary"), tile_bytes),
    )(x, w_cat, scale, bias)


# -------- kernel 3 (pass A): conv3(1x1) + bn3 per HW tile, GAP + SE gate -----

def _conv3_gap_gate_kernel(inv_hw, x_ref, w3_ref, s3_ref, b3_ref,
                           w1_ref, b1_ref, w2_ref, b2_ref,
                           y_ref, gate_ref, gap_acc):
    t = pl.program_id(1)

    y = jnp.dot(x_ref[0], w3_ref[...], preferred_element_type=jnp.float32)
    y = y * s3_ref[...] + b3_ref[...]                      # (thw, C3) f32
    y_ref[0] = y.astype(y_ref.dtype)

    @pl.when(t == 0)
    def _():
        gap_acc[...] = jnp.zeros_like(gap_acc)
        gate_ref[...] = jnp.zeros_like(gate_ref)

    gap_acc[...] += jnp.sum(y, axis=0, keepdims=True) * inv_hw

    @pl.when(t == pl.num_programs(1) - 1)
    def _():
        # SE gate: GAP -> FC -> tanh-GELU -> FC -> sigmoid (computed once).
        h = jnp.dot(gap_acc[...], w1_ref[...],
                    preferred_element_type=jnp.float32) + b1_ref[...]
        h = 0.5 * h * (1.0 + jnp.tanh(0.7978845608028654
                                      * (h + 0.044715 * h * h * h)))
        g = jnp.dot(h, w2_ref[...],
                    preferred_element_type=jnp.float32) + b2_ref[...]
        gate_ref[0] = jax.nn.sigmoid(g)


def conv3_bn_gap_gate(x2, w3, s3, b3, w1, b1, w2, b2, *, thw):
    N, HW, P = x2.shape
    C3 = w3.shape[1]
    CR = w1.shape[1]
    assert HW % thw == 0
    nt = HW // thw

    tile_bytes = (2 * thw * P * 2 + 2 * P * C3 * 2 + 2 * thw * C3 * 2
                  + 2 * (C3 * CR + CR * C3) * 4 + 8 * C3 * 4)

    y, gate = pl.pallas_call(
        functools.partial(_conv3_gap_gate_kernel, 1.0 / HW),
        out_shape=(jax.ShapeDtypeStruct((N, HW, C3), jnp.bfloat16),
                   jax.ShapeDtypeStruct((N, 1, C3), jnp.float32)),
        grid_spec=pltpu.PrefetchScalarGridSpec(
            num_scalar_prefetch=0,
            grid=(N, nt),
            in_specs=[
                pl.BlockSpec((1, thw, P), lambda b, t: (b, t, 0)),
                pl.BlockSpec((P, C3), lambda b, t: (0, 0)),
                pl.BlockSpec((1, C3), lambda b, t: (0, 0)),
                pl.BlockSpec((1, C3), lambda b, t: (0, 0)),
                pl.BlockSpec((C3, CR), lambda b, t: (0, 0)),
                pl.BlockSpec((1, CR), lambda b, t: (0, 0)),
                pl.BlockSpec((CR, C3), lambda b, t: (0, 0)),
                pl.BlockSpec((1, C3), lambda b, t: (0, 0)),
            ],
            out_specs=[
                pl.BlockSpec((1, thw, C3), lambda b, t: (b, t, 0)),
                pl.BlockSpec((1, 1, C3), lambda b, t: (b, 0, 0)),
            ],
            scratch_shapes=[pltpu.VMEM((1, C3), jnp.float32)],
        ),
        compiler_params=_compiler_params(("parallel", "arbitrary"), tile_bytes),
    )(x2, w3, s3, b3, w1, b1, w2, b2)
    return y, gate


# ---- kernel 4 (pass B): gate + residual + final ReLU, NCHW output slab ------

def _apply_gate_residual_kernel(c3, gate_ref, y_ref, r_ref, o_ref):
    g = gate_ref[0]                                        # (1, C3) f32
    out = y_ref[0].astype(jnp.float32) * (1.0 + g) + r_ref[0].astype(jnp.float32)
    out = jnp.maximum(out, 0.0)                            # (thw, C3)
    # In-kernel transpose to the NCHW layout (drops padded channels) so the
    # wrapper needs no extra crop/transpose HBM pass.
    o_ref[0] = jnp.transpose(out)[:c3, :].astype(o_ref.dtype)


def apply_gate_residual_nchw(y, gate, resid, *, c3, thw, out_dtype=jnp.float32):
    N, HW, C3 = y.shape
    assert HW % thw == 0
    nt = HW // thw

    tile_bytes = (2 * thw * C3 * 2 * 2 + 2 * c3 * thw * 4
                  + thw * C3 * 4 + 2 * C3 * 4)

    return pl.pallas_call(
        functools.partial(_apply_gate_residual_kernel, c3),
        out_shape=jax.ShapeDtypeStruct((N, c3, HW), out_dtype),
        grid_spec=pltpu.PrefetchScalarGridSpec(
            num_scalar_prefetch=0,
            grid=(N, nt),
            in_specs=[
                pl.BlockSpec((1, 1, C3), lambda b, t: (b, 0, 0)),
                pl.BlockSpec((1, thw, C3), lambda b, t: (b, t, 0)),
                pl.BlockSpec((1, thw, C3), lambda b, t: (b, t, 0)),
            ],
            out_specs=pl.BlockSpec((1, c3, thw), lambda b, t: (b, 0, t)),
        ),
        compiler_params=_compiler_params(("parallel", "parallel"), tile_bytes),
    )(gate, y, resid)


# ------------------------------- JAX glue ------------------------------------

def init_params(key, inplanes, planes, r=4):
    c3 = planes * 4
    ks = jax.random.split(key, 8)

    def conv_w(k, cout, cin, kh, kw):
        fan_in = cin * kh * kw
        return jax.random.normal(k, (cout, cin, kh, kw), jnp.float32) * (2.0 / fan_in) ** 0.5

    def bn_p(k, c):
        k1, k2, k3, k4 = jax.random.split(k, 4)
        gamma = jax.random.uniform(k1, (c,), jnp.float32, 0.5, 1.5)
        beta = 0.1 * jax.random.normal(k2, (c,), jnp.float32)
        mean = 0.1 * jax.random.normal(k3, (c,), jnp.float32)
        var = jax.random.uniform(k4, (c,), jnp.float32, 0.5, 1.5)
        return gamma, beta, mean, var

    return dict(
        conv1=conv_w(ks[0], planes, inplanes, 1, 1),
        bn1=bn_p(ks[1], planes),
        conv2=conv_w(ks[2], planes, planes, 3, 3),
        bn2=bn_p(ks[3], planes),
        conv3=conv_w(ks[4], c3, planes, 1, 1),
        bn3=bn_p(ks[5], c3),
        se_w1=jax.random.normal(ks[6], (c3, c3 // r), jnp.float32) * (1.0 / c3) ** 0.5,
        se_b1=jnp.zeros((c3 // r,), jnp.float32),
        se_w2=jax.random.normal(ks[7], (c3 // r, c3), jnp.float32) * (float(r) / c3) ** 0.5,
        se_b2=jnp.zeros((c3,), jnp.float32),
    )


def se_bottleneck_forward(x_nchw, params, stride=1):
    if stride != 1:
        # TODO(synk): stride>1 / downsample path not implemented.
        raise NotImplementedError("only stride=1 / downsample=None supported")

    cdt = jnp.bfloat16  # MXU-input / inter-stage dtype (f32 accumulation)

    # NCHW interface -> NHWC (channels in the lane dim). Single boundary pass.
    x = jnp.transpose(x_nchw, (0, 2, 3, 1)).astype(jnp.float32)
    N, H, W, cin = x.shape
    planes = params["conv1"].shape[0]
    c3 = params["conv3"].shape[0]
    cr = params["se_w1"].shape[1]
    assert cin == c3, "residual add requires inplanes == planes*4 (no downsample)"

    # lane-dense channel padding (multiples of 128); padded channels carry 0.
    CIN = _rup(cin, 128)
    P = _rup(planes, 128)
    C3 = _rup(c3, 128)
    CR = _rup(cr, 128)
    HW = H * W

    # channel-padded bf16 activation; also reused as the residual.
    xp = jnp.pad(x, ((0, 0), (0, 0), (0, 0), (0, CIN - cin))).astype(cdt)

    # ---- conv1 (1x1) + bn1 + relu : tiled matmul kernel ----
    w1 = _pad2d(params["conv1"][:, :, 0, 0].T, CIN, P).astype(cdt)
    s1, b1 = fold_bn(params["bn1"])
    s1, b1 = _pad2d(s1, 1, P), _pad2d(b1, 1, P)
    out1 = matmul_bn(xp.reshape(N * HW, CIN), w1, s1, b1,
                     relu=True, out_dtype=cdt)
    out1 = out1.reshape(N, H, W, P)

    # ---- conv2 (3x3, pad=1) + bn2 + relu : direct conv kernel ----
    w2 = jnp.transpose(params["conv2"], (2, 3, 1, 0))        # (kh,kw,cin,cout)
    w2 = jnp.pad(w2, ((0, 0), (0, 0), (0, P - planes), (0, P - planes)))
    w2 = w2.reshape(3, 3 * P, P).astype(cdt)                 # Wcat[dh]
    s2, b2 = fold_bn(params["bn2"])
    s2, b2 = _pad2d(s2, 1, P), _pad2d(b2, 1, P)
    out2 = conv3x3_bn_relu(out1, w2, s2, b2, out_dtype=cdt)

    # ---- conv3 (1x1) + bn3 + SE + residual + relu : two HW-tiled passes ----
    thw = _pick_tile(HW, (1024, 512, 448, 392, 256, 128, 64, 32, 16, 8))
    w3 = _pad2d(params["conv3"][:, :, 0, 0].T, P, C3).astype(cdt)
    s3, b3 = fold_bn(params["bn3"])
    s3, b3 = _pad2d(s3, 1, C3), _pad2d(b3, 1, C3)
    sw1 = _pad2d(params["se_w1"], C3, CR)
    sb1 = _pad2d(params["se_b1"].reshape(1, -1), 1, CR)
    sw2 = _pad2d(params["se_w2"], CR, C3)
    sb2 = _pad2d(params["se_b2"].reshape(1, -1), 1, C3)

    y, gate = conv3_bn_gap_gate(out2.reshape(N, HW, P), w3, s3, b3,
                                sw1, sb1, sw2, sb2, thw=thw)
    out_nchw = apply_gate_residual_nchw(y, gate, xp.reshape(N, HW, CIN),
                                        c3=c3, thw=thw, out_dtype=jnp.float32)
    return out_nchw.reshape(N, c3, H, W)


# ---------------------------------- main -------------------------------------

if __name__ == "__main__":
    key = jax.random.PRNGKey(0)
    kx, kp = jax.random.split(key)

    # inplanes == planes * expansion so the residual add works (downsample=None)
    inplanes, planes = 16, 4
    x = jax.random.normal(kx, (2, inplanes, 16, 16), jnp.float32)  # NCHW
    params = init_params(kp, inplanes, planes, r=4)

    fwd = jax.jit(functools.partial(se_bottleneck_forward, stride=1))
    y = fwd(x, params)
    jax.block_until_ready(y)

    assert y.shape == (2, planes * 4, 16, 16), y.shape
    assert bool(jnp.all(jnp.isfinite(y)))
    assert bool(jnp.all(y >= 0.0))  # final ReLU
    print("KERNEL_OK")
</pallas_src>

<mosaic_0001>
module attributes {stable_mosaic.version = 11 : i64} {
  func.func @_mm_bn_kernel(%arg0: i32, %arg1: i32, %arg2: i32, %arg3: memref<512x128xbf16, #tpu.memory_space<vmem>>, %arg4: memref<128x128xbf16, #tpu.memory_space<vmem>>, %arg5: memref<1x128xf32, #tpu.memory_space<vmem>>, %arg6: memref<1x128xf32, #tpu.memory_space<vmem>>, %arg7: memref<512x128xbf16, #tpu.memory_space<vmem>>, %arg8: memref<512x128xf32, #tpu.memory_space<vmem>>) attributes {dimension_semantics = [#tpu.dimension_semantics<parallel>, #tpu.dimension_semantics<parallel>, #tpu.dimension_semantics<arbitrary>], iteration_bounds = array<i64: 1, 1, 1>, scalar_prefetch = 0 : i64, scratch_operands = 1 : i64, tpu.core_type = #tpu.core_type<tc>, window_params = [{transform_indices = @transform_0, window_bounds = array<i64: 512, 128>}, {transform_indices = @transform_1, window_bounds = array<i64: 128, 128>}, {transform_indices = @transform_2, window_bounds = array<i64: 1, 128>}, {transform_indices = @transform_3, window_bounds = array<i64: 1, 128>}, {transform_indices = @transform_4, window_bounds = array<i64: 512, 128>}]} {
    %c0_i32 = arith.constant 0 : i32
    %0 = arith.cmpi eq, %arg2, %c0_i32 : i32
    %1 = arith.extui %0 : i1 to i32
    %c0_i32_0 = arith.constant 0 : i32
    %2 = arith.cmpi ne, %1, %c0_i32_0 : i32
    scf.if %2 {
      %cst_10 = arith.constant 0.000000e+00 : f32
      %12 = vector.broadcast %cst_10 : f32 to vector<512x128xf32>
      %c0_11 = arith.constant 0 : index
      %c0_12 = arith.constant 0 : index
      %13 = vector.load %arg8[%c0_11, %c0_12] : memref<512x128xf32, #tpu.memory_space<vmem>>, vector<512x128xf32>
      tpu.vector_store %arg8[%c0_11, %c0_12], %12 {strides = array<i32>} : memref<512x128xf32, #tpu.memory_space<vmem>>, vector<512x128xf32>,
    } else {
    }
    %c0 = arith.constant 0 : index
    %c0_1 = arith.constant 0 : index
    %3 = vector.load %arg8[%c0, %c0_1] : memref<512x128xf32, #tpu.memory_space<vmem>>, vector<512x128xf32>
    %c0_2 = arith.constant 0 : index
    %c0_3 = arith.constant 0 : index
    %4 = vector.load %arg3[%c0_2, %c0_3] : memref<512x128xbf16, #tpu.memory_space<vmem>>, vector<512x128xbf16>
    %c0_4 = arith.constant 0 : index
    %c0_5 = arith.constant 0 : index
    %5 = vector.load %arg4[%c0_4, %c0_5] : memref<128x128xbf16, #tpu.memory_space<vmem>>, vector<128x128xbf16>
    %cst = arith.constant dense<0.000000e+00> : vector<512x128xf32>
    %6 = tpu.matmul %4, %5, %cst {dimension_numbers = #tpu.dot_dimension_numbers<[1], [0], [0], [1], [0, 0, 1, 1], [], []>} : vector<512x128xbf16>, vector<128x128xbf16>, vector<512x128xf32> -> vector<512x128xf32>
    %7 = arith.addf %3, %6 : vector<512x128xf32>
    %c0_6 = arith.constant 0 : index
    %c0_7 = arith.constant 0 : index
    %8 = vector.load %arg8[%c0_6, %c0_7] : memref<512x128xf32, #tpu.memory_space<vmem>>, vector<512x128xf32>
    tpu.vector_store %arg8[%c0_6, %c0_7], %7 {strides = array<i32>} : memref<512x128xf32, #tpu.memory_space<vmem>>, vector<512x128xf32>,
    %c0_i32_8 = arith.constant 0 : i32
    %9 = arith.cmpi eq, %arg2, %c0_i32_8 : i32
    %10 = arith.extui %9 : i1 to i32
    %c0_i32_9 = arith.constant 0 : i32
    %11 = arith.cmpi ne, %10, %c0_i32_9 : i32
    scf.if %11 {
      %c0_10 = arith.constant 0 : index
      %c0_11 = arith.constant 0 : index
      %12 = vector.load %arg8[%c0_10, %c0_11] : memref<512x128xf32, #tpu.memory_space<vmem>>, vector<512x128xf32>
      %c0_12 = arith.constant 0 : index
      %c0_13 = arith.constant 0 : index
      %13 = vector.load %arg5[%c0_12, %c0_13] : memref<1x128xf32, #tpu.memory_space<vmem>>, vector<1x128xf32>
      %14 = vector.broadcast %13 : vector<1x128xf32> to vector<512x128xf32>
      %15 = arith.mulf %12, %14 : vector<512x128xf32>
      %c0_14 = arith.constant 0 : index
      %c0_15 = arith.constant 0 : index
      %16 = vector.load %arg6[%c0_14, %c0_15] : memref<1x128xf32, #tpu.memory_space<vmem>>, vector<1x128xf32>
      %17 = vector.broadcast %16 : vector<1x128xf32> to vector<512x128xf32>
      %18 = arith.addf %15, %17 : vector<512x128xf32>
      %cst_16 = arith.constant 0.000000e+00 : f32
      %19 = vector.broadcast %cst_16 : f32 to vector<512x128xf32>
      %20 = arith.maximumf %18, %19 : vector<512x128xf32>
      %21 = arith.truncf %20 : vector<512x128xf32> to vector<512x128xbf16>
      %c0_17 = arith.constant 0 : index
      %c0_18 = arith.constant 0 : index
      %22 = vector.load %arg7[%c0_17, %c0_18] : memref<512x128xbf16, #tpu.memory_space<vmem>>, vector<512x128xbf16>
      tpu.vector_store %arg7[%c0_17, %c0_18], %21 {strides = array<i32>} : memref<512x128xbf16, #tpu.memory_space<vmem>>, vector<512x128xbf16>,
    } else {
    }
    return
  }
  func.func @transform_0(%arg0: i32, %arg1: i32, %arg2: i32) -> (i32, i32) {
    %c0_i32 = arith.constant 0 : i32
    return %arg0, %arg2 : i32, i32
  }
  func.func @transform_1(%arg0: i32, %arg1: i32, %arg2: i32) -> (i32, i32) {
    %c0_i32 = arith.constant 0 : i32
    return %arg2, %arg1 : i32, i32
  }
  func.func @transform_2(%arg0: i32, %arg1: i32, %arg2: i32) -> (i32, i32) {
    %c0_i32 = arith.constant 0 : i32
    %c0_i32_0 = arith.constant 0 : i32
    return %c0_i32, %arg1 : i32, i32
  }
  func.func @transform_3(%arg0: i32, %arg1: i32, %arg2: i32) -> (i32, i32) {
    %c0_i32 = arith.constant 0 : i32
    %c0_i32_0 = arith.constant 0 : i32
    return %c0_i32, %arg1 : i32, i32
  }
  func.func @transform_4(%arg0: i32, %arg1: i32, %arg2: i32) -> (i32, i32) {
    %c0_i32 = arith.constant 0 : i32
    return %arg0, %arg1 : i32, i32
  }
}

module attributes {stable_mosaic.version = 11 : i64} {
  func.func @_conv3x3_bn_relu_kernel(%arg0: i32, %arg1: i32, %arg2: memref<1x16x16x128xbf16, #tpu.memory_space<vmem>>, %arg3: memref<3x384x128xbf16, #tpu.memory_space<vmem>>, %arg4: memref<1x128xf32, #tpu.memory_space<vmem>>, %arg5: memref<1x128xf32, #tpu.memory_space<vmem>>, %arg6: memref<1x16x16x128xbf16, #tpu.memory_space<vmem>>, %arg7: memref<432x384xbf16, #tpu.memory_space<vmem>>, %arg8: memref<384x128xf32, #tpu.memory_space<vmem>>) attributes {dimension_semantics = [#tpu.dimension_semantics<parallel>, #tpu.dimension_semantics<arbitrary>], iteration_bounds = array<i64: 2, 1>, scalar_prefetch = 0 : i64, scratch_operands = 2 : i64, tpu.core_type = #tpu.core_type<tc>, window_params = [{transform_indices = @transform_0, window_bounds = array<i64: 1, 16, 16, 128>}, {transform_indices = @transform_1, window_bounds = array<i64: 3, 384, 128>}, {transform_indices = @transform_2, window_bounds = array<i64: 1, 128>}, {transform_indices = @transform_3, window_bounds = array<i64: 1, 128>}, {transform_indices = @transform_4, window_bounds = array<i64: 1, 16, 16, 128>}]} {
    %c0_i32 = arith.constant 0 : i32
    %0 = arith.cmpi eq, %arg1, %c0_i32 : i32
    %1 = arith.extui %0 : i1 to i32
    %c0_i32_0 = arith.constant 0 : i32
    %2 = arith.cmpi ne, %1, %c0_i32_0 : i32
    scf.if %2 {
      %cst_113 = arith.constant 0.000000e+00 : bf16
      %200 = vector.broadcast %cst_113 : bf16 to vector<432x384xbf16>
      %c0_114 = arith.constant 0 : index
      %c0_115 = arith.constant 0 : index
      %201 = vector.load %arg7[%c0_114, %c0_115] : memref<432x384xbf16, #tpu.memory_space<vmem>>, vector<432x384xbf16>
      tpu.vector_store %arg7[%c0_114, %c0_115], %200 {strides = array<i32>} : memref<432x384xbf16, #tpu.memory_space<vmem>>, vector<432x384xbf16>,
      %c0_116 = arith.constant 0 : index
      %c0_117 = arith.constant 0 : index
      %c0_118 = arith.constant 0 : index
      %c0_119 = arith.constant 0 : index
      %202 = vector.load %arg2[%c0_116, %c0_117, %c0_118, %c0_119] : memref<1x16x16x128xbf16, #tpu.memory_space<vmem>>, vector<1x1x16x128xbf16>
      %203 = vector.shape_cast %202 : vector<1x1x16x128xbf16> to vector<16x128xbf16>
      %c25 = arith.constant 25 : index
      %c0_120 = arith.constant 0 : index
      %204 = vector.load %arg7[%c25, %c0_120] : memref<432x384xbf16, #tpu.memory_space<vmem>>, vector<16x128xbf16>
      tpu.vector_store %arg7[%c25, %c0_120], %203 {strides = array<i32>} : memref<432x384xbf16, #tpu.memory_space<vmem>>, vector<16x128xbf16>,
      %c24_121 = arith.constant 24 : index
      %c128 = arith.constant 128 : index
      %205 = vector.load %arg7[%c24_121, %c128] : memref<432x384xbf16, #tpu.memory_space<vmem>>, vector<16x128xbf16>
      tpu.vector_store %arg7[%c24_121, %c128], %203 {strides = array<i32>} : memref<432x384xbf16, #tpu.memory_space<vmem>>, vector<16x128xbf16>,
      %c23 = arith.constant 23 : index
      %c256 = arith.constant 256 : index
      %206 = vector.load %arg7[%c23, %c256] : memref<432x384xbf16, #tpu.memory_space<vmem>>, vector<16x128xbf16>
      tpu.vector_store %arg7[%c23, %c256], %203 {strides = array<i32>} : memref<432x384xbf16, #tpu.memory_space<vmem>>, vector<16x128xbf16>,
      %c0_122 = arith.constant 0 : index
      %c1_123 = arith.constant 1 : index
      %c0_124 = arith.constant 0 : index
      %c0_125 = arith.constant 0 : index
      %207 = vector.load %arg2[%c0_122, %c1_123, %c0_124, %c0_125] : memref<1x16x16x128xbf16, #tpu.memory_space<vmem>>, vector<1x1x16x128xbf16>
      %208 = vector.shape_cast %207 : vector<1x1x16x128xbf16> to vector<16x128xbf16>
      %c49 = arith.constant 49 : index
      %c0_126 = arith.constant 0 : index
      %209 = vector.load %arg7[%c49, %c0_126] : memref<432x384xbf16, #tpu.memory_space<vmem>>, vector<16x128xbf16>
      tpu.vector_store %arg7[%c49, %c0_126], %208 {strides = array<i32>} : memref<432x384xbf16, #tpu.memory_space<vmem>>, vector<16x128xbf16>,
      %c48_127 = arith.constant 48 : index
      %c128_128 = arith.constant 128 : index
      %210 = vector.load %arg7[%c48_127, %c128_128] : memref<432x384xbf16, #tpu.memory_space<vmem>>, vector<16x128xbf16>
      tpu.vector_store %arg7[%c48_127, %c128_128], %208 {strides = array<i32>} : memref<432x384xbf16, #tpu.memory_space<vmem>>, vector<16x128xbf16>,
      %c47 = arith.constant 47 : index
      %c256_129 = arith.constant 256 : index
      %211 = vector.load %arg7[%c47, %c256_129] : memref<432x384xbf16, #tpu.memory_space<vmem>>, vector<16x128xbf16>
      tpu.vector_store %arg7[%c47, %c256_129], %208 {strides = array<i32>} : memref<432x384xbf16, #tpu.memory_space<vmem>>, vector<16x128xbf16>,
      %c0_130 = arith.constant 0 : index
      %c2_131 = arith.constant 2 : index
      %c0_132 = arith.constant 0 : index
      %c0_133 = arith.constant 0 : index
      %212 = vector.load %arg2[%c0_130, %c2_131, %c0_132, %c0_133] : memref<1x16x16x128xbf16, #tpu.memory_space<vmem>>, vector<1x1x16x128xbf16>
      %213 = vector.shape_cast %212 : vector<1x1x16x128xbf16> to vector<16x128xbf16>
      %c73 = arith.constant 73 : index
      %c0_134 = arith.constant 0 : index
      %214 = vector.load %arg7[%c73, %c0_134] : memref<432x384xbf16, #tpu.memory_space<vmem>>, vector<16x128xbf16>
      tpu.vector_store %arg7[%c73, %c0_134], %213 {strides = array<i32>} : memref<432x384xbf16, #tpu.memory_space<vmem>>, vector<16x128xbf16>,
      %c72_135 = arith.constant 72 : index
      %c128_136 = arith.constant 128 : index
      %215 = vector.load %arg7[%c72_135, %c128_136] : memref<432x384xbf16, #tpu.memory_space<vmem>>, vector<16x128xbf16>
      tpu.vector_store %arg7[%c72_135, %c128_136], %213 {strides = array<i32>} : memref<432x384xbf16, #tpu.memory_space<vmem>>, vector<16x128xbf16>,
      %c71 = arith.constant 71 : index
      %c256_137 = arith.constant 256 : index
      %216 = vector.load %arg7[%c71, %c256_137] : memref<432x384xbf16, #tpu.memory_space<vmem>>, vector<16x128xbf16>
      tpu.vector_store %arg7[%c71, %c256_137], %213 {strides = array<i32>} : memref<432x384xbf16, #tpu.memory_space<vmem>>, vector<16x128xbf16>,
      %c0_138 = arith.constant 0 : index
      %c3_139 = arith.constant 3 : index
      %c0_140 = arith.constant 0 : index
      %c0_141 = arith.constant 0 : index
      %217 = vector.load %arg2[%c0_138, %c3_139, %c0_140, %c0_141] : memref<1x16x16x128xbf16, #tpu.memory_space<vmem>>, vector<1x1x16x128xbf16>
      %218 = vector.shape_cast %217 : vector<1x1x16x128xbf16> to vector<16x128xbf16>
      %c97 = arith.constant 97 : index
      %c0_142 = arith.constant 0 : index
      %219 = vector.load %arg7[%c97, %c0_142] : memref<432x384xbf16, #tpu.memory_space<vmem>>, vector<16x128xbf16>
      tpu.vector_store %arg7[%c97, %c0_142], %218 {strides = array<i32>} : memref<432x384xbf16, #tpu.memory_space<vmem>>, vector<16x128xbf16>,
      %c96_143 = arith.constant 96 : index
      %c128_144 = arith.constant 128 : index
      %220 = vector.load %arg7[%c96_143, %c128_144] : memref<432x384xbf16, #tpu.memory_space<vmem>>, vector<16x128xbf16>
      tpu.vector_store %arg7[%c96_143, %c128_144], %218 {strides = array<i32>} : memref<432x384xbf16, #tpu.memory_space<vmem>>, vector<16x128xbf16>,
      %c95 = arith.constant 95 : index
      %c256_145 = arith.constant 256 : index
      %221 = vector.load %arg7[%c95, %c256_145] : memref<432x384xbf16, #tpu.memory_space<vmem>>, vector<16x128xbf16>
      tpu.vector_store %arg7[%c95, %c256_145], %218 {strides = array<i32>} : memref<432x384xbf16, #tpu.memory_space<vmem>>, vector<16x128xbf16>,
      %c0_146 = arith.constant 0 : index
      %c4_147 = arith.constant 4 : index
      %c0_148 = arith.constant 0 : index
      %c0_149 = arith.constant 0 : index
      %222 = vector.load %arg2[%c0_146, %c4_147, %c0_148, %c0_149] : memref<1x16x16x128xbf16, #tpu.memory_space<vmem>>, vector<1x1x16x128xbf16>
      %223 = vector.shape_cast %222 : vector<1x1x16x128xbf16> to vector<16x128xbf16>
      %c121 = arith.constant 121 : index
      %c0_150 = arith.constant 0 : index
      %224 = vector.load %arg7[%c121, %c0_150] : memref<432x384xbf16, #tpu.memory_space<vmem>>, vector<16x128xbf16>
      tpu.vector_store %arg7[%c121, %c0_150], %223 {strides = array<i32>} : memref<432x384xbf16, #tpu.memory_space<vmem>>, vector<16x128xbf16>,
      %c120_151 = arith.constant 120 : index
      %c128_152 = arith.constant 128 : index
      %225 = vector.load %arg7[%c120_151, %c128_152] : memref<432x384xbf16, #tpu.memory_space<vmem>>, vector<16x128xbf16>
      tpu.vector_store %arg7[%c120_151, %c128_152], %223 {strides = array<i32>} : memref<432x384xbf16, #tpu.memory_space<vmem>>, vector<16x128xbf16>,
      %c119 = arith.constant 119 : index
      %c256_153 = arith.constant 256 : index
      %226 = vector.load %arg7[%c119, %c256_153] : memref<432x384xbf16, #tpu.memory_space<vmem>>, vector<16x128xbf16>
      tpu.vector_store %arg7[%c119, %c256_153], %223 {strides = array<i32>} : memref<432x384xbf16, #tpu.memory_space<vmem>>, vector<16x128xbf16>,
      %c0_154 = arith.constant 0 : index
      %c5_155 = arith.constant 5 : index
      %c0_156 = arith.constant 0 : index
      %c0_157 = arith.constant 0 : index
      %227 = vector.load %arg2[%c0_154, %c5_155, %c0_156, %c0_157] : memref<1x16x16x128xbf16, #tpu.memory_space<vmem>>, vector<1x1x16x128xbf16>
      %228 = vector.shape_cast %227 : vector<1x1x16x128xbf16> to vector<16x128xbf16>
      %c145 = arith.constant 145 : index
      %c0_158 = arith.constant 0 : index
      %229 = vector.load %arg7[%c145, %c0_158] : memref<432x384xbf16, #tpu.memory_space<vmem>>, vector<16x128xbf16>
      tpu.vector_store %arg7[%c145, %c0_158], %228 {strides = array<i32>} : memref<432x384xbf16, #tpu.memory_space<vmem>>, vector<16x128xbf16>,
      %c144_159 = arith.constant 144 : index
      %c128_160 = arith.constant 128 : index
      %230 = vector.load %arg7[%c144_159, %c128_160] : memref<432x384xbf16, #tpu.memory_space<vmem>>, vector<16x128xbf16>
      tpu.vector_store %arg7[%c144_159, %c128_160], %228 {strides = array<i32>} : memref<432x384xbf16, #tpu.memory_space<vmem>>, vector<16x128xbf16>,
      %c143 = arith.constant 143 : index
      %c256_161 = arith.constant 256 : index
      %231 = vector.load %arg7[%c143, %c256_161] : memref<432x384xbf16, #tpu.memory_space<vmem>>, vector<16x128xbf16>
      tpu.vector_store %arg7[%c143, %c256_161], %228 {strides = array<i32>} : memref<432x384xbf16, #tpu.memory_space<vmem>>, vector<16x128xbf16>,
      %c0_162 = arith.constant 0 : index
      %c6_163 = arith.constant 6 : index
      %c0_164 = arith.constant 0 : index
      %c0_165 = arith.constant 0 : index
      %232 = vector.load %arg2[%c0_162, %c6_163, %c0_164, %c0_165] : memref<1x16x16x128xbf16, #tpu.memory_space<vmem>>, vector<1x1x16x128xbf16>
      %233 = vector.shape_cast %232 : vector<1x1x16x128xbf16> to vector<16x128xbf16>
      %c169 = arith.constant 169 : index
      %c0_166 = arith.constant 0 : index
      %234 = vector.load %arg7[%c169, %c0_166] : memref<432x384xbf16, #tpu.memory_space<vmem>>, vector<16x128xbf16>
      tpu.vector_store %arg7[%c169, %c0_166], %233 {strides = array<i32>} : memref<432x384xbf16, #tpu.memory_space<vmem>>, vector<16x128xbf16>,
      %c168_167 = arith.constant 168 : index
      %c128_168 = arith.constant 128 : index
      %235 = vector.load %arg7[%c168_167, %c128_168] : memref<432x384xbf16, #tpu.memory_space<vmem>>, vector<16x128xbf16>
      tpu.vector_store %arg7[%c168_167, %c128_168], %233 {strides = array<i32>} : memref<432x384xbf16, #tpu.memory_space<vmem>>, vector<16x128xbf16>,
      %c167 = arith.constant 167 : index
      %c256_169 = arith.constant 256 : index
      %236 = vector.load %arg7[%c167, %c256_169] : memref<432x384xbf16, #tpu.memory_space<vmem>>, vector<16x128xbf16>
      tpu.vector_store %arg7[%c167, %c256_169], %233 {strides = array<i32>} : memref<432x384xbf16, #tpu.memory_space<vmem>>, vector<16x128xbf16>,
      %c0_170 = arith.constant 0 : index
      %c7_171 = arith.constant 7 : index
      %c0_172 = arith.constant 0 : index
      %c0_173 = arith.constant 0 : index
      %237 = vector.load %arg2[%c0_170, %c7_171, %c0_172, %c0_173] : memref<1x16x16x128xbf16, #tpu.memory_space<vmem>>, vector<1x1x16x128xbf16>
      %238 = vector.shape_cast %237 : vector<1x1x16x128xbf16> to vector<16x128xbf16>
      %c193 = arith.constant 193 : index
      %c0_174 = arith.constant 0 : index
      %239 = vector.load %arg7[%c193, %c0_174] : memref<432x384xbf16, #tpu.memory_space<vmem>>, vector<16x128xbf16>
      tpu.vector_store %arg7[%c193, %c0_174], %238 {strides = array<i32>} : memref<432x384xbf16, #tpu.memory_space<vmem>>, vector<16x128xbf16>,
      %c192_175 = arith.constant 192 : index
      %c128_176 = arith.constant 128 : index
      %240 = vector.load %arg7[%c192_175, %c128_176] : memref<432x384xbf16, #tpu.memory_space<vmem>>, vector<16x128xbf16>
      tpu.vector_store %arg7[%c192_175, %c128_176], %238 {strides = array<i32>} : memref<432x384xbf16, #tpu.memory_space<vmem>>, vector<16x128xbf16>,
      %c191 = arith.constant 191 : index
      %c256_177 = arith.constant 256 : index
      %241 = vector.load %arg7[%c191, %c256_177] : memref<432x384xbf16, #tpu.memory_space<vmem>>, vector<16x128xbf16>
      tpu.vector_store %arg7[%c191, %c256_177], %238 {strides = array<i32>} : memref<432x384xbf16, #tpu.memory_space<vmem>>, vector<16x128xbf16>,
      %c0_178 = arith.constant 0 : index
      %c8_179 = arith.constant 8 : index
      %c0_180 = arith.constant 0 : index
      %c0_181 = arith.constant 0 : index
      %242 = vector.load %arg2[%c0_178, %c8_179, %c0_180, %c0_181] : memref<1x16x16x128xbf16, #tpu.memory_space<vmem>>, vector<1x1x16x128xbf16>
      %243 = vector.shape_cast %242 : vector<1x1x16x128xbf16> to vector<16x128xbf16>
      %c217 = arith.constant 217 : index
      %c0_182 = arith.constant 0 : index
      %244 = vector.load %arg7[%c217, %c0_182] : memref<432x384xbf16, #tpu.memory_space<vmem>>, vector<16x128xbf16>
      tpu.vector_store %arg7[%c217, %c0_182], %243 {strides = array<i32>} : memref<432x384xbf16, #tpu.memory_space<vmem>>, vector<16x128xbf16>,
      %c216_183 = arith.constant 216 : index
      %c128_184 = arith.constant 128 : index
      %245 = vector.load %arg7[%c216_183, %c128_184] : memref<432x384xbf16, #tpu.memory_space<vmem>>, vector<16x128xbf16>
      tpu.vector_store %arg7[%c216_183, %c128_184], %243 {strides = array<i32>} : memref<432x384xbf16, #tpu.memory_space<vmem>>, vector<16x128xbf16>,
      %c215 = arith.constant 215 : index
      %c256_185 = arith.constant 256 : index
      %246 = vector.load %arg7[%c215, %c256_185] : memref<432x384xbf16, #tpu.memory_space<vmem>>, vector<16x128xbf16>
      tpu.vector_store %arg7[%c215, %c256_185], %243 {strides = array<i32>} : memref<432x384xbf16, #tpu.memory_space<vmem>>, vector<16x128xbf16>,
      %c0_186 = arith.constant 0 : index
      %c9_187 = arith.constant 9 : index
      %c0_188 = arith.constant 0 : index
      %c0_189 = arith.constant 0 : index
      %247 = vector.load %arg2[%c0_186, %c9_187, %c0_188, %c0_189] : memref<1x16x16x128xbf16, #tpu.memory_space<vmem>>, vector<1x1x16x128xbf16>
      %248 = vector.shape_cast %247 : vector<1x1x16x128xbf16> to vector<16x128xbf16>
      %c241 = arith.constant 241 : index
      %c0_190 = arith.constant 0 : index
      %249 = vector.load %arg7[%c241, %c0_190] : memref<432x384xbf16, #tpu.memory_space<vmem>>, vector<16x128xbf16>
      tpu.vector_store %arg7[%c241, %c0_190], %248 {strides = array<i32>} : memref<432x384xbf16, #tpu.memory_space<vmem>>, vector<16x128xbf16>,
      %c240_191 = arith.constant 240 : index
      %c128_192 = arith.constant 128 : index
      %250 = vector.load %arg7[%c240_191, %c128_192] : memref<432x384xbf16, #tpu.memory_space<vmem>>, vector<16x128xbf16>
      tpu.vector_store %arg7[%c240_191, %c128_192], %248 {strides = array<i32>} : memref<432x384xbf16, #tpu.memory_space<vmem>>, vector<16x128xbf16>,
      %c239 = arith.constant 239 : index
      %c256_193 = arith.constant 256 : index
      %251 = vector.load %arg7[%c239, %c256_193] : memref<432x384xbf16, #tpu.memory_space<vmem>>, vector<16x128xbf16>
      tpu.vector_store %arg7[%c239, %c256_193], %248 {strides = array<i32>} : memref<432x384xbf16, #tpu.memory_space<vmem>>, vector<16x128xbf16>,
      %c0_194 = arith.constant 0 : index
      %c10_195 = arith.constant 10 : index
      %c0_196 = arith.constant 0 : index
      %c0_197 = arith.constant 0 : index
      %252 = vector.load %arg2[%c0_194, %c10_195, %c0_196, %c0_197] : memref<1x16x16x128xbf16, #tpu.memory_space<vmem>>, vector<1x1x16x128xbf16>
      %253 = vector.shape_cast %252 : vector<1x1x16x128xbf16> to vector<16x128xbf16>
      %c265 = arith.constant 265 : index
      %c0_198 = arith.constant 0 : index
      %254 = vector.load %arg7[%c265, %c0_198] : memref<432x384xbf16, #tpu.memory_space<vmem>>, vector<16x128xbf16>
      tpu.vector_store %arg7[%c265, %c0_198], %253 {strides = array<i32>} : memref<432x384xbf16, #tpu.memory_space<vmem>>, vector<16x128xbf16>,
      %c264_199 = arith.constant 264 : index
      %c128_200 = arith.constant 128 : index
      %255 = vector.load %arg7[%c264_199, %c128_200] : memref<432x384xbf16, #tpu.memory_space<vmem>>, vector<16x128xbf16>
      tpu.vector_store %arg7[%c264_199, %c128_200], %253 {strides = array<i32>} : memref<432x384xbf16, #tpu.memory_space<vmem>>, vector<16x128xbf16>,
      %c263 = arith.constant 263 : index
      %c256_201 = arith.constant 256 : index
      %256 = vector.load %arg7[%c263, %c256_201] : memref<432x384xbf16, #tpu.memory_space<vmem>>, vector<16x128xbf16>
      tpu.vector_store %arg7[%c263, %c256_201], %253 {strides = array<i32>} : memref<432x384xbf16, #tpu.memory_space<vmem>>, vector<16x128xbf16>,
      %c0_202 = arith.constant 0 : index
      %c11_203 = arith.constant 11 : index
      %c0_204 = arith.constant 0 : index
      %c0_205 = arith.constant 0 : index
      %257 = vector.load %arg2[%c0_202, %c11_203, %c0_204, %c0_205] : memref<1x16x16x128xbf16, #tpu.memory_space<vmem>>, vector<1x1x16x128xbf16>
      %258 = vector.shape_cast %257 : vector<1x1x16x128xbf16> to vector<16x128xbf16>
      %c289 = arith.constant 289 : index
      %c0_206 = arith.constant 0 : index
      %259 = vector.load %arg7[%c289, %c0_206] : memref<432x384xbf16, #tpu.memory_space<vmem>>, vector<16x128xbf16>
      tpu.vector_store %arg7[%c289, %c0_206], %258 {strides = array<i32>} : memref<432x384xbf16, #tpu.memory_space<vmem>>, vector<16x128xbf16>,
      %c288_207 = arith.constant 288 : index
      %c128_208 = arith.constant 128 : index
      %260 = vector.load %arg7[%c288_207, %c128_208] : memref<432x384xbf16, #tpu.memory_space<vmem>>, vector<16x128xbf16>
      tpu.vector_store %arg7[%c288_207, %c128_208], %258 {strides = array<i32>} : memref<432x384xbf16, #tpu.memory_space<vmem>>, vector<16x128xbf16>,
      %c287 = arith.constant 287 : index
      %c256_209 = arith.constant 256 : index
      %261 = vector.load %arg7[%c287, %c256_209] : memref<432x384xbf16, #tpu.memory_space<vmem>>, vector<16x128xbf16>
      tpu.vector_store %arg7[%c287, %c256_209], %258 {strides = array<i32>} : memref<432x384xbf16, #tpu.memory_space<vmem>>, vector<16x128xbf16>,
      %c0_210 = arith.constant 0 : index
      %c12_211 = arith.constant 12 : index
      %c0_212 = arith.constant 0 : index
      %c0_213 = arith.constant 0 : index
      %262 = vector.load %arg2[%c0_210, %c12_211, %c0_212, %c0_213] : memref<1x16x16x128xbf16, #tpu.memory_space<vmem>>, vector<1x1x16x128xbf16>
      %263 = vector.shape_cast %262 : vector<1x1x16x128xbf16> to vector<16x128xbf16>
      %c313 = arith.constant 313 : index
      %c0_214 = arith.constant 0 : index
      %264 = vector.load %arg7[%c313, %c0_214] : memref<432x384xbf16, #tpu.memory_space<vmem>>, vector<16x128xbf16>
      tpu.vector_store %arg7[%c313, %c0_214], %263 {strides = array<i32>} : memref<432x384xbf16, #tpu.memory_space<vmem>>, vector<16x128xbf16>,
      %c312_215 = arith.constant 312 : index
      %c128_216 = arith.constant 128 : index
      %265 = vector.load %arg7[%c312_215, %c128_216] : memref<432x384xbf16, #tpu.memory_space<vmem>>, vector<16x128xbf16>
      tpu.vector_store %arg7[%c312_215, %c128_216], %263 {strides = array<i32>} : memref<432x384xbf16, #tpu.memory_space<vmem>>, vector<16x128xbf16>,
      %c311 = arith.constant 311 : index
      %c256_217 = arith.constant 256 : index
      %266 = vector.load %arg7[%c311, %c256_217] : memref<432x384xbf16, #tpu.memory_space<vmem>>, vector<16x128xbf16>
      tpu.vector_store %arg7[%c311, %c256_217], %263 {strides = array<i32>} : memref<432x384xbf16, #tpu.memory_space<vmem>>, vector<16x128xbf16>,
      %c0_218 = arith.constant 0 : index
      %c13_219 = arith.constant 13 : index
      %c0_220 = arith.constant 0 : index
      %c0_221 = arith.constant 0 : index
      %267 = vector.load %arg2[%c0_218, %c13_219, %c0_220, %c0_221] : memref<1x16x16x128xbf16, #tpu.memory_space<vmem>>, vector<1x1x16x128xbf16>
      %268 = vector.shape_cast %267 : vector<1x1x16x128xbf16> to vector<16x128xbf16>
      %c337 = arith.constant 337 : index
      %c0_222 = arith.constant 0 : index
      %269 = vector.load %arg7[%c337, %c0_222] : memref<432x384xbf16, #tpu.memory_space<vmem>>, vector<16x128xbf16>
      tpu.vector_store %arg7[%c337, %c0_222], %268 {strides = array<i32>} : memref<432x384xbf16, #tpu.memory_space<vmem>>, vector<16x128xbf16>,
      %c336_223 = arith.constant 336 : index
      %c128_224 = arith.constant 128 : index
      %270 = vector.load %arg7[%c336_223, %c128_224] : memref<432x384xbf16, #tpu.memory_space<vmem>>, vector<16x128xbf16>
      tpu.vector_store %arg7[%c336_223, %c128_224], %268 {strides = array<i32>} : memref<432x384xbf16, #tpu.memory_space<vmem>>, vector<16x128xbf16>,
      %c335 = arith.constant 335 : index
      %c256_225 = arith.constant 256 : index
      %271 = vector.load %arg7[%c335, %c256_225] : memref<432x384xbf16, #tpu.memory_space<vmem>>, vector<16x128xbf16>
      tpu.vector_store %arg7[%c335, %c256_225], %268 {strides = array<i32>} : memref<432x384xbf16, #tpu.memory_space<vmem>>, vector<16x128xbf16>,
      %c0_226 = arith.constant 0 : index
      %c14_227 = arith.constant 14 : index
      %c0_228 = arith.constant 0 : index
      %c0_229 = arith.constant 0 : index
      %272 = vector.load %arg2[%c0_226, %c14_227, %c0_228, %c0_229] : memref<1x16x16x128xbf16, #tpu.memory_space<vmem>>, vector<1x1x16x128xbf16>
      %273 = vector.shape_cast %272 : vector<1x1x16x128xbf16> to vector<16x128xbf16>
      %c361 = arith.constant 361 : index
      %c0_230 = arith.constant 0 : index
      %274 = vector.load %arg7[%c361, %c0_230] : memref<432x384xbf16, #tpu.memory_space<vmem>>, vector<16x128xbf16>
      tpu.vector_store %arg7[%c361, %c0_230], %273 {strides = array<i32>} : memref<432x384xbf16, #tpu.memory_space<vmem>>, vector<16x128xbf16>,
      %c360_231 = arith.constant 360 : index
      %c128_232 = arith.constant 128 : index
      %275 = vector.load %arg7[%c360_231, %c128_232] : memref<432x384xbf16, #tpu.memory_space<vmem>>, vector<16x128xbf16>
      tpu.vector_store %arg7[%c360_231, %c128_232], %273 {strides = array<i32>} : memref<432x384xbf16, #tpu.memory_space<vmem>>, vector<16x128xbf16>,
      %c359 = arith.constant 359 : index
      %c256_233 = arith.constant 256 : index
      %276 = vector.load %arg7[%c359, %c256_233] : memref<432x384xbf16, #tpu.memory_space<vmem>>, vector<16x128xbf16>
      tpu.vector_store %arg7[%c359, %c256_233], %273 {strides = array<i32>} : memref<432x384xbf16, #tpu.memory_space<vmem>>, vector<16x128xbf16>,
      %c0_234 = arith.constant 0 : index
      %c15_235 = arith.constant 15 : index
      %c0_236 = arith.constant 0 : index
      %c0_237 = arith.constant 0 : index
      %277 = vector.load %arg2[%c0_234, %c15_235, %c0_236, %c0_237] : memref<1x16x16x128xbf16, #tpu.memory_space<vmem>>, vector<1x1x16x128xbf16>
      %278 = vector.shape_cast %277 : vector<1x1x16x128xbf16> to vector<16x128xbf16>
      %c385 = arith.constant 385 : index
      %c0_238 = arith.constant 0 : index
      %279 = vector.load %arg7[%c385, %c0_238] : memref<432x384xbf16, #tpu.memory_space<vmem>>, vector<16x128xbf16>
      tpu.vector_store %arg7[%c385, %c0_238], %278 {strides = array<i32>} : memref<432x384xbf16, #tpu.memory_space<vmem>>, vector<16x128xbf16>,
      %c384 = arith.constant 384 : index
      %c128_239 = arith.constant 128 : index
      %280 = vector.load %arg7[%c384, %c128_239] : memref<432x384xbf16, #tpu.memory_space<vmem>>, vector<16x128xbf16>
      tpu.vector_store %arg7[%c384, %c128_239], %278 {strides = array<i32>} : memref<432x384xbf16, #tpu.memory_space<vmem>>, vector<16x128xbf16>,
      %c383 = arith.constant 383 : index
      %c256_240 = arith.constant 256 : index
      %281 = vector.load %arg7[%c383, %c256_240] : memref<432x384xbf16, #tpu.memory_space<vmem>>, vector<16x128xbf16>
      tpu.vector_store %arg7[%c383, %c256_240], %278 {strides = array<i32>} : memref<432x384xbf16, #tpu.memory_space<vmem>>, vector<16x128xbf16>,
    } else {
    }
    %c0 = arith.constant 0 : index
    %c0_1 = arith.constant 0 : index
    %3 = vector.load %arg7[%c0, %c0_1] : memref<432x384xbf16, #tpu.memory_space<vmem>>, vector<384x384xbf16>
    %c0_2 = arith.constant 0 : index
    %c0_3 = arith.constant 0 : index
    %c0_4 = arith.constant 0 : index
    %4 = vector.load %arg3[%c0_2, %c0_3, %c0_4] : memref<3x384x128xbf16, #tpu.memory_space<vmem>>, vector<1x384x128xbf16>
    %5 = vector.shape_cast %4 : vector<1x384x128xbf16> to vector<384x128xbf16>
    %cst = arith.constant dense<0.000000e+00> : vector<384x128xf32>
    %6 = tpu.matmul %3, %5, %cst {dimension_numbers = #tpu.dot_dimension_numbers<[1], [0], [0], [1], [0, 0, 1, 1], [], []>} : vector<384x384xbf16>, vector<384x128xbf16>, vector<384x128xf32> -> vector<384x128xf32>
    %c0_5 = arith.constant 0 : index
    %c0_6 = arith.constant 0 : index
    %7 = vector.load %arg8[%c0_5, %c0_6] : memref<384x128xf32, #tpu.memory_space<vmem>>, vector<384x128xf32>
    tpu.vector_store %arg8[%c0_5, %c0_6], %6 {strides = array<i32>} : memref<384x128xf32, #tpu.memory_space<vmem>>, vector<384x128xf32>,
    %c0_7 = arith.constant 0 : index
    %c0_8 = arith.constant 0 : index
    %8 = vector.load %arg8[%c0_7, %c0_8] : memref<384x128xf32, #tpu.memory_space<vmem>>, vector<384x128xf32>
    %c24 = arith.constant 24 : index
    %c0_9 = arith.constant 0 : index
    %9 = vector.load %arg7[%c24, %c0_9] : memref<432x384xbf16, #tpu.memory_space<vmem>>, vector<384x384xbf16>
    %c1 = arith.constant 1 : index
    %c0_10 = arith.constant 0 : index
    %c0_11 = arith.constant 0 : index
    %10 = vector.load %arg3[%c1, %c0_10, %c0_11] : memref<3x384x128xbf16, #tpu.memory_space<vmem>>, vector<1x384x128xbf16>
    %11 = vector.shape_cast %10 : vector<1x384x128xbf16> to vector<384x128xbf16>
    %cst_12 = arith.constant dense<0.000000e+00> : vector<384x128xf32>
    %12 = tpu.matmul %9, %11, %cst_12 {dimension_numbers = #tpu.dot_dimension_numbers<[1], [0], [0], [1], [0, 0, 1, 1], [], []>} : vector<384x384xbf16>, vector<384x128xbf16>, vector<384x128xf32> -> vector<384x128xf32>
    %13 = arith.addf %8, %12 : vector<384x128xf32>
    %c0_13 = arith.constant 0 : index
    %c0_14 = arith.constant 0 : index
    %14 = vector.load %arg8[%c0_13, %c0_14] : memref<384x128xf32, #tpu.memory_space<vmem>>, vector<384x128xf32>
    tpu.vector_store %arg8[%c0_13, %c0_14], %13 {strides = array<i32>} : memref<384x128xf32, #tpu.memory_space<vmem>>, vector<384x128xf32>,
    %c0_15 = arith.constant 0 : index
    %c0_16 = arith.constant 0 : index
    %15 = vector.load %arg8[%c0_15, %c0_16] : memref<384x128xf32, #tpu.memory_space<vmem>>, vector<384x128xf32>
    %c48 = arith.constant 48 : index
    %c0_17 = arith.constant 0 : index
    %16 = vector.load %arg7[%c48, %c0_17] : memref<432x384xbf16, #tpu.memory_space<vmem>>, vector<384x384xbf16>
    %c2 = arith.constant 2 : index
    %c0_18 = arith.constant 0 : index
    %c0_19 = arith.constant 0 : index
    %17 = vector.load %arg3[%c2, %c0_18, %c0_19] : memref<3x384x128xbf16, #tpu.memory_space<vmem>>, vector<1x384x128xbf16>
    %18 = vector.shape_cast %17 : vector<1x384x128xbf16> to vector<384x128xbf16>
    %cst_20 = arith.constant dense<0.000000e+00> : vector<384x128xf32>
    %19 = tpu.matmul %16, %18, %cst_20 {dimension_numbers = #tpu.dot_dimension_numbers<[1], [0], [0], [1], [0, 0, 1, 1], [], []>} : vector<384x384xbf16>, vector<384x128xbf16>, vector<384x128xf32> -> vector<384x128xf32>
    %20 = arith.addf %15, %19 : vector<384x128xf32>
    %c0_21 = arith.constant 0 : index
    %c0_22 = arith.constant 0 : index
    %21 = vector.load %arg8[%c0_21, %c0_22] : memref<384x128xf32, #tpu.memory_space<vmem>>, vector<384x128xf32>
    tpu.vector_store %arg8[%c0_21, %c0_22], %20 {strides = array<i32>} : memref<384x128xf32, #tpu.memory_space<vmem>>, vector<384x128xf32>,
    %c0_23 = arith.constant 0 : index
    %c0_24 = arith.constant 0 : index
    %22 = vector.load %arg4[%c0_23, %c0_24] : memref<1x128xf32, #tpu.memory_space<vmem>>, vector<1x128xf32>
    %c0_25 = arith.constant 0 : index
    %c0_26 = arith.constant 0 : index
    %23 = vector.load %arg5[%c0_25, %c0_26] : memref<1x128xf32, #tpu.memory_space<vmem>>, vector<1x128xf32>
    %c0_27 = arith.constant 0 : index
    %c0_28 = arith.constant 0 : index
    %24 = vector.load %arg8[%c0_27, %c0_28] : memref<384x128xf32, #tpu.memory_space<vmem>>, vector<16x128xf32>
    %25 = vector.broadcast %22 : vector<1x128xf32> to vector<16x128xf32>
    %26 = arith.mulf %24, %25 : vector<16x128xf32>
    %27 = vector.broadcast %23 : vector<1x128xf32> to vector<16x128xf32>
    %28 = arith.addf %26, %27 : vector<16x128xf32>
    %cst_29 = arith.constant 0.000000e+00 : f32
    %29 = vector.broadcast %cst_29 : f32 to vector<16x128xf32>
    %30 = arith.maximumf %28, %29 : vector<16x128xf32>
    %31 = arith.truncf %30 : vector<16x128xf32> to vector<16x128xbf16>
    %c0_30 = arith.constant 0 : index
    %c0_31 = arith.constant 0 : index
    %c0_32 = arith.constant 0 : index
    %c0_33 = arith.constant 0 : index
    %32 = vector.load %arg6[%c0_30, %c0_31, %c0_32, %c0_33] : memref<1x16x16x128xbf16, #tpu.memory_space<vmem>>, vector<1x1x16x128xbf16>
    %33 = vector.shape_cast %32 : vector<1x1x16x128xbf16> to vector<16x128xbf16>
    %34 = vector.shape_cast %31 : vector<16x128xbf16> to vector<1x1x16x128xbf16>
    tpu.vector_store %arg6[%c0_30, %c0_31, %c0_32, %c0_33], %34 {strides = array<i32>} : memref<1x16x16x128xbf16, #tpu.memory_space<vmem>>, vector<1x1x16x128xbf16>,
    %c24_34 = arith.constant 24 : index
    %c0_35 = arith.constant 0 : index
    %35 = vector.load %arg8[%c24_34, %c0_35] : memref<384x128xf32, #tpu.memory_space<vmem>>, vector<16x128xf32>
    %36 = vector.broadcast %22 : vector<1x128xf32> to vector<16x128xf32>
    %37 = arith.mulf %35, %36 : vector<16x128xf32>
    %38 = vector.broadcast %23 : vector<1x128xf32> to vector<16x128xf32>
    %39 = arith.addf %37, %38 : vector<16x128xf32>
    %cst_36 = arith.constant 0.000000e+00 : f32
    %40 = vector.broadcast %cst_36 : f32 to vector<16x128xf32>
    %41 = arith.maximumf %39, %40 : vector<16x128xf32>
    %42 = arith.truncf %41 : vector<16x128xf32> to vector<16x128xbf16>
    %c0_37 = arith.constant 0 : index
    %c1_38 = arith.constant 1 : index
    %c0_39 = arith.constant 0 : index
    %c0_40 = arith.constant 0 : index
    %43 = vector.load %arg6[%c0_37, %c1_38, %c0_39, %c0_40] : memref<1x16x16x128xbf16, #tpu.memory_space<vmem>>, vector<1x1x16x128xbf16>
    %44 = vector.shape_cast %43 : vector<1x1x16x128xbf16> to vector<16x128xbf16>
    %45 = vector.shape_cast %42 : vector<16x128xbf16> to vector<1x1x16x128xbf16>
    tpu.vector_store %arg6[%c0_37, %c1_38, %c0_39, %c0_40], %45 {strides = array<i32>} : memref<1x16x16x128xbf16, #tpu.memory_space<vmem>>, vector<1x1x16x128xbf16>,
    %c48_41 = arith.constant 48 : index
    %c0_42 = arith.constant 0 : index
    %46 = vector.load %arg8[%c48_41, %c0_42] : memref<384x128xf32, #tpu.memory_space<vmem>>, vector<16x128xf32>
    %47 = vector.broadcast %22 : vector<1x128xf32> to vector<16x128xf32>
    %48 = arith.mulf %46, %47 : vector<16x128xf32>
    %49 = vector.broadcast %23 : vector<1x128xf32> to vector<16x128xf32>
    %50 = arith.addf %48, %49 : vector<16x128xf32>
    %cst_43 = arith.constant 0.000000e+00 : f32
    %51 = vector.broadcast %cst_43 : f32 to vector<16x128xf32>
    %52 = arith.maximumf %50, %51 : vector<16x128xf32>
    %53 = arith.truncf %52 : vector<16x128xf32> to vector<16x128xbf16>
    %c0_44 = arith.constant 0 : index
    %c2_45 = arith.constant 2 : index
    %c0_46 = arith.constant 0 : index
    %c0_47 = arith.constant 0 : index
    %54 = vector.load %arg6[%c0_44, %c2_45, %c0_46, %c0_47] : memref<1x16x16x128xbf16, #tpu.memory_space<vmem>>, vector<1x1x16x128xbf16>
    %55 = vector.shape_cast %54 : vector<1x1x16x128xbf16> to vector<16x128xbf16>
    %56 = vector.shape_cast %53 : vector<16x128xbf16> to vector<1x1x16x128xbf16>
    tpu.vector_store %arg6[%c0_44, %c2_45, %c0_46, %c0_47], %56 {strides = array<i32>} : memref<1x16x16x128xbf16, #tpu.memory_space<vmem>>, vector<1x1x16x128xbf16>,
    %c72 = arith.constant 72 : index
    %c0_48 = arith.constant 0 : index
    %57 = vector.load %arg8[%c72, %c0_48] : memref<384x128xf32, #tpu.memory_space<vmem>>, vector<16x128xf32>
    %58 = vector.broadcast %22 : vector<1x128xf32> to vector<16x128xf32>
    %59 = arith.mulf %57, %58 : vector<16x128xf32>
    %60 = vector.broadcast %23 : vector<1x128xf32> to vector<16x128xf32>
    %61 = arith.addf %59, %60 : vector<16x128xf32>
    %cst_49 = arith.constant 0.000000e+00 : f32
    %62 = vector.broadcast %cst_49 : f32 to vector<16x128xf32>
    %63 = arith.maximumf %61, %62 : vector<16x128xf32>
    %64 = arith.truncf %63 : vector<16x128xf32> to vector<16x128xbf16>
    %c0_50 = arith.constant 0 : index
    %c3 = arith.constant 3 : index
    %c0_51 = arith.constant 0 : index
    %c0_52 = arith.constant 0 : index
    %65 = vector.load %arg6[%c0_50, %c3, %c0_51, %c0_52] : memref<1x16x16x128xbf16, #tpu.memory_space<vmem>>, vector<1x1x16x128xbf16>
    %66 = vector.shape_cast %65 : vector<1x1x16x128xbf16> to vector<16x128xbf16>
    %67 = vector.shape_cast %64 : vector<16x128xbf16> to vector<1x1x16x128xbf16>
    tpu.vector_store %arg6[%c0_50, %c3, %c0_51, %c0_52], %67 {strides = array<i32>} : memref<1x16x16x128xbf16, #tpu.memory_space<vmem>>, vector<1x1x16x128xbf16>,
    %c96 = arith.constant 96 : index
    %c0_53 = arith.constant 0 : index
    %68 = vector.load %arg8[%c96, %c0_53] : memref<384x128xf32, #tpu.memory_space<vmem>>, vector<16x128xf32>
    %69 = vector.broadcast %22 : vector<1x128xf32> to vector<16x128xf32>
    %70 = arith.mulf %68, %69 : vector<16x128xf32>
    %71 = vector.broadcast %23 : vector<1x128xf32> to vector<16x128xf32>
    %72 = arith.addf %70, %71 : vector<16x128xf32>
    %cst_54 = arith.constant 0.000000e+00 : f32
    %73 = vector.broadcast %cst_54 : f32 to vector<16x128xf32>
    %74 = arith.maximumf %72, %73 : vector<16x128xf32>
    %75 = arith.truncf %74 : vector<16x128xf32> to vector<16x128xbf16>
    %c0_55 = arith.constant 0 : index
    %c4 = arith.constant 4 : index
    %c0_56 = arith.constant 0 : index
    %c0_57 = arith.constant 0 : index
    %76 = vector.load %arg6[%c0_55, %c4, %c0_56, %c0_57] : memref<1x16x16x128xbf16, #tpu.memory_space<vmem>>, vector<1x1x16x128xbf16>
    %77 = vector.shape_cast %76 : vector<1x1x16x128xbf16> to vector<16x128xbf16>
    %78 = vector.shape_cast %75 : vector<16x128xbf16> to vector<1x1x16x128xbf16>
    tpu.vector_store %arg6[%c0_55, %c4, %c0_56, %c0_57], %78 {strides = array<i32>} : memref<1x16x16x128xbf16, #tpu.memory_space<vmem>>, vector<1x1x16x128xbf16>,
    %c120 = arith.constant 120 : index
    %c0_58 = arith.constant 0 : index
    %79 = vector.load %arg8[%c120, %c0_58] : memref<384x128xf32, #tpu.memory_space<vmem>>, vector<16x128xf32>
    %80 = vector.broadcast %22 : vector<1x128xf32> to vector<16x128xf32>
    %81 = arith.mulf %79, %80 : vector<16x128xf32>
    %82 = vector.broadcast %23 : vector<1x128xf32> to vector<16x128xf32>
    %83 = arith.addf %81, %82 : vector<16x128xf32>
    %cst_59 = arith.constant 0.000000e+00 : f32
    %84 = vector.broadcast %cst_59 : f32 to vector<16x128xf32>
    %85 = arith.maximumf %83, %84 : vector<16x128xf32>
    %86 = arith.truncf %85 : vector<16x128xf32> to vector<16x128xbf16>
    %c0_60 = arith.constant 0 : index
    %c5 = arith.constant 5 : index
    %c0_61 = arith.constant 0 : index
    %c0_62 = arith.constant 0 : index
    %87 = vector.load %arg6[%c0_60, %c5, %c0_61, %c0_62] : memref<1x16x16x128xbf16, #tpu.memory_space<vmem>>, vector<1x1x16x128xbf16>
    %88 = vector.shape_cast %87 : vector<1x1x16x128xbf16> to vector<16x128xbf16>
    %89 = vector.shape_cast %86 : vector<16x128xbf16> to vector<1x1x16x128xbf16>
    tpu.vector_store %arg6[%c0_60, %c5, %c0_61, %c0_62], %89 {strides = array<i32>} : memref<1x16x16x128xbf16, #tpu.memory_space<vmem>>, vector<1x1x16x128xbf16>,
    %c144 = arith.constant 144 : index
    %c0_63 = arith.constant 0 : index
    %90 = vector.load %arg8[%c144, %c0_63] : memref<384x128xf32, #tpu.memory_space<vmem>>, vector<16x128xf32>
    %91 = vector.broadcast %22 : vector<1x128xf32> to vector<16x128xf32>
    %92 = arith.mulf %90, %91 : vector<16x128xf32>
    %93 = vector.broadcast %23 : vector<1x128xf32> to vector<16x128xf32>
    %94 = arith.addf %92, %93 : vector<16x128xf32>
    %cst_64 = arith.constant 0.000000e+00 : f32
    %95 = vector.broadcast %cst_64 : f32 to vector<16x128xf32>
    %96 = arith.maximumf %94, %95 : vector<16x128xf32>
    %97 = arith.truncf %96 : vector<16x128xf32> to vector<16x128xbf16>
    %c0_65 = arith.constant 0 : index
    %c6 = arith.constant 6 : index
    %c0_66 = arith.constant 0 : index
    %c0_67 = arith.constant 0 : index
    %98 = vector.load %arg6[%c0_65, %c6, %c0_66, %c0_67] : memref<1x16x16x128xbf16, #tpu.memory_space<vmem>>, vector<1x1x16x128xbf16>
    %99 = vector.shape_cast %98 : vector<1x1x16x128xbf16> to vector<16x128xbf16>
    %100 = vector.shape_cast %97 : vector<16x128xbf16> to vector<1x1x16x128xbf16>
    tpu.vector_store %arg6[%c0_65, %c6, %c0_66, %c0_67], %100 {strides = array<i32>} : memref<1x16x16x128xbf16, #tpu.memory_space<vmem>>, vector<1x1x16x128xbf16>,
    %c168 = arith.constant 168 : index
    %c0_68 = arith.constant 0 : index
    %101 = vector.load %arg8[%c168, %c0_68] : memref<384x128xf32, #tpu.memory_space<vmem>>, vector<16x128xf32>
    %102 = vector.broadcast %22 : vector<1x128xf32> to vector<16x128xf32>
    %103 = arith.mulf %101, %102 : vector<16x128xf32>
    %104 = vector.broadcast %23 : vector<1x128xf32> to vector<16x128xf32>
    %105 = arith.addf %103, %104 : vector<16x128xf32>
    %cst_69 = arith.constant 0.000000e+00 : f32
    %106 = vector.broadcast %cst_69 : f32 to vector<16x128xf32>
    %107 = arith.maximumf %105, %106 : vector<16x128xf32>
    %108 = arith.truncf %107 : vector<16x128xf32> to vector<16x128xbf16>
    %c0_70 = arith.constant 0 : index
    %c7 = arith.constant 7 : index
    %c0_71 = arith.constant 0 : index
    %c0_72 = arith.constant 0 : index
    %109 = vector.load %arg6[%c0_70, %c7, %c0_71, %c0_72] : memref<1x16x16x128xbf16, #tpu.memory_space<vmem>>, vector<1x1x16x128xbf16>
    %110 = vector.shape_cast %109 : vector<1x1x16x128xbf16> to vector<16x128xbf16>
    %111 = vector.shape_cast %108 : vector<16x128xbf16> to vector<1x1x16x128xbf16>
    tpu.vector_store %arg6[%c0_70, %c7, %c0_71, %c0_72], %111 {strides = array<i32>} : memref<1x16x16x128xbf16, #tpu.memory_space<vmem>>, vector<1x1x16x128xbf16>,
    %c192 = arith.constant 192 : index
    %c0_73 = arith.constant 0 : index
    %112 = vector.load %arg8[%c192, %c0_73] : memref<384x128xf32, #tpu.memory_space<vmem>>, vector<16x128xf32>
    %113 = vector.broadcast %22 : vector<1x128xf32> to vector<16x128xf32>
    %114 = arith.mulf %112, %113 : vector<16x128xf32>
    %115 = vector.broadcast %23 : vector<1x128xf32> to vector<16x128xf32>
    %116 = arith.addf %114, %115 : vector<16x128xf32>
    %cst_74 = arith.constant 0.000000e+00 : f32
    %117 = vector.broadcast %cst_74 : f32 to vector<16x128xf32>
    %118 = arith.maximumf %116, %117 : vector<16x128xf32>
    %119 = arith.truncf %118 : vector<16x128xf32> to vector<16x128xbf16>
    %c0_75 = arith.constant 0 : index
    %c8 = arith.constant 8 : index
    %c0_76 = arith.constant 0 : index
    %c0_77 = arith.constant 0 : index
    %120 = vector.load %arg6[%c0_75, %c8, %c0_76, %c0_77] : memref<1x16x16x128xbf16, #tpu.memory_space<vmem>>, vector<1x1x16x128xbf16>
    %121 = vector.shape_cast %120 : vector<1x1x16x128xbf16> to vector<16x128xbf16>
    %122 = vector.shape_cast %119 : vector<16x128xbf16> to vector<1x1x16x128xbf16>
    tpu.vector_store %arg6[%c0_75, %c8, %c0_76, %c0_77], %122 {strides = array<i32>} : memref<1x16x16x128xbf16, #tpu.memory_space<vmem>>, vector<1x1x16x128xbf16>,
    %c216 = arith.constant 216 : index
    %c0_78 = arith.constant 0 : index
    %123 = vector.load %arg8[%c216, %c0_78] : memref<384x128xf32, #tpu.memory_space<vmem>>, vector<16x128xf32>
    %124 = vector.broadcast %22 : vector<1x128xf32> to vector<16x128xf32>
    %125 = arith.mulf %123, %124 : vector<16x128xf32>
    %126 = vector.broadcast %23 : vector<1x128xf32> to vector<16x128xf32>
    %127 = arith.addf %125, %126 : vector<16x128xf32>
    %cst_79 = arith.constant 0.000000e+00 : f32
    %128 = vector.broadcast %cst_79 : f32 to vector<16x128xf32>
    %129 = arith.maximumf %127, %128 : vector<16x128xf32>
    %130 = arith.truncf %129 : vector<16x128xf32> to vector<16x128xbf16>
    %c0_80 = arith.constant 0 : index
    %c9 = arith.constant 9 : index
    %c0_81 = arith.constant 0 : index
    %c0_82 = arith.constant 0 : index
    %131 = vector.load %arg6[%c0_80, %c9, %c0_81, %c0_82] : memref<1x16x16x128xbf16, #tpu.memory_space<vmem>>, vector<1x1x16x128xbf16>
    %132 = vector.shape_cast %131 : vector<1x1x16x128xbf16> to vector<16x128xbf16>
    %133 = vector.shape_cast %130 : vector<16x128xbf16> to vector<1x1x16x128xbf16>
    tpu.vector_store %arg6[%c0_80, %c9, %c0_81, %c0_82], %133 {strides = array<i32>} : memref<1x16x16x128xbf16, #tpu.memory_space<vmem>>, vector<1x1x16x128xbf16>,
    %c240 = arith.constant 240 : index
    %c0_83 = arith.constant 0 : index
    %134 = vector.load %arg8[%c240, %c0_83] : memref<384x128xf32, #tpu.memory_space<vmem>>, vector<16x128xf32>
    %135 = vector.broadcast %22 : vector<1x128xf32> to vector<16x128xf32>
    %136 = arith.mulf %134, %135 : vector<16x128xf32>
    %137 = vector.broadcast %23 : vector<1x128xf32> to vector<16x128xf32>
    %138 = arith.addf %136, %137 : vector<16x128xf32>
    %cst_84 = arith.constant 0.000000e+00 : f32
    %139 = vector.broadcast %cst_84 : f32 to vector<16x128xf32>
    %140 = arith.maximumf %138, %139 : vector<16x128xf32>
    %141 = arith.truncf %140 : vector<16x128xf32> to vector<16x128xbf16>
    %c0_85 = arith.constant 0 : index
    %c10 = arith.constant 10 : index
    %c0_86 = arith.constant 0 : index
    %c0_87 = arith.constant 0 : index
    %142 = vector.load %arg6[%c0_85, %c10, %c0_86, %c0_87] : memref<1x16x16x128xbf16, #tpu.memory_space<vmem>>, vector<1x1x16x128xbf16>
    %143 = vector.shape_cast %142 : vector<1x1x16x128xbf16> to vector<16x128xbf16>
    %144 = vector.shape_cast %141 : vector<16x128xbf16> to vector<1x1x16x128xbf16>
    tpu.vector_store %arg6[%c0_85, %c10, %c0_86, %c0_87], %144 {strides = array<i32>} : memref<1x16x16x128xbf16, #tpu.memory_space<vmem>>, vector<1x1x16x128xbf16>,
    %c264 = arith.constant 264 : index
    %c0_88 = arith.constant 0 : index
    %145 = vector.load %arg8[%c264, %c0_88] : memref<384x128xf32, #tpu.memory_space<vmem>>, vector<16x128xf32>
    %146 = vector.broadcast %22 : vector<1x128xf32> to vector<16x128xf32>
    %147 = arith.mulf %145, %146 : vector<16x128xf32>
    %148 = vector.broadcast %23 : vector<1x128xf32> to vector<16x128xf32>
    %149 = arith.addf %147, %148 : vector<16x128xf32>
    %cst_89 = arith.constant 0.000000e+00 : f32
    %150 = vector.broadcast %cst_89 : f32 to vector<16x128xf32>
    %151 = arith.maximumf %149, %150 : vector<16x128xf32>
    %152 = arith.truncf %151 : vector<16x128xf32> to vector<16x128xbf16>
    %c0_90 = arith.constant 0 : index
    %c11 = arith.constant 11 : index
    %c0_91 = arith.constant 0 : index
    %c0_92 = arith.constant 0 : index
    %153 = vector.load %arg6[%c0_90, %c11, %c0_91, %c0_92] : memref<1x16x16x128xbf16, #tpu.memory_space<vmem>>, vector<1x1x16x128xbf16>
    %154 = vector.shape_cast %153 : vector<1x1x16x128xbf16> to vector<16x128xbf16>
    %155 = vector.shape_cast %152 : vector<16x128xbf16> to vector<1x1x16x128xbf16>
    tpu.vector_store %arg6[%c0_90, %c11, %c0_91, %c0_92], %155 {strides = array<i32>} : memref<1x16x16x128xbf16, #tpu.memory_space<vmem>>, vector<1x1x16x128xbf16>,
    %c288 = arith.constant 288 : index
    %c0_93 = arith.constant 0 : index
    %156 = vector.load %arg8[%c288, %c0_93] : memref<384x128xf32, #tpu.memory_space<vmem>>, vector<16x128xf32>
    %157 = vector.broadcast %22 : vector<1x128xf32> to vector<16x128xf32>
    %158 = arith.mulf %156, %157 : vector<16x128xf32>
    %159 = vector.broadcast %23 : vector<1x128xf32> to vector<16x128xf32>
    %160 = arith.addf %158, %159 : vector<16x128xf32>
    %cst_94 = arith.constant 0.000000e+00 : f32
    %161 = vector.broadcast %cst_94 : f32 to vector<16x128xf32>
    %162 = arith.maximumf %160, %161 : vector<16x128xf32>
    %163 = arith.truncf %162 : vector<16x128xf32> to vector<16x128xbf16>
    %c0_95 = arith.constant 0 : index
    %c12 = arith.constant 12 : index
    %c0_96 = arith.constant 0 : index
    %c0_97 = arith.constant 0 : index
    %164 = vector.load %arg6[%c0_95, %c12, %c0_96, %c0_97] : memref<1x16x16x128xbf16, #tpu.memory_space<vmem>>, vector<1x1x16x128xbf16>
    %165 = vector.shape_cast %164 : vector<1x1x16x128xbf16> to vector<16x128xbf16>
    %166 = vector.shape_cast %163 : vector<16x128xbf16> to vector<1x1x16x128xbf16>
    tpu.vector_store %arg6[%c0_95, %c12, %c0_96, %c0_97], %166 {strides = array<i32>} : memref<1x16x16x128xbf16, #tpu.memory_space<vmem>>, vector<1x1x16x128xbf16>,
    %c312 = arith.constant 312 : index
    %c0_98 = arith.constant 0 : index
    %167 = vector.load %arg8[%c312, %c0_98] : memref<384x128xf32, #tpu.memory_space<vmem>>, vector<16x128xf32>
    %168 = vector.broadcast %22 : vector<1x128xf32> to vector<16x128xf32>
    %169 = arith.mulf %167, %168 : vector<16x128xf32>
    %170 = vector.broadcast %23 : vector<1x128xf32> to vector<16x128xf32>
    %171 = arith.addf %169, %170 : vector<16x128xf32>
    %cst_99 = arith.constant 0.000000e+00 : f32
    %172 = vector.broadcast %cst_99 : f32 to vector<16x128xf32>
    %173 = arith.maximumf %171, %172 : vector<16x128xf32>
    %174 = arith.truncf %173 : vector<16x128xf32> to vector<16x128xbf16>
    %c0_100 = arith.constant 0 : index
    %c13 = arith.constant 13 : index
    %c0_101 = arith.constant 0 : index
    %c0_102 = arith.constant 0 : index
    %175 = vector.load %arg6[%c0_100, %c13, %c0_101, %c0_102] : memref<1x16x16x128xbf16, #tpu.memory_space<vmem>>, vector<1x1x16x128xbf16>
    %176 = vector.shape_cast %175 : vector<1x1x16x128xbf16> to vector<16x128xbf16>
    %177 = vector.shape_cast %174 : vector<16x128xbf16> to vector<1x1x16x128xbf16>
    tpu.vector_store %arg6[%c0_100, %c13, %c0_101, %c0_102], %177 {strides = array<i32>} : memref<1x16x16x128xbf16, #tpu.memory_space<vmem>>, vector<1x1x16x128xbf16>,
    %c336 = arith.constant 336 : index
    %c0_103 = arith.constant 0 : index
    %178 = vector.load %arg8[%c336, %c0_103] : memref<384x128xf32, #tpu.memory_space<vmem>>, vector<16x128xf32>
    %179 = vector.broadcast %22 : vector<1x128xf32> to vector<16x128xf32>
    %180 = arith.mulf %178, %179 : vector<16x128xf32>
    %181 = vector.broadcast %23 : vector<1x128xf32> to vector<16x128xf32>
    %182 = arith.addf %180, %181 : vector<16x128xf32>
    %cst_104 = arith.constant 0.000000e+00 : f32
    %183 = vector.broadcast %cst_104 : f32 to vector<16x128xf32>
    %184 = arith.maximumf %182, %183 : vector<16x128xf32>
    %185 = arith.truncf %184 : vector<16x128xf32> to vector<16x128xbf16>
    %c0_105 = arith.constant 0 : index
    %c14 = arith.constant 14 : index
    %c0_106 = arith.constant 0 : index
    %c0_107 = arith.constant 0 : index
    %186 = vector.load %arg6[%c0_105, %c14, %c0_106, %c0_107] : memref<1x16x16x128xbf16, #tpu.memory_space<vmem>>, vector<1x1x16x128xbf16>
    %187 = vector.shape_cast %186 : vector<1x1x16x128xbf16> to vector<16x128xbf16>
    %188 = vector.shape_cast %185 : vector<16x128xbf16> to vector<1x1x16x128xbf16>
    tpu.vector_store %arg6[%c0_105, %c14, %c0_106, %c0_107], %188 {strides = array<i32>} : memref<1x16x16x128xbf16, #tpu.memory_space<vmem>>, vector<1x1x16x128xbf16>,
    %c360 = arith.constant 360 : index
    %c0_108 = arith.constant 0 : index
    %189 = vector.load %arg8[%c360, %c0_108] : memref<384x128xf32, #tpu.memory_space<vmem>>, vector<16x128xf32>
    %190 = vector.broadcast %22 : vector<1x128xf32> to vector<16x128xf32>
    %191 = arith.mulf %189, %190 : vector<16x128xf32>
    %192 = vector.broadcast %23 : vector<1x128xf32> to vector<16x128xf32>
    %193 = arith.addf %191, %192 : vector<16x128xf32>
    %cst_109 = arith.constant 0.000000e+00 : f32
    %194 = vector.broadcast %cst_109 : f32 to vector<16x128xf32>
    %195 = arith.maximumf %193, %194 : vector<16x128xf32>
    %196 = arith.truncf %195 : vector<16x128xf32> to vector<16x128xbf16>
    %c0_110 = arith.constant 0 : index
    %c15 = arith.constant 15 : index
    %c0_111 = arith.constant 0 : index
    %c0_112 = arith.constant 0 : index
    %197 = vector.load %arg6[%c0_110, %c15, %c0_111, %c0_112] : memref<1x16x16x128xbf16, #tpu.memory_space<vmem>>, vector<1x1x16x128xbf16>
    %198 = vector.shape_cast %197 : vector<1x1x16x128xbf16> to vector<16x128xbf16>
    %199 = vector.shape_cast %196 : vector<16x128xbf16> to vector<1x1x16x128xbf16>
    tpu.vector_store %arg6[%c0_110, %c15, %c0_111, %c0_112], %199 {strides = array<i32>} : memref<1x16x16x128xbf16, #tpu.memory_space<vmem>>, vector<1x1x16x128xbf16>,
    return
  }
  func.func @transform_0(%arg0: i32, %arg1: i32) -> (i32, i32, i32, i32) {
    %c0_i32 = arith.constant 0 : i32
    %c0_i32_0 = arith.constant 0 : i32
    %c0_i32_1 = arith.constant 0 : i32
    %c0_i32_2 = arith.constant 0 : i32
    return %arg0, %c0_i32, %c0_i32_0, %c0_i32_1 : i32, i32, i32, i32
  }
  func.func @transform_1(%arg0: i32, %arg1: i32) -> (i32, i32, i32) {
    %c0_i32 = arith.constant 0 : i32
    %c0_i32_0 = arith.constant 0 : i32
    %c0_i32_1 = arith.constant 0 : i32
    return %c0_i32, %c0_i32_0, %arg1 : i32, i32, i32
  }
  func.func @transform_2(%arg0: i32, %arg1: i32) -> (i32, i32) {
    %c0_i32 = arith.constant 0 : i32
    %c0_i32_0 = arith.constant 0 : i32
    return %c0_i32, %arg1 : i32, i32
  }
  func.func @transform_3(%arg0: i32, %arg1: i32) -> (i32, i32) {
    %c0_i32 = arith.constant 0 : i32
    %c0_i32_0 = arith.constant 0 : i32
    return %c0_i32, %arg1 : i32, i32
  }
  func.func @transform_4(%arg0: i32, %arg1: i32) -> (i32, i32, i32, i32) {
    %c0_i32 = arith.constant 0 : i32
    %c0_i32_0 = arith.constant 0 : i32
    %c0_i32_1 = arith.constant 0 : i32
    return %arg0, %c0_i32, %c0_i32_0, %arg1 : i32, i32, i32, i32
  }
}

module attributes {stable_mosaic.version = 11 : i64} {
  func.func @_apply_gate_residual_kernel(%arg0: i32, %arg1: i32, %arg2: memref<1x1x128xf32, #tpu.memory_space<vmem>>, %arg3: memref<1x256x128xbf16, #tpu.memory_space<vmem>>, %arg4: memref<1x256x128xbf16, #tpu.memory_space<vmem>>, %arg5: memref<1x16x256xf32, #tpu.memory_space<vmem>>) attributes {dimension_semantics = [#tpu.dimension_semantics<parallel>, #tpu.dimension_semantics<parallel>], iteration_bounds = array<i64: 2, 1>, scalar_prefetch = 0 : i64, scratch_operands = 0 : i64, tpu.core_type = #tpu.core_type<tc>, window_params = [{transform_indices = @transform_0, window_bounds = array<i64: 1, 1, 128>}, {transform_indices = @transform_1, window_bounds = array<i64: 1, 256, 128>}, {transform_indices = @transform_2, window_bounds = array<i64: 1, 256, 128>}, {transform_indices = @transform_3, window_bounds = array<i64: 1, 16, 256>}]} {
    %c0 = arith.constant 0 : index
    %c0_0 = arith.constant 0 : index
    %c0_1 = arith.constant 0 : index
    %0 = vector.load %arg2[%c0, %c0_0, %c0_1] : memref<1x1x128xf32, #tpu.memory_space<vmem>>, vector<1x1x128xf32>
    %1 = vector.shape_cast %0 : vector<1x1x128xf32> to vector<1x128xf32>
    %c0_2 = arith.constant 0 : index
    %c0_3 = arith.constant 0 : index
    %c0_4 = arith.constant 0 : index
    %2 = vector.load %arg3[%c0_2, %c0_3, %c0_4] : memref<1x256x128xbf16, #tpu.memory_space<vmem>>, vector<1x256x128xbf16>
    %3 = vector.shape_cast %2 : vector<1x256x128xbf16> to vector<256x128xbf16>
    %4 = arith.extf %3 : vector<256x128xbf16> to vector<256x128xf32>
    %cst = arith.constant 1.000000e+00 : f32
    %5 = vector.broadcast %cst : f32 to vector<1x128xf32>
    %6 = arith.addf %5, %1 : vector<1x128xf32>
    %7 = vector.broadcast %6 : vector<1x128xf32> to vector<256x128xf32>
    %8 = arith.mulf %4, %7 : vector<256x128xf32>
    %c0_5 = arith.constant 0 : index
    %c0_6 = arith.constant 0 : index
    %c0_7 = arith.constant 0 : index
    %9 = vector.load %arg4[%c0_5, %c0_6, %c0_7] : memref<1x256x128xbf16, #tpu.memory_space<vmem>>, vector<1x256x128xbf16>
    %10 = vector.shape_cast %9 : vector<1x256x128xbf16> to vector<256x128xbf16>
    %11 = arith.extf %10 : vector<256x128xbf16> to vector<256x128xf32>
    %12 = arith.addf %8, %11 : vector<256x128xf32>
    %cst_8 = arith.constant 0.000000e+00 : f32
    %13 = vector.broadcast %cst_8 : f32 to vector<256x128xf32>
    %14 = arith.maximumf %12, %13 : vector<256x128xf32>
    %15 = tpu.transpose %14, [1, 0] : vector<256x128xf32> -> vector<128x256xf32>
    %16 = vector.extract_strided_slice %15 {offsets = [0, 0], sizes = [16, 256], strides = [1, 1]} : vector<128x256xf32> to vector<16x256xf32>
    %c0_9 = arith.constant 0 : index
    %c0_10 = arith.constant 0 : index
    %c0_11 = arith.constant 0 : index
    %17 = vector.load %arg5[%c0_9, %c0_10, %c0_11] : memref<1x16x256xf32, #tpu.memory_space<vmem>>, vector<1x16x256xf32>
    %18 = vector.shape_cast %17 : vector<1x16x256xf32> to vector<16x256xf32>
    %19 = vector.shape_cast %16 : vector<16x256xf32> to vector<1x16x256xf32>
    tpu.vector_store %arg5[%c0_9, %c0_10, %c0_11], %19 {strides = array<i32>} : memref<1x16x256xf32, #tpu.memory_space<vmem>>, vector<1x16x256xf32>,
    return
  }
  func.func @transform_0(%arg0: i32, %arg1: i32) -> (i32, i32, i32) {
    %c0_i32 = arith.constant 0 : i32
    %c0_i32_0 = arith.constant 0 : i32
    %c0_i32_1 = arith.constant 0 : i32
    return %arg0, %c0_i32, %c0_i32_0 : i32, i32, i32
  }
  func.func @transform_1(%arg0: i32, %arg1: i32) -> (i32, i32, i32) {
    %c0_i32 = arith.constant 0 : i32
    %c0_i32_0 = arith.constant 0 : i32
    return %arg0, %arg1, %c0_i32 : i32, i32, i32
  }
  func.func @transform_2(%arg0: i32, %arg1: i32) -> (i32, i32, i32) {
    %c0_i32 = arith.constant 0 : i32
    %c0_i32_0 = arith.constant 0 : i32
    return %arg0, %arg1, %c0_i32 : i32, i32, i32
  }
  func.func @transform_3(%arg0: i32, %arg1: i32) -> (i32, i32, i32) {
    %c0_i32 = arith.constant 0 : i32
    %c0_i32_0 = arith.constant 0 : i32
    return %arg0, %c0_i32, %arg1 : i32, i32, i32
  }
}

module attributes {stable_mosaic.version = 11 : i64} {
  func.func @_conv3_gap_gate_kernel(%arg0: i32, %arg1: i32, %arg2: memref<1x256x128xbf16, #tpu.memory_space<vmem>>, %arg3: memref<128x128xbf16, #tpu.memory_space<vmem>>, %arg4: memref<1x128xf32, #tpu.memory_space<vmem>>, %arg5: memref<1x128xf32, #tpu.memory_space<vmem>>, %arg6: memref<128x128xf32, #tpu.memory_space<vmem>>, %arg7: memref<1x128xf32, #tpu.memory_space<vmem>>, %arg8: memref<128x128xf32, #tpu.memory_space<vmem>>, %arg9: memref<1x128xf32, #tpu.memory_space<vmem>>, %arg10: memref<1x256x128xbf16, #tpu.memory_space<vmem>>, %arg11: memref<1x1x128xf32, #tpu.memory_space<vmem>>, %arg12: memref<1x128xf32, #tpu.memory_space<vmem>>) attributes {dimension_semantics = [#tpu.dimension_semantics<parallel>, #tpu.dimension_semantics<arbitrary>], iteration_bounds = array<i64: 2, 1>, scalar_prefetch = 0 : i64, scratch_operands = 1 : i64, tpu.core_type = #tpu.core_type<tc>, window_params = [{transform_indices = @transform_0, window_bounds = array<i64: 1, 256, 128>}, {pipeline_mode = #tpu.pipeline_mode<synchronous>, transform_indices = @transform_1, window_bounds = array<i64: 128, 128>}, {pipeline_mode = #tpu.pipeline_mode<synchronous>, transform_indices = @transform_2, window_bounds = array<i64: 1, 128>}, {pipeline_mode = #tpu.pipeline_mode<synchronous>, transform_indices = @transform_3, window_bounds = array<i64: 1, 128>}, {pipeline_mode = #tpu.pipeline_mode<synchronous>, transform_indices = @transform_4, window_bounds = array<i64: 128, 128>}, {pipeline_mode = #tpu.pipeline_mode<synchronous>, transform_indices = @transform_5, window_bounds = array<i64: 1, 128>}, {pipeline_mode = #tpu.pipeline_mode<synchronous>, transform_indices = @transform_6, window_bounds = array<i64: 128, 128>}, {pipeline_mode = #tpu.pipeline_mode<synchronous>, transform_indices = @transform_7, window_bounds = array<i64: 1, 128>}, {transform_indices = @transform_8, window_bounds = array<i64: 1, 256, 128>}, {transform_indices = @transform_9, window_bounds = array<i64: 1, 1, 128>}]} {
    %c0 = arith.constant 0 : index
    %c0_0 = arith.constant 0 : index
    %c0_1 = arith.constant 0 : index
    %0 = vector.load %arg2[%c0, %c0_0, %c0_1] : memref<1x256x128xbf16, #tpu.memory_space<vmem>>, vector<1x256x128xbf16>
    %1 = vector.shape_cast %0 : vector<1x256x128xbf16> to vector<256x128xbf16>
    %c0_2 = arith.constant 0 : index
    %c0_3 = arith.constant 0 : index
    %2 = vector.load %arg3[%c0_2, %c0_3] : memref<128x128xbf16, #tpu.memory_space<vmem>>, vector<128x128xbf16>
    %cst = arith.constant dense<0.000000e+00> : vector<256x128xf32>
    %3 = tpu.matmul %1, %2, %cst {dimension_numbers = #tpu.dot_dimension_numbers<[1], [0], [0], [1], [0, 0, 1, 1], [], []>} : vector<256x128xbf16>, vector<128x128xbf16>, vector<256x128xf32> -> vector<256x128xf32>
    %c0_4 = arith.constant 0 : index
    %c0_5 = arith.constant 0 : index
    %4 = vector.load %arg4[%c0_4, %c0_5] : memref<1x128xf32, #tpu.memory_space<vmem>>, vector<1x128xf32>
    %5 = vector.broadcast %4 : vector<1x128xf32> to vector<256x128xf32>
    %6 = arith.mulf %3, %5 : vector<256x128xf32>
    %c0_6 = arith.constant 0 : index
    %c0_7 = arith.constant 0 : index
    %7 = vector.load %arg5[%c0_6, %c0_7] : memref<1x128xf32, #tpu.memory_space<vmem>>, vector<1x128xf32>
    %8 = vector.broadcast %7 : vector<1x128xf32> to vector<256x128xf32>
    %9 = arith.addf %6, %8 : vector<256x128xf32>
    %10 = arith.truncf %9 : vector<256x128xf32> to vector<256x128xbf16>
    %c0_8 = arith.constant 0 : index
    %c0_9 = arith.constant 0 : index
    %c0_10 = arith.constant 0 : index
    %11 = vector.load %arg10[%c0_8, %c0_9, %c0_10] : memref<1x256x128xbf16, #tpu.memory_space<vmem>>, vector<1x256x128xbf16>
    %12 = vector.shape_cast %11 : vector<1x256x128xbf16> to vector<256x128xbf16>
    %13 = vector.shape_cast %10 : vector<256x128xbf16> to vector<1x256x128xbf16>
    tpu.vector_store %arg10[%c0_8, %c0_9, %c0_10], %13 {strides = array<i32>} : memref<1x256x128xbf16, #tpu.memory_space<vmem>>, vector<1x256x128xbf16>,
    %c0_i32 = arith.constant 0 : i32
    %14 = arith.cmpi eq, %arg1, %c0_i32 : i32
    %15 = arith.extui %14 : i1 to i32
    %c0_i32_11 = arith.constant 0 : i32
    %16 = arith.cmpi ne, %15, %c0_i32_11 : i32
    scf.if %16 {
      %cst_20 = arith.constant 0.000000e+00 : f32
      %27 = vector.broadcast %cst_20 : f32 to vector<1x128xf32>
      %c0_21 = arith.constant 0 : index
      %c0_22 = arith.constant 0 : index
      %28 = vector.load %arg12[%c0_21, %c0_22] : memref<1x128xf32, #tpu.memory_space<vmem>>, vector<1x128xf32>
      tpu.vector_store %arg12[%c0_21, %c0_22], %27 {strides = array<i32>} : memref<1x128xf32, #tpu.memory_space<vmem>>, vector<1x128xf32>,
      %cst_23 = arith.constant 0.000000e+00 : f32
      %29 = vector.broadcast %cst_23 : f32 to vector<1x1x128xf32>
      %c0_24 = arith.constant 0 : index
      %c0_25 = arith.constant 0 : index
      %c0_26 = arith.constant 0 : index
      %30 = vector.load %arg11[%c0_24, %c0_25, %c0_26] : memref<1x1x128xf32, #tpu.memory_space<vmem>>, vector<1x1x128xf32>
      tpu.vector_store %arg11[%c0_24, %c0_25, %c0_26], %29 {strides = array<i32>} : memref<1x1x128xf32, #tpu.memory_space<vmem>>, vector<1x1x128xf32>,
    } else {
    }
    %c0_12 = arith.constant 0 : index
    %c0_13 = arith.constant 0 : index
    %17 = vector.load %arg12[%c0_12, %c0_13] : memref<1x128xf32, #tpu.memory_space<vmem>>, vector<1x128xf32>
    %cst_14 = arith.constant dense<0.000000e+00> : vector<128xf32>
    %18 = vector.multi_reduction <add>, %9, %cst_14 [0] : vector<256x128xf32> to vector<128xf32>
    %19 = vector.shape_cast %18 : vector<128xf32> to vector<1x128xf32>
    %cst_15 = arith.constant 3.906250e-03 : f32
    %20 = vector.broadcast %cst_15 : f32 to vector<1x128xf32>
    %21 = arith.mulf %19, %20 : vector<1x128xf32>
    %22 = arith.addf %17, %21 : vector<1x128xf32>
    %c0_16 = arith.constant 0 : index
    %c0_17 = arith.constant 0 : index
    %23 = vector.load %arg12[%c0_16, %c0_17] : memref<1x128xf32, #tpu.memory_space<vmem>>, vector<1x128xf32>
    tpu.vector_store %arg12[%c0_16, %c0_17], %22 {strides = array<i32>} : memref<1x128xf32, #tpu.memory_space<vmem>>, vector<1x128xf32>,
    %c0_i32_18 = arith.constant 0 : i32
    %24 = arith.cmpi eq, %arg1, %c0_i32_18 : i32
    %25 = arith.extui %24 : i1 to i32
    %c0_i32_19 = arith.constant 0 : i32
    %26 = arith.cmpi ne, %25, %c0_i32_19 : i32
    scf.if %26 {
      %c0_20 = arith.constant 0 : index
      %c0_21 = arith.constant 0 : index
      %27 = vector.load %arg12[%c0_20, %c0_21] : memref<1x128xf32, #tpu.memory_space<vmem>>, vector<1x128xf32>
      %c0_22 = arith.constant 0 : index
      %c0_23 = arith.constant 0 : index
      %28 = vector.load %arg6[%c0_22, %c0_23] : memref<128x128xf32, #tpu.memory_space<vmem>>, vector<128x128xf32>
      %cst_24 = arith.constant dense<0.000000e+00> : vector<1x128xf32>
      %29 = tpu.matmul %27, %28, %cst_24 {dimension_numbers = #tpu.dot_dimension_numbers<[1], [0], [0], [1], [0, 0, 1, 1], [], []>} : vector<1x128xf32>, vector<128x128xf32>, vector<1x128xf32> -> vector<1x128xf32>
      %c0_25 = arith.constant 0 : index
      %c0_26 = arith.constant 0 : index
      %30 = vector.load %arg7[%c0_25, %c0_26] : memref<1x128xf32, #tpu.memory_space<vmem>>, vector<1x128xf32>
      %31 = arith.addf %29, %30 : vector<1x128xf32>
      %cst_27 = arith.constant 5.000000e-01 : f32
      %32 = vector.broadcast %cst_27 : f32 to vector<1x128xf32>
      %33 = arith.mulf %32, %31 : vector<1x128xf32>
      %cst_28 = arith.constant 4.471500e-02 : f32
      %34 = vector.broadcast %cst_28 : f32 to vector<1x128xf32>
      %35 = arith.mulf %34, %31 : vector<1x128xf32>
      %36 = arith.mulf %35, %31 : vector<1x128xf32>
      %37 = arith.mulf %36, %31 : vector<1x128xf32>
      %38 = arith.addf %31, %37 : vector<1x128xf32>
      %cst_29 = arith.constant 0.797884583 : f32
      %39 = vector.broadcast %cst_29 : f32 to vector<1x128xf32>
      %40 = arith.mulf %39, %38 : vector<1x128xf32>
      %41 = math.tanh %40 : vector<1x128xf32>
      %cst_30 = arith.constant 1.000000e+00 : f32
      %42 = vector.broadcast %cst_30 : f32 to vector<1x128xf32>
      %43 = arith.addf %42, %41 : vector<1x128xf32>
      %44 = arith.mulf %33, %43 : vector<1x128xf32>
      %c0_31 = arith.constant 0 : index
      %c0_32 = arith.constant 0 : index
      %45 = vector.load %arg8[%c0_31, %c0_32] : memref<128x128xf32, #tpu.memory_space<vmem>>, vector<128x128xf32>
      %cst_33 = arith.constant dense<0.000000e+00> : vector<1x128xf32>
      %46 = tpu.matmul %44, %45, %cst_33 {dimension_numbers = #tpu.dot_dimension_numbers<[1], [0], [0], [1], [0, 0, 1, 1], [], []>} : vector<1x128xf32>, vector<128x128xf32>, vector<1x128xf32> -> vector<1x128xf32>
      %c0_34 = arith.constant 0 : index
      %c0_35 = arith.constant 0 : index
      %47 = vector.load %arg9[%c0_34, %c0_35] : memref<1x128xf32, #tpu.memory_space<vmem>>, vector<1x128xf32>
      %48 = arith.addf %46, %47 : vector<1x128xf32>
      %49 = arith.negf %48 : vector<1x128xf32>
      %50 = math.exp %49 : vector<1x128xf32>
      %cst_36 = arith.constant 1.000000e+00 : f32
      %51 = vector.broadcast %cst_36 : f32 to vector<1x128xf32>
      %52 = arith.addf %51, %50 : vector<1x128xf32>
      %53 = arith.divf %51, %52 : vector<1x128xf32>
      %c0_37 = arith.constant 0 : index
      %c0_38 = arith.constant 0 : index
      %c0_39 = arith.constant 0 : index
      %54 = vector.load %arg11[%c0_37, %c0_38, %c0_39] : memref<1x1x128xf32, #tpu.memory_space<vmem>>, vector<1x1x128xf32>
      %55 = vector.shape_cast %54 : vector<1x1x128xf32> to vector<1x128xf32>
      %56 = vector.shape_cast %53 : vector<1x128xf32> to vector<1x1x128xf32>
      tpu.vector_store %arg11[%c0_37, %c0_38, %c0_39], %56 {strides = array<i32>} : memref<1x1x128xf32, #tpu.memory_space<vmem>>, vector<1x1x128xf32>,
    } else {
    }
    return
  }
  func.func @transform_0(%arg0: i32, %arg1: i32) -> (i32, i32, i32) {
    %c0_i32 = arith.constant 0 : i32
    %c0_i32_0 = arith.constant 0 : i32
    return %arg0, %arg1, %c0_i32 : i32, i32, i32
  }
  func.func @transform_1(%arg0: i32, %arg1: i32) -> (i32, i32) {
    %c0_i32 = arith.constant 0 : i32
    %c0_i32_0 = arith.constant 0 : i32
    %c0_i32_1 = arith.constant 0 : i32
    return %c0_i32, %c0_i32_0 : i32, i32
  }
  func.func @transform_2(%arg0: i32, %arg1: i32) -> (i32, i32) {
    %c0_i32 = arith.constant 0 : i32
    %c0_i32_0 = arith.constant 0 : i32
    %c0_i32_1 = arith.constant 0 : i32
    return %c0_i32, %c0_i32_0 : i32, i32
  }
  func.func @transform_3(%arg0: i32, %arg1: i32) -> (i32, i32) {
    %c0_i32 = arith.constant 0 : i32
    %c0_i32_0 = arith.constant 0 : i32
    %c0_i32_1 = arith.constant 0 : i32
    return %c0_i32, %c0_i32_0 : i32, i32
  }
  func.func @transform_4(%arg0: i32, %arg1: i32) -> (i32, i32) {
    %c0_i32 = arith.constant 0 : i32
    %c0_i32_0 = arith.constant 0 : i32
    %c0_i32_1 = arith.constant 0 : i32
    return %c0_i32, %c0_i32_0 : i32, i32
  }
  func.func @transform_5(%arg0: i32, %arg1: i32) -> (i32, i32) {
    %c0_i32 = arith.constant 0 : i32
    %c0_i32_0 = arith.constant 0 : i32
    %c0_i32_1 = arith.constant 0 : i32
    return %c0_i32, %c0_i32_0 : i32, i32
  }
  func.func @transform_6(%arg0: i32, %arg1: i32) -> (i32, i32) {
    %c0_i32 = arith.constant 0 : i32
    %c0_i32_0 = arith.constant 0 : i32
    %c0_i32_1 = arith.constant 0 : i32
    return %c0_i32, %c0_i32_0 : i32, i32
  }
  func.func @transform_7(%arg0: i32, %arg1: i32) -> (i32, i32) {
    %c0_i32 = arith.constant 0 : i32
    %c0_i32_0 = arith.constant 0 : i32
    %c0_i32_1 = arith.constant 0 : i32
    return %c0_i32, %c0_i32_0 : i32, i32
  }
  func.func @transform_8(%arg0: i32, %arg1: i32) -> (i32, i32, i32) {
    %c0_i32 = arith.constant 0 : i32
    %c0_i32_0 = arith.constant 0 : i32
    return %arg0, %arg1, %c0_i32 : i32, i32, i32
  }
  func.func @transform_9(%arg0: i32, %arg1: i32) -> (i32, i32, i32) {
    %c0_i32 = arith.constant 0 : i32
    %c0_i32_0 = arith.constant 0 : i32
    %c0_i32_1 = arith.constant 0 : i32
    return %arg0, %c0_i32, %c0_i32_0 : i32, i32, i32
  }
}

</mosaic_0001>

<bundles_post_ra>
// kernel: se_bottleneck_forward.7
= control target key start
LH: loop header
LB: loop body
LE: loop exit
PB: predicated region body
PF: predicated region fallthrough
CT: control target
= control target key end

     0   :  { %s916_s12 = smov 0   ;;  %s918_s13 = smov 0   ;;  %s1030_s0 = inlined_call_operand.vmem [shape: f32[2,1,128], index: 0, kind: input, shape index: {}]   ;;  %s1031_s1 = inlined_call_operand.vmem [shape: bf16[2,256,128], index: 1, kind: input, shape index: {}]   ;;  %s1032_s2 = inlined_call_operand.vmem [shape: bf16[2,256,128], index: 2, kind: input, shape index: {}]   ;;  %s1033_s3 = inlined_call_operand.vmem [shape: f32[2,16,256], index: 3, kind: output, shape index: {}]  }
   0x1   :  { %s920_s14 = smov 0  }
   0x2 LB: > { %s25_s15 = sadd.s32 1, %s890_s13  ;;  %p678_p0 = scmp.ge.s32.totalorder %s894_s14, 1  ;;  %s894_s14 = sphi %s920_s14, %s13_s14   ;;  %s890_s13 = sphi %s918_s13, %s1035_s13   ;;  %s886_s12 = sphi %s916_s12, %s1034_s12  }
   0x3   : > { %p27_p1 = scmp.ge.s32.totalorder %s25_s15, 2  ;;  %p183_p2 = scmp.lt.s32.totalorder %s894_s14, 3 }
   0x5   : > { %s1037_s15 = smov (%p27_p1, %s25_s15), 0  ;;  %p184_p3 = pnand %p678_p0, %p183_p2 }
   0x6   : > { %p227_p4 = scmp.lt.s32.totalorder (!%p184_p3), %s886_s12, 1  ;;  %v327_v0 = vlaneseq (!%p184_p3) }
   0x7   : > { %187 = sbr.rel (%p184_p3) target bundleno = 162 (0xa2), region = 32 }
   0x8   : > { %v328_v1 = vshrl.u32 (!%p184_p3), %v327_v0, 7 }
   0xa   : > { %v329_v2 = vsub.s32 (!%p184_p3), 0, %v328_v1 }
   0xe   : > { %s1039_s12 = smov (!%p227_p4, %s886_s12), 1 }
   0xf   : > { %s229_s18 = scalar_lea.vmem %s1030_s0, %s1039_s12  ;;  %s687_s19 = sshll.u32 %s1039_s12, 7 }
  0x10   : > { %s944_s22 = scalar_lea.vmem %s1031_s1, %s687_s19  ;;  %s949_s25 = scalar_lea.vmem %s1032_s2, %s687_s19  ;;  %v260_v3 = vld [vmem:[%s229_s18] sm:$0x1] }
  0x11   : > { %v825_v4 = vld [vmem:[%s944_s22 + $0x40] sm:$0xff]   ;;  %v325_v5 = vadd.f32 1.0, %v260_v3  ;;  %v826_v13 = vld [vmem:[%s944_s22 + $0x48] sm:$0xff]   ;;  %v827_v37 = vld [vmem:[%s944_s22 + $0x50] sm:$0xff]   ;;  %s689_s26 = sshll.u32 %s1039_s12, 5 }
  0x12   : > { %v840_v6 = vld [vmem:[%s949_s25 + $0x40] sm:$0xff]   ;;  %v724_v8 = vunpack.c.l.bf16 %v825_v4  ;;  %v725_v12 = vunpack.c.h.bf16 %v825_v4  ;;  %v841_v14 = vld [vmem:[%s949_s25 + $0x48] sm:$0xff]   ;;  %v728_v22 = vunpack.c.l.bf16 %v826_v13  ;;  %v729_v32 = vunpack.c.h.bf16 %v826_v13  ;;  %v819_v38 = vld [vmem:[%s944_s22 + $0x10] sm:$0xff]   ;;  %s258_s29 = scalar_lea.vmem %s1033_s3, %s689_s26 }
  0x13   : > { %v691_v7 = vld [vmem:[%s944_s22] sm:$0xff]   ;;  %v788_v9 = vunpack.c.l.bf16 %v840_v6  ;;  %v957_v15 = vrot.slane %v325_v5, %v329_v2  ;;  %v789_v17 = vunpack.c.h.bf16 %v840_v6  ;;  %v818_v19 = vld [vmem:[%s944_s22 + $0x8] sm:$0xff]   ;;  %v792_v23 = vunpack.c.l.bf16 %v841_v14  ;;  %v842_v47 = vld [vmem:[%s949_s25 + $0x50] sm:$0xff]  }
  0x14   : > { %v692_v10 = vunpack.c.l.bf16 %v691_v7  ;;  %v755_v11 = vld [vmem:[%s949_s25] sm:$0xff]   ;;  %v693_v18 = vunpack.c.h.bf16 %v691_v7  ;;  %v833_v20 = vld [vmem:[%s949_s25 + $0x8] sm:$0xff]   ;;  %v696_v24 = vunpack.c.l.bf16 %v818_v19  ;;  %v793_v45 = vunpack.c.h.bf16 %v841_v14  ;;  %v834_v52 = vld [vmem:[%s949_s25 + $0x10] sm:$0xff]  }
  0x15   : > { %v756_v16 = vunpack.c.l.bf16 %v755_v11  ;;  %v757_v21 = vunpack.c.h.bf16 %v755_v11  ;;  %v348_v25 = vmul.f32 %v724_v8, %v957_v15  ;;  %v349_v27 = vmul.f32 %v725_v12, %v957_v15  ;;  %v828_v0 = vld [vmem:[%s944_s22 + $0x58] sm:$0xff]  }
  0x16   : > { %v332_v26 = vmul.f32 %v692_v10, %v957_v15  ;;  %v333_v28 = vmul.f32 %v693_v18, %v957_v15  ;;  %v350_v29 = vmul.f32 %v728_v22, %v957_v15  ;;  %v334_v30 = vmul.f32 %v696_v24, %v957_v15  ;;  %v820_v1 = vld [vmem:[%s944_s22 + $0x18] sm:$0xff]  }
  0x17   : > { %v760_v31 = vunpack.c.l.bf16 %v833_v20  ;;  %v444_v33 = vadd.f32 %v788_v9, %v348_v25  ;;  %v445_v35 = vadd.f32 %v789_v17, %v349_v27  ;;  %v351_v44 = vmul.f32 %v729_v32, %v957_v15  ;;  %v843_v9 = vld [vmem:[%s949_s25 + $0x58] sm:$0xff]   ;;  %v844_v32 = vld [vmem:[%s949_s25 + $0x60] sm:$0xff]  }
  0x18   : > { %v428_v34 = vadd.f32 %v756_v16, %v332_v26  ;;  %v429_v36 = vadd.f32 %v757_v21, %v333_v28  ;;  %v446_v41 = vadd.f32 %v792_v23, %v350_v29  ;;  %v697_v46 = vunpack.c.h.bf16 %v818_v19  ;;  %v835_v13 = vld [vmem:[%s949_s25 + $0x18] sm:$0xff]   ;;  %v829_v21 = vld [vmem:[%s944_s22 + $0x60] sm:$0xff]  }
  0x19   : > { %v476_v39 = vmax.f32 %v444_v33, 0.0  ;;  %v430_v42 = vadd.f32 %v760_v31, %v334_v30  ;;  %v477_v43 = vmax.f32 %v445_v35, 0.0  ;;  %v761_v49 = vunpack.c.h.bf16 %v833_v20  ;;  %v821_v26 = vld [vmem:[%s944_s22 + $0x20] sm:$0xff]  }
  0x1a   : > { %v460_v40 = vmax.f32 %v428_v34, 0.0  ;;  %v461_v48 = vmax.f32 %v429_v36, 0.0  ;;  %v732_v50 = vunpack.c.l.bf16 %v827_v37  ;;  %v700_v51 = vunpack.c.l.bf16 %v819_v38 }
  0x1b   : > { %524 = vxpose.xlu1.b32.start [1/16] (narrow) %v476_v39, 16  ;;  %v335_v53 = vmul.f32 %v697_v46, %v957_v15  ;;  %v796_v54 = vunpack.c.l.bf16 %v842_v47  ;;  %v733_v55 = vunpack.c.h.bf16 %v827_v37  ;;  %v764_v58 = vunpack.c.l.bf16 %v834_v52 }
  0x1c   : > { %492 = vxpose.xlu0.b32.start [1/16] (narrow) %v460_v40, 16  ;;  %v352_v56 = vmul.f32 %v732_v50, %v957_v15  ;;  %v336_v57 = vmul.f32 %v700_v51, %v957_v15  ;;  %v701_v59 = vunpack.c.h.bf16 %v819_v38  ;;  %v478_v60 = vmax.f32 %v446_v41, 0.0  ;;  %v836_v38 = vld [vmem:[%s949_s25 + $0x20] sm:$0xff]   ;;  %v822_v50 = vld [vmem:[%s944_s22 + $0x28] sm:$0xff]  }
  0x1d   : > { %v462_v61 = vmax.f32 %v430_v42, 0.0  ;;  %v447_v62 = vadd.f32 %v793_v45, %v351_v44  ;;  %v431_v63 = vadd.f32 %v761_v49, %v335_v53  ;;  %v353_v2 = vmul.f32 %v733_v55, %v957_v15  ;;  %v830_v49 = vld [vmem:[%s944_s22 + $0x68] sm:$0xff]  }
  0x1e   : > { %v797_v3 = vunpack.c.h.bf16 %v842_v47  ;;  %v765_v4 = vunpack.c.h.bf16 %v834_v52  ;;  %v448_v5 = vadd.f32 %v796_v54, %v352_v56  ;;  %v432_v6 = vadd.f32 %v764_v58, %v336_v57 }
  0x1f   : > { %525 = vxpose.xlu1.b32.cont [2/16] (narrow) %v477_v43, 16  ;;  %v337_v7 = vmul.f32 %v701_v59, %v957_v15  ;;  %v736_v8 = vunpack.c.l.bf16 %v828_v0  ;;  %v479_v10 = vmax.f32 %v447_v62, 0.0  ;;  %v463_v11 = vmax.f32 %v431_v63, 0.0  ;;  %v837_v62 = vld [vmem:[%s949_s25 + $0x28] sm:$0xff]  }
  0x20   : > { %493 = vxpose.xlu0.b32.cont [2/16] (narrow) %v461_v48, 16  ;;  %v704_v12 = vunpack.c.l.bf16 %v820_v1  ;;  %v449_v14 = vadd.f32 %v797_v3, %v353_v2  ;;  %v800_v16 = vunpack.c.l.bf16 %v843_v9  ;;  %v480_v17 = vmax.f32 %v448_v5, 0.0  ;;  %v831_v5 = vld [vmem:[%s944_s22 + $0x70] sm:$0xff]  }
  0x21   : > { %v464_v18 = vmax.f32 %v432_v6, 0.0  ;;  %v433_v19 = vadd.f32 %v765_v4, %v337_v7  ;;  %v354_v20 = vmul.f32 %v736_v8, %v957_v15  ;;  %v768_v23 = vunpack.c.l.bf16 %v835_v13 }
  0x22   : > { %v338_v22 = vmul.f32 %v704_v12, %v957_v15  ;;  %v737_v24 = vunpack.c.h.bf16 %v828_v0  ;;  %v705_v25 = vunpack.c.h.bf16 %v820_v1  ;;  %v481_v27 = vmax.f32 %v449_v14, 0.0 }
  0x23   : > { %526 = vxpose.xlu1.b32.cont [3/16] (narrow) %v478_v60, 16  ;;  %v740_v28 = vunpack.c.l.bf16 %v829_v21  ;;  %v465_v29 = vmax.f32 %v433_v19, 0.0  ;;  %v450_v30 = vadd.f32 %v800_v16, %v354_v20  ;;  %v801_v31 = vunpack.c.h.bf16 %v843_v9  ;;  %v845_v60 = vld [vmem:[%s949_s25 + $0x68] sm:$0xff]  }
  0x24   : > { %494 = vxpose.xlu0.b32.cont [3/16] (narrow) %v462_v61, 16  ;;  %v708_v33 = vunpack.c.l.bf16 %v821_v26  ;;  %v434_v34 = vadd.f32 %v768_v23, %v338_v22  ;;  %v355_v35 = vmul.f32 %v737_v24, %v957_v15  ;;  %v339_v36 = vmul.f32 %v705_v25, %v957_v15  ;;  %v838_v23 = vld [vmem:[%s949_s25 + $0x30] sm:$0xff]  }
  0x25   : > { %v769_v37 = vunpack.c.h.bf16 %v835_v13  ;;  %v356_v39 = vmul.f32 %v740_v28, %v957_v15  ;;  %v804_v40 = vunpack.c.l.bf16 %v844_v32  ;;  %v741_v41 = vunpack.c.h.bf16 %v829_v21 }
  0x26   : > { %v340_v42 = vmul.f32 %v708_v33, %v957_v15  ;;  %v772_v43 = vunpack.c.l.bf16 %v836_v38  ;;  %v709_v44 = vunpack.c.h.bf16 %v821_v26  ;;  %v482_v45 = vmax.f32 %v450_v30, 0.0 }
  0x27   : > { %527 = vxpose.xlu1.b32.cont [4/16] (narrow) %v479_v10, 16  ;;  %v466_v46 = vmax.f32 %v434_v34, 0.0  ;;  %v451_v47 = vadd.f32 %v801_v31, %v355_v35  ;;  %v435_v48 = vadd.f32 %v769_v37, %v339_v36  ;;  %v452_v51 = vadd.f32 %v804_v40, %v356_v39  ;;  %v823_v10 = vld [vmem:[%s944_s22 + $0x30] sm:$0xff]   ;;  %v832_v34 = vld [vmem:[%s944_s22 + $0x78] sm:$0xff]  }
  0x28   : > { %495 = vxpose.xlu0.b32.cont [4/16] (narrow) %v463_v11, 16  ;;  %v357_v52 = vmul.f32 %v741_v41, %v957_v15  ;;  %v805_v53 = vunpack.c.h.bf16 %v844_v32  ;;  %v436_v54 = vadd.f32 %v772_v43, %v340_v42  ;;  %v341_v55 = vmul.f32 %v709_v44, %v957_v15  ;;  %v824_v35 = vld [vmem:[%s944_s22 + $0x38] sm:$0xff]  }
  0x29   : > { %v773_v56 = vunpack.c.h.bf16 %v836_v38  ;;  %v744_v57 = vunpack.c.l.bf16 %v830_v49  ;;  %v483_v58 = vmax.f32 %v451_v47, 0.0  ;;  %v467_v59 = vmax.f32 %v435_v48, 0.0  ;;  %v839_v47 = vld [vmem:[%s949_s25 + $0x38] sm:$0xff]  }
  0x2a   : > { %v712_v61 = vunpack.c.l.bf16 %v822_v50  ;;  %v484_v63 = vmax.f32 %v452_v51, 0.0  ;;  %v453_v0 = vadd.f32 %v805_v53, %v357_v52  ;;  %v468_v1 = vmax.f32 %v436_v54, 0.0 }
  0x2b   : > { %528 = vxpose.xlu1.b32.cont [5/16] (narrow) %v480_v17, 16  ;;  %v437_v2 = vadd.f32 %v773_v56, %v341_v55  ;;  %v358_v3 = vmul.f32 %v744_v57, %v957_v15  ;;  %v808_v4 = vunpack.c.l.bf16 %v845_v60  ;;  %v776_v7 = vunpack.c.l.bf16 %v837_v62  ;;  %v846_v17 = vld [vmem:[%s949_s25 + $0x70] sm:$0xff]  }
  0x2c   : > { %496 = vxpose.xlu0.b32.cont [5/16] (narrow) %v464_v18, 16  ;;  %v342_v6 = vmul.f32 %v712_v61, %v957_v15  ;;  %v745_v8 = vunpack.c.h.bf16 %v830_v49  ;;  %v713_v9 = vunpack.c.h.bf16 %v822_v50  ;;  %v485_v11 = vmax.f32 %v453_v0, 0.0 }
  0x2d   : > { %v748_v12 = vunpack.c.l.bf16 %v831_v5  ;;  %v469_v13 = vmax.f32 %v437_v2, 0.0  ;;  %v454_v14 = vadd.f32 %v808_v4, %v358_v3  ;;  %v809_v16 = vunpack.c.h.bf16 %v845_v60 }
  0x2e   : > { %v716_v18 = vunpack.c.l.bf16 %v823_v10  ;;  %v438_v19 = vadd.f32 %v776_v7, %v342_v6  ;;  %v359_v20 = vmul.f32 %v745_v8, %v957_v15  ;;  %v343_v21 = vmul.f32 %v713_v9, %v957_v15 }
  0x2f   : > { %529 = vxpose.xlu1.b32.cont [6/16] (narrow) %v481_v27, 16  ;;  %v777_v22 = vunpack.c.h.bf16 %v837_v62  ;;  %v360_v24 = vmul.f32 %v748_v12, %v957_v15  ;;  %v812_v25 = vunpack.c.l.bf16 %v846_v17  ;;  %v749_v26 = vunpack.c.h.bf16 %v831_v5 }
  0x30   : > { %497 = vxpose.xlu0.b32.cont [6/16] (narrow) %v465_v29, 16  ;;  %v344_v27 = vmul.f32 %v716_v18, %v957_v15  ;;  %v780_v28 = vunpack.c.l.bf16 %v838_v23  ;;  %v717_v29 = vunpack.c.h.bf16 %v823_v10  ;;  %v486_v30 = vmax.f32 %v454_v14, 0.0 }
  0x31   : > { %v470_v31 = vmax.f32 %v438_v19, 0.0  ;;  %v455_v32 = vadd.f32 %v809_v16, %v359_v20  ;;  %v439_v33 = vadd.f32 %v777_v22, %v343_v21  ;;  %v456_v36 = vadd.f32 %v812_v25, %v360_v24 }
  0x32   : > { %v361_v37 = vmul.f32 %v749_v26, %v957_v15  ;;  %v813_v38 = vunpack.c.h.bf16 %v846_v17  ;;  %v440_v39 = vadd.f32 %v780_v28, %v344_v27  ;;  %v345_v40 = vmul.f32 %v717_v29, %v957_v15 }
  0x33   : > { %530 = vxpose.xlu1.b32.cont [7/16] (narrow) %v482_v45, 16  ;;  %v781_v41 = vunpack.c.h.bf16 %v838_v23  ;;  %v752_v42 = vunpack.c.l.bf16 %v832_v34  ;;  %v487_v43 = vmax.f32 %v455_v32, 0.0  ;;  %v471_v44 = vmax.f32 %v439_v33, 0.0  ;;  %v847_v45 = vld [vmem:[%s949_s25 + $0x78] sm:$0xff]  }
  0x34   : > { %498 = vxpose.xlu0.b32.cont [7/16] (narrow) %v466_v46, 16  ;;  %v720_v46 = vunpack.c.l.bf16 %v824_v35  ;;  %v488_v48 = vmax.f32 %v456_v36, 0.0  ;;  %v457_v49 = vadd.f32 %v813_v38, %v361_v37  ;;  %v472_v50 = vmax.f32 %v440_v39, 0.0 }
  0x35   : > { %v441_v51 = vadd.f32 %v781_v41, %v345_v40  ;;  %v362_v52 = vmul.f32 %v752_v42, %v957_v15  ;;  %v816_v53 = vunpack.c.l.bf16 %v847_v45  ;;  %v784_v55 = vunpack.c.l.bf16 %v839_v47 }
  0x36   : > { %v346_v54 = vmul.f32 %v720_v46, %v957_v15  ;;  %v753_v56 = vunpack.c.h.bf16 %v832_v34  ;;  %v721_v57 = vunpack.c.h.bf16 %v824_v35  ;;  %v817_v61 = vunpack.c.h.bf16 %v847_v45 }
  0x37   : > { %531 = vxpose.xlu1.b32.cont [8/16] (narrow) %v483_v58, 16  ;;  %v489_v58 = vmax.f32 %v457_v49, 0.0  ;;  %v458_v60 = vadd.f32 %v816_v53, %v362_v52 }
  0x38   : > { %499 = vxpose.xlu0.b32.cont [8/16] (narrow) %v467_v59, 16  ;;  %v473_v59 = vmax.f32 %v441_v51, 0.0  ;;  %v442_v62 = vadd.f32 %v784_v55, %v346_v54  ;;  %v347_v0 = vmul.f32 %v721_v57, %v957_v15 }
  0x39   : > { %v490_v2 = vmax.f32 %v458_v60, 0.0 }
  0x3a   : > { %v474_v3 = vmax.f32 %v442_v62, 0.0 }
  0x3b   : > { %532 = vxpose.xlu1.b32.cont [9/16] (narrow) %v484_v63, 16  ;;  %v363_v63 = vmul.f32 %v753_v56, %v957_v15 }
  0x3c   : > { %500 = vxpose.xlu0.b32.cont [9/16] (narrow) %v468_v1, 16  ;;  %v785_v1 = vunpack.c.h.bf16 %v839_v47 }
  0x3d   : > { %v459_v4 = vadd.f32 %v817_v61, %v363_v63 }
  0x3e   : > { %v443_v5 = vadd.f32 %v785_v1, %v347_v0 }
  0x3f   : > { %533 = vxpose.xlu1.b32.cont [10/16] (narrow) %v485_v11, 16  ;;  %v491_v6 = vmax.f32 %v459_v4, 0.0 }
  0x40   : > { %501 = vxpose.xlu0.b32.cont [10/16] (narrow) %v469_v13, 16  ;;  %v475_v7 = vmax.f32 %v443_v5, 0.0 }
  0x43   : > { %534 = vxpose.xlu1.b32.cont [11/16] (narrow) %v486_v30, 16 }
  0x44   : > { %502 = vxpose.xlu0.b32.cont [11/16] (narrow) %v470_v31, 16 }
  0x47   : > { %535 = vxpose.xlu1.b32.cont [12/16] (narrow) %v487_v43, 16 }
  0x48   : > { %503 = vxpose.xlu0.b32.cont [12/16] (narrow) %v471_v44, 16 }
  0x4b   : > { %536 = vxpose.xlu1.b32.cont [13/16] (narrow) %v488_v48, 16 }
  0x4c   : > { %504 = vxpose.xlu0.b32.cont [13/16] (narrow) %v472_v50, 16 }
  0x4f   : > { %537 = vxpose.xlu1.b32.cont [14/16] (narrow) %v489_v58, 16 }
  0x50   : > { %505 = vxpose.xlu0.b32.cont [14/16] (narrow) %v473_v59, 16 }
  0x53   : > { %538 = vxpose.xlu1.b32.cont [15/16] (narrow) %v490_v2, 16 }
  0x54   : > { %506 = vxpose.xlu0.b32.cont [15/16] (narrow) %v474_v3, 16 }
  0x57   : > { %539 = vxpose.xlu1.b32.end [16/16] (narrow) %v491_v6, 16 }
  0x58   : > { %507 = vxpose.xlu0.b32.end [16/16] (narrow) %v475_v7, 16 }
  0x9b   : > { %v540_v8 = vpop.trf.xlu1 }
  0x9c   : > { %v508_v15 = vpop.trf.xlu0  ;;  %557 = vst [vmem:[%s258_s29 + $0x8] sm:$0xff] %v540_v8 }
  0x9d   : > { %556 = vst [vmem:[%s258_s29] sm:$0xff] %v508_v15 }
  0x9f   : > { %v541_v9 = vpop.trf.xlu1 }
  0xa0   : > { %v509_v10 = vpop.trf.xlu0  ;;  %559 = vst [vmem:[%s258_s29 + $0x18] sm:$0xff] %v541_v9 }
  0xa1   : > { %558 = vst [vmem:[%s258_s29 + $0x10] sm:$0xff] %v509_v10 }
  0xa2 PF: > { %s13_s14 = sadd.s32 1, %s894_s14   ;;  %s1034_s12 = smov %s890_s13 }
  0xa3   : > { %p10_p5 = scmp.ge.s32.totalorder %s13_s14, 4   ;;  %s1035_s13 = smov %s1037_s15 }
  0xa5   :  { %12 = sbr.rel (!%p10_p5) target bundleno = 2 (0x2), region = 68 }

// kernel: se_bottleneck_forward.4
= control target key start
LH: loop header
LB: loop body
LE: loop exit
PB: predicated region body
PF: predicated region fallthrough
CT: control target
= control target key end

     0   :  { %s2400_s1 = inlined_call_operand.vmem [shape: bf16[128,128], index: 1, kind: input, shape index: {}]   ;;  %s2401_s0 = inlined_call_operand.vmem [shape: bf16[512,128], index: 0, kind: input, shape index: {}]   ;;  %s2402_s2 = inlined_call_operand.vmem [shape: f32[1,128], index: 2, kind: input, shape index: {}]   ;;  %s2403_s3 = inlined_call_operand.vmem [shape: f32[1,128], index: 3, kind: input, shape index: {}]   ;;  %s2404_s4 = inlined_call_operand.vmem [shape: bf16[512,128], index: 4, kind: output, shape index: {}]  }
   0x1   :  { %v1981_v0 = vld [vmem:[%s2400_s1] sm:$0xff]   ;;  %v1982_v1 = vld [vmem:[%s2400_s1 + $0x8] sm:$0xff]   ;;  %v1983_v2 = vld [vmem:[%s2400_s1 + $0x10] sm:$0xff]  }
   0x2   :  { %1885 = vmatprep.subr.bf16.mxu0 %v1981_v0  ;;  %1965 = vmatprep.subr.bf16.mxu1 %v1981_v0  ;;  %v1984_v3 = vld [vmem:[%s2400_s1 + $0x18] sm:$0xff]   ;;  %v1989_v4 = vld [vmem:[%s2401_s0] sm:$0xff]   ;;  %v1986_v7 = vld [vmem:[%s2400_s1 + $0x28] sm:$0xff]  }
   0x3   :  { %1886 = vmatpush3.bf16.msra.mxu0 %v1981_v0  ;;  %1973 = vmatpush3.bf16.msra.mxu1 %v1981_v0  ;;  %v1990_v5 = vld [vmem:[%s2401_s0 + $0x80] sm:$0xff]   ;;  %v1987_v8 = vld [vmem:[%s2400_s1 + $0x30] sm:$0xff]   ;;  %v1988_v9 = vld [vmem:[%s2400_s1 + $0x38] sm:$0xff]  }
   0x4   :  { %1887 = vmatprep.subr.bf16.mxu0 %v1982_v1  ;;  %1966 = vmatprep.subr.bf16.mxu1 %v1982_v1  ;;  %v1985_v6 = vld [vmem:[%s2400_s1 + $0x20] sm:$0xff]   ;;  %v1991_v10 = vld [vmem:[%s2401_s0 + $0x8] sm:$0xff]   ;;  %v1993_v12 = vld [vmem:[%s2401_s0 + $0x10] sm:$0xff]  }
   0x5   :  { %1901 = vmatprep.mubr.bf16.mxu0 %v1989_v4  ;;  %1933 = vmatprep.mubr.bf16.mxu1 %v1990_v5  ;;  %v1992_v11 = vld [vmem:[%s2401_s0 + $0x88] sm:$0xff]   ;;  %v1994_v13 = vld [vmem:[%s2401_s0 + $0x90] sm:$0xff]   ;;  %v1995_v14 = vld [vmem:[%s2401_s0 + $0x18] sm:$0xff]  }
   0x6   :  { %v1996_v15 = vld [vmem:[%s2401_s0 + $0x98] sm:$0xff]   ;;  %v1997_v16 = vld [vmem:[%s2401_s0 + $0x20] sm:$0xff]   ;;  %v1999_v18 = vld [vmem:[%s2401_s0 + $0x28] sm:$0xff]  }
   0x7   :  { %1888 = vmatpush3.bf16.msra.mxu0 %v1982_v1  ;;  %1974 = vmatpush3.bf16.msra.mxu1 %v1982_v1  ;;  %v1998_v17 = vld [vmem:[%s2401_s0 + $0xa0] sm:$0xff]   ;;  %v2000_v19 = vld [vmem:[%s2401_s0 + $0xa8] sm:$0xff]   ;;  %v2001_v20 = vld [vmem:[%s2401_s0 + $0x30] sm:$0xff]  }
   0x8   :  { %1889 = vmatprep.subr.bf16.mxu0 %v1983_v2  ;;  %1967 = vmatprep.subr.bf16.mxu1 %v1983_v2  ;;  %v2002_v21 = vld [vmem:[%s2401_s0 + $0xb0] sm:$0xff]   ;;  %v2003_v22 = vld [vmem:[%s2401_s0 + $0x38] sm:$0xff]   ;;  %v2005_v24 = vld [vmem:[%s2401_s0 + $0x40] sm:$0xff]  }
   0x9   :  { %v2004_v23 = vld [vmem:[%s2401_s0 + $0xb8] sm:$0xff]   ;;  %v2006_v25 = vld [vmem:[%s2401_s0 + $0xc0] sm:$0xff]   ;;  %v2007_v26 = vld [vmem:[%s2401_s0 + $0x48] sm:$0xff]  }
   0xa   :  { %v2008_v27 = vld [vmem:[%s2401_s0 + $0xc8] sm:$0xff]   ;;  %v2009_v28 = vld [vmem:[%s2401_s0 + $0x50] sm:$0xff]   ;;  %v2011_v30 = vld [vmem:[%s2401_s0 + $0x58] sm:$0xff]  }
   0xb   :  { %1890 = vmatpush3.bf16.msra.mxu0 %v1983_v2  ;;  %1975 = vmatpush3.bf16.msra.mxu1 %v1983_v2  ;;  %v2010_v29 = vld [vmem:[%s2401_s0 + $0xd0] sm:$0xff]   ;;  %v2012_v31 = vld [vmem:[%s2401_s0 + $0xd8] sm:$0xff]   ;;  %v2013_v32 = vld [vmem:[%s2401_s0 + $0x60] sm:$0xff]  }
   0xc   :  { %1891 = vmatprep.subr.bf16.mxu0 %v1984_v3  ;;  %1968 = vmatprep.subr.bf16.mxu1 %v1984_v3  ;;  %v2014_v33 = vld [vmem:[%s2401_s0 + $0xe0] sm:$0xff]   ;;  %v2015_v34 = vld [vmem:[%s2401_s0 + $0x68] sm:$0xff]   ;;  %v2017_v36 = vld [vmem:[%s2401_s0 + $0x70] sm:$0xff]  }
   0xd   :  { %v2016_v35 = vld [vmem:[%s2401_s0 + $0xe8] sm:$0xff]   ;;  %v2018_v37 = vld [vmem:[%s2401_s0 + $0xf0] sm:$0xff]   ;;  %v2019_v38 = vld [vmem:[%s2401_s0 + $0x78] sm:$0xff]  }
   0xe   :  { %v2020_v39 = vld [vmem:[%s2401_s0 + $0xf8] sm:$0xff]   ;;  %v2169_v40 = vld [vmem:[%s2402_s2] ss:$0 sm:$0xff] }
   0xf   :  { %1892 = vmatpush3.bf16.msra.mxu0 %v1984_v3  ;;  %1976 = vmatpush3.bf16.msra.mxu1 %v1984_v3  ;;  %v2174_v42 = vld [vmem:[%s2403_s3] ss:$0 sm:$0xff] }
  0x10   :  { %1893 = vmatprep.subr.bf16.mxu0 %v1985_v6  ;;  %1969 = vmatprep.subr.bf16.mxu1 %v1985_v6 }
  0x13   :  { %1894 = vmatpush3.bf16.msra.mxu0 %v1985_v6  ;;  %1977 = vmatpush3.bf16.msra.mxu1 %v1985_v6 }
  0x14   :  { %1895 = vmatprep.subr.bf16.mxu0 %v1986_v7  ;;  %1970 = vmatprep.subr.bf16.mxu1 %v1986_v7 }
  0x17   :  { %1896 = vmatpush3.bf16.msra.mxu0 %v1986_v7  ;;  %1978 = vmatpush3.bf16.msra.mxu1 %v1986_v7 }
  0x18   :  { %1897 = vmatprep.subr.bf16.mxu0 %v1987_v8  ;;  %1971 = vmatprep.subr.bf16.mxu1 %v1987_v8 }
  0x1b   :  { %1898 = vmatpush3.bf16.msra.mxu0 %v1987_v8  ;;  %1979 = vmatpush3.bf16.msra.mxu1 %v1987_v8 }
  0x1c   :  { %1899 = vmatprep.subr.bf16.mxu0 %v1988_v9  ;;  %1972 = vmatprep.subr.bf16.mxu1 %v1988_v9 }
  0x1f   :  { %1900 = vmatpush3.bf16.msra.mxu0 %v1988_v9  ;;  %1980 = vmatpush3.bf16.msra.mxu1 %v1988_v9 }
  0x22   :  { %1902 = vmatmul.mubr.bf16.vlgmr.msra.gmra.mrb[0].mxu0 %v1991_v10  ;;  %1934 = vmatmul.mubr.bf16.vlgmr.msra.gmra.mrb[0].mxu1 %v1992_v11 }
  0x23   :  { %1905 = vmatprep.mubr.bf16.mxu0 %v1993_v12  ;;  %1937 = vmatprep.mubr.bf16.mxu1 %v1994_v13 }
  0x2a   :  { %1906 = vmatmul.mubr.bf16.gmra.mrb[4].mxu0 %v1995_v14  ;;  %1938 = vmatmul.mubr.bf16.gmra.mrb[4].mxu1 %v1996_v15 }
  0x2b   :  { %1909 = vmatprep.mubr.bf16.mxu0 %v1997_v16  ;;  %1941 = vmatprep.mubr.bf16.mxu1 %v1998_v17 }
  0x32   :  { %1910 = vmatmul.mubr.bf16.gmra.mrb[8].mxu0 %v1999_v18  ;;  %1942 = vmatmul.mubr.bf16.gmra.mrb[8].mxu1 %v2000_v19 }
  0x33   :  { %1913 = vmatprep.mubr.bf16.mxu0 %v2001_v20  ;;  %1945 = vmatprep.mubr.bf16.mxu1 %v2002_v21 }
  0x3a   :  { %1914 = vmatmul.mubr.bf16.gmra.mrb[12].mxu0 %v2003_v22  ;;  %1946 = vmatmul.mubr.bf16.gmra.mrb[12].mxu1 %v2004_v23 }
  0x3b   :  { %1917 = vmatprep.mubr.bf16.mxu0 %v2005_v24  ;;  %1949 = vmatprep.mubr.bf16.mxu1 %v2006_v25 }
  0x42   :  { %1918 = vmatmul.mubr.bf16.gmra.mrb[16].mxu0 %v2007_v26  ;;  %1950 = vmatmul.mubr.bf16.gmra.mrb[16].mxu1 %v2008_v27 }
  0x43   :  { %1921 = vmatprep.mubr.bf16.mxu0 %v2009_v28  ;;  %1953 = vmatprep.mubr.bf16.mxu1 %v2010_v29 }
  0x4a   :  { %1922 = vmatmul.mubr.bf16.gmra.mrb[20].mxu0 %v2011_v30  ;;  %1954 = vmatmul.mubr.bf16.gmra.mrb[20].mxu1 %v2012_v31 }
  0x4b   :  { %1925 = vmatprep.mubr.bf16.mxu0 %v2013_v32  ;;  %1957 = vmatprep.mubr.bf16.mxu1 %v2014_v33 }
  0x52   :  { %1926 = vmatmul.mubr.bf16.gmra.mrb[24].mxu0 %v2015_v34  ;;  %1958 = vmatmul.mubr.bf16.gmra.mrb[24].mxu1 %v2016_v35 }
  0x53   :  { %1929 = vmatprep.mubr.bf16.mxu0 %v2017_v36  ;;  %1961 = vmatprep.mubr.bf16.mxu1 %v2018_v37 }
  0x5a   :  { %1930 = vmatmul.mubr.bf16.gmra.mrb[28].mxu0 %v2019_v38  ;;  %1962 = vmatmul.mubr.bf16.gmra.mrb[28].mxu1 %v2020_v39 }
  0xf5   :  { %v1903_v41 = vpop.f32.mrb[0].mxu0  ;;  %v1935_v43 = vpop.f32.mrb[0].mxu1 }
  0xf6   :  { %v963_v44 = vmul.f32 %v1903_v41, %v2169_v40  ;;  %v995_v45 = vmul.f32 %v1935_v43, %v2169_v40  ;;  %v504_v46 = vpop.f32.mrb[1].mxu0  ;;  %v632_v47 = vpop.f32.mrb[1].mxu1 }
  0xf7   :  { %v961_v48 = vmul.f32 %v2169_v40, %v504_v46  ;;  %v993_v49 = vmul.f32 %v2169_v40, %v632_v47  ;;  %v1904_v50 = vpop.f32.mrb[2].mxu0  ;;  %v1936_v51 = vpop.f32.mrb[2].mxu1 }
  0xf8   :  { %v1034_v52 = vadd.f32 %v2174_v42, %v963_v44  ;;  %v1066_v53 = vadd.f32 %v2174_v42, %v995_v45  ;;  %v964_v54 = vmul.f32 %v1904_v50, %v2169_v40  ;;  %v996_v55 = vmul.f32 %v1936_v51, %v2169_v40  ;;  %v507_v56 = vpop.f32.mrb[3].mxu0  ;;  %v635_v57 = vpop.f32.mrb[3].mxu1 }
  0xf9   :  { %v1032_v58 = vadd.f32 %v2174_v42, %v961_v48  ;;  %v1064_v59 = vadd.f32 %v2174_v42, %v993_v49  ;;  %v962_v60 = vmul.f32 %v2169_v40, %v507_v56  ;;  %v994_v61 = vmul.f32 %v2169_v40, %v635_v57 }
  0xfa   :  { %v1035_v62 = vadd.f32 %v2174_v42, %v964_v54  ;;  %v1067_v63 = vadd.f32 %v2174_v42, %v996_v55  ;;  %v1098_v2 = vmax.f32 %v1034_v52, 0.0  ;;  %v1130_v3 = vmax.f32 %v1066_v53, 0.0 }
  0xfb   :  { %v1033_v0 = vadd.f32 %v2174_v42, %v962_v60  ;;  %v1065_v1 = vadd.f32 %v2174_v42, %v994_v61  ;;  %v1096_v6 = vmax.f32 %v1032_v58, 0.0  ;;  %v1128_v7 = vmax.f32 %v1064_v59, 0.0 }
  0xfc   :  { %v1099_v4 = vmax.f32 %v1035_v62, 0.0  ;;  %v1131_v5 = vmax.f32 %v1067_v63, 0.0 }
  0xfd   :  { %v1097_v8 = vmax.f32 %v1033_v0, 0.0  ;;  %v1129_v9 = vmax.f32 %v1065_v1, 0.0  ;;  %v1907_v10 = vpop.f32.mrb[4].mxu0  ;;  %v1939_v11 = vpop.f32.mrb[4].mxu1 }
  0xfe   :  { %v1662_v12 = vpack.c.bf16 %v1099_v4, %v1098_v2  ;;  %v1742_v13 = vpack.c.bf16 %v1131_v5, %v1130_v3  ;;  %v967_v14 = vmul.f32 %v1907_v10, %v2169_v40  ;;  %v999_v15 = vmul.f32 %v1939_v11, %v2169_v40  ;;  %v520_v16 = vpop.f32.mrb[5].mxu0  ;;  %v648_v17 = vpop.f32.mrb[5].mxu1 }
  0xff   :  { %v1657_v18 = vpack.c.bf16 %v1097_v8, %v1096_v6  ;;  %v1737_v19 = vpack.c.bf16 %v1129_v9, %v1128_v7  ;;  %v965_v20 = vmul.f32 %v2169_v40, %v520_v16  ;;  %v997_v21 = vmul.f32 %v2169_v40, %v648_v17  ;;  %v1908_v22 = vpop.f32.mrb[6].mxu0  ;;  %v1940_v23 = vpop.f32.mrb[6].mxu1 }
 0x100   :  { %1814 = vst [vmem:[%s2404_s4 + $0x8] sm:$0xff] %v1662_v12   ;;  %1830 = vst [vmem:[%s2404_s4 + $0x88] sm:$0xff] %v1742_v13   ;;  %v1038_v24 = vadd.f32 %v2174_v42, %v967_v14  ;;  %v1070_v25 = vadd.f32 %v2174_v42, %v999_v15  ;;  %v968_v26 = vmul.f32 %v1908_v22, %v2169_v40  ;;  %v523_v28 = vpop.f32.mrb[7].mxu0  ;;  %v651_v29 = vpop.f32.mrb[7].mxu1 }
 0x101   :  { %v1000_v27 = vmul.f32 %v1940_v23, %v2169_v40  ;;  %1658 = vst [vmem:[%s2404_s4] sm:$0xff] %v1657_v18   ;;  %1829 = vst [vmem:[%s2404_s4 + $0x80] sm:$0xff] %v1737_v19   ;;  %v1036_v30 = vadd.f32 %v2174_v42, %v965_v20  ;;  %v1068_v31 = vadd.f32 %v2174_v42, %v997_v21 }
 0x102   :  { %v966_v32 = vmul.f32 %v2169_v40, %v523_v28  ;;  %v998_v33 = vmul.f32 %v2169_v40, %v651_v29  ;;  %v1039_v34 = vadd.f32 %v2174_v42, %v968_v26  ;;  %v1102_v38 = vmax.f32 %v1038_v24, 0.0 }
 0x103   :  { %v1071_v35 = vadd.f32 %v2174_v42, %v1000_v27  ;;  %v1134_v39 = vmax.f32 %v1070_v25, 0.0  ;;  %v1100_v44 = vmax.f32 %v1036_v30, 0.0  ;;  %v1132_v45 = vmax.f32 %v1068_v31, 0.0 }
 0x104   :  { %v1037_v36 = vadd.f32 %v2174_v42, %v966_v32  ;;  %v1069_v37 = vadd.f32 %v2174_v42, %v998_v33  ;;  %v1103_v41 = vmax.f32 %v1039_v34, 0.0 }
 0x105   :  { %v1135_v43 = vmax.f32 %v1071_v35, 0.0  ;;  %v1911_v48 = vpop.f32.mrb[8].mxu0  ;;  %v1943_v49 = vpop.f32.mrb[8].mxu1 }
 0x106   :  { %v1101_v46 = vmax.f32 %v1037_v36, 0.0  ;;  %v1133_v47 = vmax.f32 %v1069_v37, 0.0  ;;  %v1672_v50 = vpack.c.bf16 %v1103_v41, %v1102_v38  ;;  %v971_v52 = vmul.f32 %v1911_v48, %v2169_v40  ;;  %v536_v54 = vpop.f32.mrb[9].mxu0  ;;  %v664_v55 = vpop.f32.mrb[9].mxu1 }
 0x107   :  { %v1752_v51 = vpack.c.bf16 %v1135_v43, %v1134_v39  ;;  %v1003_v53 = vmul.f32 %v1943_v49, %v2169_v40  ;;  %v969_v58 = vmul.f32 %v2169_v40, %v536_v54  ;;  %v1001_v59 = vmul.f32 %v2169_v40, %v664_v55  ;;  %v1912_v60 = vpop.f32.mrb[10].mxu0  ;;  %v1944_v61 = vpop.f32.mrb[10].mxu1 }
 0x108   :  { %v1667_v56 = vpack.c.bf16 %v1101_v46, %v1100_v44  ;;  %v1747_v57 = vpack.c.bf16 %v1133_v47, %v1132_v45  ;;  %1816 = vst [vmem:[%s2404_s4 + $0x18] sm:$0xff] %v1672_v50   ;;  %v1042_v62 = vadd.f32 %v2174_v42, %v971_v52  ;;  %v972_v0 = vmul.f32 %v1912_v60, %v2169_v40  ;;  %v539_v2 = vpop.f32.mrb[11].mxu0  ;;  %v667_v3 = vpop.f32.mrb[11].mxu1 }
 0x109   :  { %1832 = vst [vmem:[%s2404_s4 + $0x98] sm:$0xff] %v1752_v51   ;;  %v1074_v63 = vadd.f32 %v2174_v42, %v1003_v53  ;;  %v1004_v1 = vmul.f32 %v1944_v61, %v2169_v40  ;;  %v1040_v4 = vadd.f32 %v2174_v42, %v969_v58  ;;  %v1072_v5 = vadd.f32 %v2174_v42, %v1001_v59 }
 0x10a   :  { %1815 = vst [vmem:[%s2404_s4 + $0x10] sm:$0xff] %v1667_v56   ;;  %1831 = vst [vmem:[%s2404_s4 + $0x90] sm:$0xff] %v1747_v57   ;;  %v970_v6 = vmul.f32 %v2169_v40, %v539_v2  ;;  %v1002_v7 = vmul.f32 %v2169_v40, %v667_v3  ;;  %v1043_v8 = vadd.f32 %v2174_v42, %v972_v0  ;;  %v1106_v12 = vmax.f32 %v1042_v62, 0.0 }
 0x10b   :  { %v1075_v9 = vadd.f32 %v2174_v42, %v1004_v1  ;;  %v1138_v13 = vmax.f32 %v1074_v63, 0.0  ;;  %v1104_v16 = vmax.f32 %v1040_v4, 0.0  ;;  %v1136_v17 = vmax.f32 %v1072_v5, 0.0 }
 0x10c   :  { %v1041_v10 = vadd.f32 %v2174_v42, %v970_v6  ;;  %v1073_v11 = vadd.f32 %v2174_v42, %v1002_v7  ;;  %v1107_v14 = vmax.f32 %v1043_v8, 0.0 }
 0x10d   :  { %v1139_v15 = vmax.f32 %v1075_v9, 0.0  ;;  %v1915_v20 = vpop.f32.mrb[12].mxu0  ;;  %v1947_v21 = vpop.f32.mrb[12].mxu1 }
 0x10e   :  { %v1105_v18 = vmax.f32 %v1041_v10, 0.0  ;;  %v1137_v19 = vmax.f32 %v1073_v11, 0.0  ;;  %v1682_v22 = vpack.c.bf16 %v1107_v14, %v1106_v12  ;;  %v975_v24 = vmul.f32 %v1915_v20, %v2169_v40  ;;  %v552_v26 = vpop.f32.mrb[13].mxu0  ;;  %v680_v27 = vpop.f32.mrb[13].mxu1 }
 0x10f   :  { %v1762_v23 = vpack.c.bf16 %v1139_v15, %v1138_v13  ;;  %v1007_v25 = vmul.f32 %v1947_v21, %v2169_v40  ;;  %v973_v30 = vmul.f32 %v2169_v40, %v552_v26  ;;  %v1005_v31 = vmul.f32 %v2169_v40, %v680_v27  ;;  %v1916_v32 = vpop.f32.mrb[14].mxu0  ;;  %v1948_v33 = vpop.f32.mrb[14].mxu1 }
 0x110   :  { %v1677_v28 = vpack.c.bf16 %v1105_v18, %v1104_v16  ;;  %v1757_v29 = vpack.c.bf16 %v1137_v19, %v1136_v17  ;;  %1818 = vst [vmem:[%s2404_s4 + $0x28] sm:$0xff] %v1682_v22   ;;  %v1046_v34 = vadd.f32 %v2174_v42, %v975_v24  ;;  %v976_v36 = vmul.f32 %v1916_v32, %v2169_v40  ;;  %v555_v38 = vpop.f32.mrb[15].mxu0  ;;  %v683_v39 = vpop.f32.mrb[15].mxu1 }
 0x111   :  { %1834 = vst [vmem:[%s2404_s4 + $0xa8] sm:$0xff] %v1762_v23   ;;  %v1078_v35 = vadd.f32 %v2174_v42, %v1007_v25  ;;  %v1008_v37 = vmul.f32 %v1948_v33, %v2169_v40  ;;  %v1044_v41 = vadd.f32 %v2174_v42, %v973_v30  ;;  %v1076_v43 = vadd.f32 %v2174_v42, %v1005_v31 }
 0x112   :  { %1817 = vst [vmem:[%s2404_s4 + $0x20] sm:$0xff] %v1677_v28   ;;  %1833 = vst [vmem:[%s2404_s4 + $0xa0] sm:$0xff] %v1757_v29   ;;  %v974_v44 = vmul.f32 %v2169_v40, %v555_v38  ;;  %v1006_v45 = vmul.f32 %v2169_v40, %v683_v39  ;;  %v1047_v46 = vadd.f32 %v2174_v42, %v976_v36  ;;  %v1110_v50 = vmax.f32 %v1046_v34, 0.0 }
 0x113   :  { %v1079_v47 = vadd.f32 %v2174_v42, %v1008_v37  ;;  %v1142_v51 = vmax.f32 %v1078_v35, 0.0  ;;  %v1108_v54 = vmax.f32 %v1044_v41, 0.0  ;;  %v1140_v55 = vmax.f32 %v1076_v43, 0.0 }
 0x114   :  { %v1045_v48 = vadd.f32 %v2174_v42, %v974_v44  ;;  %v1077_v49 = vadd.f32 %v2174_v42, %v1006_v45  ;;  %v1111_v52 = vmax.f32 %v1047_v46, 0.0 }
 0x115   :  { %v1143_v53 = vmax.f32 %v1079_v47, 0.0  ;;  %v1919_v58 = vpop.f32.mrb[16].mxu0  ;;  %v1951_v59 = vpop.f32.mrb[16].mxu1 }
 0x116   :  { %v1109_v56 = vmax.f32 %v1045_v48, 0.0  ;;  %v1141_v57 = vmax.f32 %v1077_v49, 0.0  ;;  %v1692_v60 = vpack.c.bf16 %v1111_v52, %v1110_v50  ;;  %v979_v62 = vmul.f32 %v1919_v58, %v2169_v40  ;;  %v568_v0 = vpop.f32.mrb[17].mxu0  ;;  %v696_v1 = vpop.f32.mrb[17].mxu1 }
 0x117   :  { %v1772_v61 = vpack.c.bf16 %v1143_v53, %v1142_v51  ;;  %v1011_v63 = vmul.f32 %v1951_v59, %v2169_v40  ;;  %v977_v4 = vmul.f32 %v2169_v40, %v568_v0  ;;  %v1009_v5 = vmul.f32 %v2169_v40, %v696_v1  ;;  %v1920_v6 = vpop.f32.mrb[18].mxu0  ;;  %v1952_v7 = vpop.f32.mrb[18].mxu1 }
 0x118   :  { %v1687_v2 = vpack.c.bf16 %v1109_v56, %v1108_v54  ;;  %v1767_v3 = vpack.c.bf16 %v1141_v57, %v1140_v55  ;;  %1820 = vst [vmem:[%s2404_s4 + $0x38] sm:$0xff] %v1692_v60   ;;  %v1050_v8 = vadd.f32 %v2174_v42, %v979_v62  ;;  %v980_v10 = vmul.f32 %v1920_v6, %v2169_v40  ;;  %v571_v12 = vpop.f32.mrb[19].mxu0  ;;  %v699_v13 = vpop.f32.mrb[19].mxu1 }
 0x119   :  { %1836 = vst [vmem:[%s2404_s4 + $0xb8] sm:$0xff] %v1772_v61   ;;  %v1082_v9 = vadd.f32 %v2174_v42, %v1011_v63  ;;  %v1012_v11 = vmul.f32 %v1952_v7, %v2169_v40  ;;  %v1048_v14 = vadd.f32 %v2174_v42, %v977_v4  ;;  %v1080_v15 = vadd.f32 %v2174_v42, %v1009_v5 }
 0x11a   :  { %1819 = vst [vmem:[%s2404_s4 + $0x30] sm:$0xff] %v1687_v2   ;;  %1835 = vst [vmem:[%s2404_s4 + $0xb0] sm:$0xff] %v1767_v3   ;;  %v978_v16 = vmul.f32 %v2169_v40, %v571_v12  ;;  %v1010_v17 = vmul.f32 %v2169_v40, %v699_v13  ;;  %v1051_v18 = vadd.f32 %v2174_v42, %v980_v10  ;;  %v1114_v22 = vmax.f32 %v1050_v8, 0.0 }
 0x11b   :  { %v1083_v19 = vadd.f32 %v2174_v42, %v1012_v11  ;;  %v1146_v23 = vmax.f32 %v1082_v9, 0.0  ;;  %v1112_v26 = vmax.f32 %v1048_v14, 0.0  ;;  %v1144_v27 = vmax.f32 %v1080_v15, 0.0 }
 0x11c   :  { %v1049_v20 = vadd.f32 %v2174_v42, %v978_v16  ;;  %v1081_v21 = vadd.f32 %v2174_v42, %v1010_v17  ;;  %v1115_v24 = vmax.f32 %v1051_v18, 0.0 }
 0x11d   :  { %v1147_v25 = vmax.f32 %v1083_v19, 0.0  ;;  %v1923_v30 = vpop.f32.mrb[20].mxu0  ;;  %v1955_v31 = vpop.f32.mrb[20].mxu1 }
 0x11e   :  { %v1113_v28 = vmax.f32 %v1049_v20, 0.0  ;;  %v1145_v29 = vmax.f32 %v1081_v21, 0.0  ;;  %v1702_v32 = vpack.c.bf16 %v1115_v24, %v1114_v22  ;;  %v983_v34 = vmul.f32 %v1923_v30, %v2169_v40  ;;  %v584_v36 = vpop.f32.mrb[21].mxu0  ;;  %v712_v37 = vpop.f32.mrb[21].mxu1 }
 0x11f   :  { %v1782_v33 = vpack.c.bf16 %v1147_v25, %v1146_v23  ;;  %v1015_v35 = vmul.f32 %v1955_v31, %v2169_v40  ;;  %v981_v41 = vmul.f32 %v2169_v40, %v584_v36  ;;  %v1013_v43 = vmul.f32 %v2169_v40, %v712_v37  ;;  %v1924_v44 = vpop.f32.mrb[22].mxu0  ;;  %v1956_v45 = vpop.f32.mrb[22].mxu1 }
 0x120   :  { %v1697_v38 = vpack.c.bf16 %v1113_v28, %v1112_v26  ;;  %v1777_v39 = vpack.c.bf16 %v1145_v29, %v1144_v27  ;;  %1822 = vst [vmem:[%s2404_s4 + $0x48] sm:$0xff] %v1702_v32   ;;  %v1054_v46 = vadd.f32 %v2174_v42, %v983_v34  ;;  %v984_v48 = vmul.f32 %v1924_v44, %v2169_v40  ;;  %v587_v50 = vpop.f32.mrb[23].mxu0  ;;  %v715_v51 = vpop.f32.mrb[23].mxu1 }
 0x121   :  { %1838 = vst [vmem:[%s2404_s4 + $0xc8] sm:$0xff] %v1782_v33   ;;  %v1086_v47 = vadd.f32 %v2174_v42, %v1015_v35  ;;  %v1016_v49 = vmul.f32 %v1956_v45, %v2169_v40  ;;  %v1052_v52 = vadd.f32 %v2174_v42, %v981_v41  ;;  %v1084_v53 = vadd.f32 %v2174_v42, %v1013_v43 }
 0x122   :  { %1821 = vst [vmem:[%s2404_s4 + $0x40] sm:$0xff] %v1697_v38   ;;  %1837 = vst [vmem:[%s2404_s4 + $0xc0] sm:$0xff] %v1777_v39   ;;  %v982_v54 = vmul.f32 %v2169_v40, %v587_v50  ;;  %v1014_v55 = vmul.f32 %v2169_v40, %v715_v51  ;;  %v1055_v56 = vadd.f32 %v2174_v42, %v984_v48  ;;  %v1118_v60 = vmax.f32 %v1054_v46, 0.0 }
 0x123   :  { %v1087_v57 = vadd.f32 %v2174_v42, %v1016_v49  ;;  %v1150_v61 = vmax.f32 %v1086_v47, 0.0  ;;  %v1116_v0 = vmax.f32 %v1052_v52, 0.0  ;;  %v1148_v1 = vmax.f32 %v1084_v53, 0.0 }
 0x124   :  { %v1053_v58 = vadd.f32 %v2174_v42, %v982_v54  ;;  %v1085_v59 = vadd.f32 %v2174_v42, %v1014_v55  ;;  %v1119_v62 = vmax.f32 %v1055_v56, 0.0 }
 0x125   :  { %v1151_v63 = vmax.f32 %v1087_v57, 0.0  ;;  %v1927_v4 = vpop.f32.mrb[24].mxu0  ;;  %v1959_v5 = vpop.f32.mrb[24].mxu1 }
 0x126   :  { %v1117_v2 = vmax.f32 %v1053_v58, 0.0  ;;  %v1149_v3 = vmax.f32 %v1085_v59, 0.0  ;;  %v1712_v6 = vpack.c.bf16 %v1119_v62, %v1118_v60  ;;  %v987_v8 = vmul.f32 %v1927_v4, %v2169_v40  ;;  %v600_v10 = vpop.f32.mrb[25].mxu0  ;;  %v728_v11 = vpop.f32.mrb[25].mxu1 }
 0x127   :  { %v1792_v7 = vpack.c.bf16 %v1151_v63, %v1150_v61  ;;  %v1019_v9 = vmul.f32 %v1959_v5, %v2169_v40  ;;  %v985_v14 = vmul.f32 %v2169_v40, %v600_v10  ;;  %v1017_v15 = vmul.f32 %v2169_v40, %v728_v11  ;;  %v1928_v16 = vpop.f32.mrb[26].mxu0  ;;  %v1960_v17 = vpop.f32.mrb[26].mxu1 }
 0x128   :  { %v1707_v12 = vpack.c.bf16 %v1117_v2, %v1116_v0  ;;  %v1787_v13 = vpack.c.bf16 %v1149_v3, %v1148_v1  ;;  %1824 = vst [vmem:[%s2404_s4 + $0x58] sm:$0xff] %v1712_v6   ;;  %v1058_v18 = vadd.f32 %v2174_v42, %v987_v8  ;;  %v988_v20 = vmul.f32 %v1928_v16, %v2169_v40  ;;  %v603_v22 = vpop.f32.mrb[27].mxu0  ;;  %v731_v23 = vpop.f32.mrb[27].mxu1 }
 0x129   :  { %1840 = vst [vmem:[%s2404_s4 + $0xd8] sm:$0xff] %v1792_v7   ;;  %v1090_v19 = vadd.f32 %v2174_v42, %v1019_v9  ;;  %v1020_v21 = vmul.f32 %v1960_v17, %v2169_v40  ;;  %v1056_v24 = vadd.f32 %v2174_v42, %v985_v14  ;;  %v1088_v25 = vadd.f32 %v2174_v42, %v1017_v15 }
 0x12a   :  { %1823 = vst [vmem:[%s2404_s4 + $0x50] sm:$0xff] %v1707_v12   ;;  %1839 = vst [vmem:[%s2404_s4 + $0xd0] sm:$0xff] %v1787_v13   ;;  %v986_v26 = vmul.f32 %v2169_v40, %v603_v22  ;;  %v1018_v27 = vmul.f32 %v2169_v40, %v731_v23  ;;  %v1059_v28 = vadd.f32 %v2174_v42, %v988_v20  ;;  %v1122_v32 = vmax.f32 %v1058_v18, 0.0 }
 0x12b   :  { %v1091_v29 = vadd.f32 %v2174_v42, %v1020_v21  ;;  %v1154_v33 = vmax.f32 %v1090_v19, 0.0  ;;  %v1120_v36 = vmax.f32 %v1056_v24, 0.0  ;;  %v1152_v37 = vmax.f32 %v1088_v25, 0.0 }
 0x12c   :  { %v1057_v30 = vadd.f32 %v2174_v42, %v986_v26  ;;  %v1089_v31 = vadd.f32 %v2174_v42, %v1018_v27  ;;  %v1123_v34 = vmax.f32 %v1059_v28, 0.0 }
 0x12d   :  { %v1155_v35 = vmax.f32 %v1091_v29, 0.0  ;;  %v1931_v41 = vpop.f32.mrb[28].mxu0  ;;  %v1963_v43 = vpop.f32.mrb[28].mxu1 }
 0x12e   :  { %v1121_v38 = vmax.f32 %v1057_v30, 0.0  ;;  %v1153_v39 = vmax.f32 %v1089_v31, 0.0  ;;  %v1722_v44 = vpack.c.bf16 %v1123_v34, %v1122_v32  ;;  %v991_v46 = vmul.f32 %v1931_v41, %v2169_v40  ;;  %v616_v48 = vpop.f32.mrb[29].mxu0  ;;  %v744_v49 = vpop.f32.mrb[29].mxu1 }
 0x12f   :  { %v1802_v45 = vpack.c.bf16 %v1155_v35, %v1154_v33  ;;  %v1023_v47 = vmul.f32 %v1963_v43, %v2169_v40  ;;  %v989_v52 = vmul.f32 %v2169_v40, %v616_v48  ;;  %v1021_v53 = vmul.f32 %v2169_v40, %v744_v49  ;;  %v1932_v54 = vpop.f32.mrb[30].mxu0  ;;  %v1964_v55 = vpop.f32.mrb[30].mxu1 }
 0x130   :  { %v1717_v50 = vpack.c.bf16 %v1121_v38, %v1120_v36  ;;  %v1797_v51 = vpack.c.bf16 %v1153_v39, %v1152_v37  ;;  %1826 = vst [vmem:[%s2404_s4 + $0x68] sm:$0xff] %v1722_v44   ;;  %v1062_v56 = vadd.f32 %v2174_v42, %v991_v46  ;;  %v992_v58 = vmul.f32 %v1932_v54, %v2169_v40  ;;  %v619_v60 = vpop.f32.mrb[31].mxu0  ;;  %v747_v61 = vpop.f32.mrb[31].mxu1 }
 0x131   :  { %1842 = vst [vmem:[%s2404_s4 + $0xe8] sm:$0xff] %v1802_v45   ;;  %v1094_v57 = vadd.f32 %v2174_v42, %v1023_v47  ;;  %v1024_v59 = vmul.f32 %v1964_v55, %v2169_v40  ;;  %v1060_v62 = vadd.f32 %v2174_v42, %v989_v52  ;;  %v1092_v63 = vadd.f32 %v2174_v42, %v1021_v53 }
 0x132   :  { %1825 = vst [vmem:[%s2404_s4 + $0x60] sm:$0xff] %v1717_v50   ;;  %1841 = vst [vmem:[%s2404_s4 + $0xe0] sm:$0xff] %v1797_v51   ;;  %v990_v0 = vmul.f32 %v2169_v40, %v619_v60  ;;  %v1022_v1 = vmul.f32 %v2169_v40, %v747_v61  ;;  %v1063_v2 = vadd.f32 %v2174_v42, %v992_v58  ;;  %v1126_v6 = vmax.f32 %v1062_v56, 0.0 }
 0x133   :  { %v1095_v3 = vadd.f32 %v2174_v42, %v1024_v59  ;;  %v1158_v7 = vmax.f32 %v1094_v57, 0.0  ;;  %v1124_v10 = vmax.f32 %v1060_v62, 0.0  ;;  %v1156_v11 = vmax.f32 %v1092_v63, 0.0 }
 0x134   :  { %v1061_v4 = vadd.f32 %v2174_v42, %v990_v0  ;;  %v1093_v5 = vadd.f32 %v2174_v42, %v1022_v1  ;;  %v1127_v8 = vmax.f32 %v1063_v2, 0.0 }
 0x135   :  { %v1159_v9 = vmax.f32 %v1095_v3, 0.0 }
 0x136   :  { %v1125_v12 = vmax.f32 %v1061_v4, 0.0  ;;  %v1157_v13 = vmax.f32 %v1093_v5, 0.0  ;;  %v1732_v14 = vpack.c.bf16 %v1127_v8, %v1126_v6 }
 0x137   :  { %v1812_v15 = vpack.c.bf16 %v1159_v9, %v1158_v7 }
 0x138   :  { %v1727_v16 = vpack.c.bf16 %v1125_v12, %v1124_v10  ;;  %v1807_v40 = vpack.c.bf16 %v1157_v13, %v1156_v11  ;;  %1828 = vst [vmem:[%s2404_s4 + $0x78] sm:$0xff] %v1732_v14  }
 0x139   :  { %1844 = vst [vmem:[%s2404_s4 + $0xf8] sm:$0xff] %v1812_v15  }
 0x13a   :  { %1827 = vst [vmem:[%s2404_s4 + $0x70] sm:$0xff] %v1727_v16   ;;  %1843 = vst [vmem:[%s2404_s4 + $0xf0] sm:$0xff] %v1807_v40  }

// kernel: se_bottleneck_forward.6
= control target key start
LH: loop header
LB: loop body
LE: loop exit
PB: predicated region body
PF: predicated region fallthrough
CT: control target
= control target key end

     0   :  { %s1883_s30 = smov 0   ;;  %s1885_s10 = smov 0   ;;  %s2189_s0 = inlined_call_operand.vmem [shape: bf16[2,256,128], index: 0, kind: input, shape index: {}]   ;;  %s2190_s1 = inlined_call_operand.vmem [shape: bf16[128,128], index: 1, kind: input, shape index: {}]   ;;  %s2191_s2 = inlined_call_operand.vmem [shape: f32[1,128], index: 2, kind: input, shape index: {}]   ;;  %s2192_s3 = inlined_call_operand.vmem [shape: f32[1,128], index: 3, kind: input, shape index: {}]   ;;  %s2193_s4 = inlined_call_operand.vmem [shape: f32[128,128], index: 4, kind: input, shape index: {}]   ;;  %s2194_s5 = inlined_call_operand.vmem [shape: f32[1,128], index: 5, kind: input, shape index: {}]   ;;  %s2195_s6 = inlined_call_operand.vmem [shape: f32[128,128], index: 6, kind: input, shape index: {}]   ;;  %s2196_s7 = inlined_call_operand.vmem [shape: f32[1,128], index: 7, kind: input, shape index: {}]   ;;  %s2197_s8 = inlined_call_operand.vmem [shape: bf16[2,256,128], index: 8, kind: output, shape index: {0}]   ;;  %s2198_s9 = inlined_call_operand.vmem [shape: f32[2,1,128], index: 9, kind: output, shape index: {1}]  }
   0x1   :  { %s1887_s11 = smov 0  }
   0x2 LB: > { %s32_s12 = sadd.s32 1, %s1824_s10  ;;  %p1330_p0 = scmp.ge.s32.totalorder %s1828_s11, 1  ;;  %s1828_s11 = sphi %s1887_s11, %s20_s11   ;;  %s1824_s10 = sphi %s1885_s10, %s2200_s10   ;;  %s1820_s30 = sphi %s1883_s30, %s2199_s30  }
   0x3   : > { %p34_p1 = scmp.ge.s32.totalorder %s32_s12, 2  ;;  %p311_p2 = scmp.lt.s32.totalorder %s1828_s11, 3 }
   0x5   : > { %s2202_s12 = smov (%p34_p1, %s32_s12), 0  ;;  %p312_p3 = pnand %p1330_p0, %p311_p2 }
   0x6   : > { %v1776_v0 = vld [vmem:[%s2190_s1] sm:$0xff] (!%p312_p3)   ;;  %p359_p4 = scmp.lt.s32.totalorder (!%p312_p3), %s1820_s30, 1  ;;  %v1777_v1 = vld [vmem:[%s2190_s1 + $0x8] sm:$0xff] (!%p312_p3)   ;;  %v1778_v2 = vld [vmem:[%s2190_s1 + $0x10] sm:$0xff] (!%p312_p3)   ;;  %v1830_v27 = vmov (!%p312_p3), 0.0|0.0   ;;  %v1831_v39 = vmov (!%p312_p3), 0.0  }
   0x7   : > { %315 = sbr.rel (%p312_p3) target bundleno = 824 (0x338), region = 52  ;;  %1583 = vmatprep.subr.bf16.mxu0 (!%p312_p3), %v1776_v0  ;;  %v1779_v3 = vld [vmem:[%s2190_s1 + $0x18] sm:$0xff] (!%p312_p3)   ;;  %v1780_v5 = vld [vmem:[%s2190_s1 + $0x20] sm:$0xff] (!%p312_p3)   ;;  %v1781_v6 = vld [vmem:[%s2190_s1 + $0x28] sm:$0xff] (!%p312_p3)   ;;  %1701 = vmatprep.subr.bf16.mxu1 (!%p312_p3), %v1830_v27  ;;  %977 = vst [vmem:[#allocation2] sm:$0x1] (!%p312_p3), %v1831_v39 }
   0x8   : > { %1584 = vmatpush3.bf16.msra.mxu0 (!%p312_p3), %v1776_v0  ;;  %v1782_v7 = vld [vmem:[%s2190_s1 + $0x30] sm:$0xff] (!%p312_p3)   ;;  %v1783_v8 = vld [vmem:[%s2190_s1 + $0x38] sm:$0xff] (!%p312_p3)   ;;  %v1024_v24 = vld [vmem:[%s2193_s4] sm:$0xff] (!%p312_p3)  ;;  %vm1832_vm0 = vmmov (!%p312_p3), 0  }
   0x9   : > { %1585 = vmatprep.subr.bf16.mxu0 (!%p312_p3), %v1777_v1  ;;  %v1025_v25 = vld [vmem:[%s2193_s4 + $0x8] sm:$0xff] (!%p312_p3)  ;;  %v1026_v28 = vld [vmem:[%s2193_s4 + $0x10] sm:$0xff] (!%p312_p3)  ;;  %v1027_v29 = vld [vmem:[%s2193_s4 + $0x18] sm:$0xff] (!%p312_p3)  ;;  %1663 = vmatprep.mubr.msk.f32.mxu1 (!%p312_p3), %vm1832_vm0, %v1831_v39 }
   0xa   : > { %v1702_v26 = vpack.c.bf16 (!%p312_p3), %v1025_v25, %v1024_v24  ;;  %v1705_v30 = vpack.c.bf16 (!%p312_p3), %v1027_v29, %v1026_v28  ;;  %v1028_v31 = vld [vmem:[%s2193_s4 + $0x20] sm:$0xff] (!%p312_p3)  ;;  %v1029_v32 = vld [vmem:[%s2193_s4 + $0x28] sm:$0xff] (!%p312_p3)  ;;  %v1030_v34 = vld [vmem:[%s2193_s4 + $0x30] sm:$0xff] (!%p312_p3) }
   0xb   : > { %v1708_v33 = vpack.c.bf16 (!%p312_p3), %v1029_v32, %v1028_v31  ;;  %v1031_v35 = vld [vmem:[%s2193_s4 + $0x38] sm:$0xff] (!%p312_p3)  ;;  %v1032_v37 = vld [vmem:[%s2193_s4 + $0x40] sm:$0xff] (!%p312_p3)  ;;  %v1033_v38 = vld [vmem:[%s2193_s4 + $0x48] sm:$0xff] (!%p312_p3) }
   0xc   : > { %1586 = vmatpush3.bf16.msra.mxu0 (!%p312_p3), %v1777_v1  ;;  %1703 = vmatpush3.bf16.msra.mxu1 (!%p312_p3), %v1702_v26  ;;  %v1711_v36 = vpack.c.bf16 (!%p312_p3), %v1031_v35, %v1030_v34  ;;  %v1714_v40 = vpack.c.bf16 (!%p312_p3), %v1033_v38, %v1032_v37  ;;  %v1034_v41 = vld [vmem:[%s2193_s4 + $0x50] sm:$0xff] (!%p312_p3)  ;;  %v1035_v42 = vld [vmem:[%s2193_s4 + $0x58] sm:$0xff] (!%p312_p3)  ;;  %v1036_v43 = vld [vmem:[%s2193_s4 + $0x60] sm:$0xff] (!%p312_p3) }
   0xd   : > { %1587 = vmatprep.subr.bf16.mxu0 (!%p312_p3), %v1778_v2  ;;  %1704 = vmatprep.subr.bf16.mxu1 (!%p312_p3), %v1830_v27  ;;  %v1717_v44 = vpack.c.bf16 (!%p312_p3), %v1035_v42, %v1034_v41  ;;  %v1037_v45 = vld [vmem:[%s2193_s4 + $0x68] sm:$0xff] (!%p312_p3)  ;;  %v1038_v47 = vld [vmem:[%s2193_s4 + $0x70] sm:$0xff] (!%p312_p3)  ;;  %v1039_v48 = vld [vmem:[%s2193_s4 + $0x78] sm:$0xff] (!%p312_p3) }
   0xe   : > { %s2204_s30 = smov (!%p359_p4, %s1820_s30), 1  ;;  %v1720_v46 = vpack.c.bf16 %v1037_v45, %v1036_v43  ;;  %v1723_v49 = vpack.c.bf16 %v1039_v48, %v1038_v47  ;;  %v2022_v50 = vld [vmem:[%s2191_s2] ss:$0 sm:$0xff] }
   0xf   : > { %s1396_s19 = sshll.u32 %s2204_s30, 7  ;;  %s2001_s29 = scalar_lea.vmem %s2198_s9, %s2204_s30  ;;  %v2028_v54 = vld [vmem:[%s2192_s3] ss:$0 sm:$0xff] }
  0x10   : > { %s1918_s22 = scalar_lea.vmem %s2189_s0, %s1396_s19  ;;  %1588 = vmatpush3.bf16.msra.mxu0 %v1778_v2  ;;  %1706 = vmatpush3.bf16.msra.mxu1 %v1705_v30  ;;  %978 = vst [vmem:[%s2001_s29] sm:$0x1] %v1831_v39  ;;  %s2041_s26 = scalar_lea.vmem %s2197_s8, %s1396_s19 }
  0x11   : > { %v1784_v4 = vld [vmem:[%s1918_s22] sm:$0xff]   ;;  %1589 = vmatprep.subr.bf16.mxu0 %v1779_v3  ;;  %v1785_v9 = vld [vmem:[%s1918_s22 + $0x8] sm:$0xff]   ;;  %v1786_v10 = vld [vmem:[%s1918_s22 + $0x10] sm:$0xff]   ;;  %1707 = vmatprep.subr.bf16.mxu1 %v1830_v27 }
  0x12   : > { %1599 = vmatprep.mubr.bf16.mxu0 %v1784_v4  ;;  %v1787_v11 = vld [vmem:[%s1918_s22 + $0x18] sm:$0xff]   ;;  %v1788_v12 = vld [vmem:[%s1918_s22 + $0x20] sm:$0xff]   ;;  %v1789_v13 = vld [vmem:[%s1918_s22 + $0x28] sm:$0xff]  }
  0x13   : > { %v1790_v14 = vld [vmem:[%s1918_s22 + $0x30] sm:$0xff]   ;;  %v1791_v15 = vld [vmem:[%s1918_s22 + $0x38] sm:$0xff]   ;;  %v1792_v16 = vld [vmem:[%s1918_s22 + $0x40] sm:$0xff]  }
  0x14   : > { %1590 = vmatpush3.bf16.msra.mxu0 %v1779_v3  ;;  %v1793_v17 = vld [vmem:[%s1918_s22 + $0x48] sm:$0xff]   ;;  %v1794_v18 = vld [vmem:[%s1918_s22 + $0x50] sm:$0xff]   ;;  %v1795_v19 = vld [vmem:[%s1918_s22 + $0x58] sm:$0xff]   ;;  %1709 = vmatpush3.bf16.msra.mxu1 %v1708_v33 }
  0x15   : > { %1591 = vmatprep.subr.bf16.mxu0 %v1780_v5  ;;  %v1796_v20 = vld [vmem:[%s1918_s22 + $0x60] sm:$0xff]   ;;  %v1797_v21 = vld [vmem:[%s1918_s22 + $0x68] sm:$0xff]   ;;  %v1798_v22 = vld [vmem:[%s1918_s22 + $0x70] sm:$0xff]   ;;  %1710 = vmatprep.subr.bf16.mxu1 %v1830_v27 }
  0x16   : > { %v1799_v23 = vld [vmem:[%s1918_s22 + $0x78] sm:$0xff]  }
  0x18   : > { %1592 = vmatpush3.bf16.msra.mxu0 %v1780_v5  ;;  %1712 = vmatpush3.bf16.msra.mxu1 %v1711_v36 }
  0x19   : > { %1593 = vmatprep.subr.bf16.mxu0 %v1781_v6  ;;  %1713 = vmatprep.subr.bf16.mxu1 %v1830_v27 }
  0x1c   : > { %1594 = vmatpush3.bf16.msra.mxu0 %v1781_v6  ;;  %1715 = vmatpush3.bf16.msra.mxu1 %v1714_v40 }
  0x1d   : > { %1595 = vmatprep.subr.bf16.mxu0 %v1782_v7  ;;  %1716 = vmatprep.subr.bf16.mxu1 %v1830_v27 }
  0x20   : > { %1596 = vmatpush3.bf16.msra.mxu0 %v1782_v7  ;;  %1718 = vmatpush3.bf16.msra.mxu1 %v1717_v44 }
  0x21   : > { %1597 = vmatprep.subr.bf16.mxu0 %v1783_v8  ;;  %1719 = vmatprep.subr.bf16.mxu1 %v1830_v27 }
  0x24   : > { %1598 = vmatpush3.bf16.msra.mxu0 %v1783_v8  ;;  %1721 = vmatpush3.bf16.msra.mxu1 %v1720_v46 }
  0x25   : > { %1722 = vmatprep.subr.bf16.mxu1 %v1830_v27 }
  0x27   : > { %1600 = vmatmul.mubr.bf16.vlgmr.msra.gmra.mrb[0].mxu0 %v1785_v9 }
  0x28   : > { %1603 = vmatprep.mubr.bf16.mxu0 %v1786_v10  ;;  %1724 = vmatpush3.bf16.msra.mxu1 %v1723_v49 }
  0x29   : > { %1725 = vmatprep.subr.bf16.mxu1 %v1830_v27 }
  0x2f   : > { %1604 = vmatmul.mubr.bf16.gmra.mrb[4].mxu0 %v1787_v11 }
  0x30   : > { %1607 = vmatprep.mubr.bf16.mxu0 %v1788_v12 }
  0x37   : > { %1608 = vmatmul.mubr.bf16.gmra.mrb[8].mxu0 %v1789_v13 }
  0x38   : > { %1611 = vmatprep.mubr.bf16.mxu0 %v1790_v14 }
  0x3f   : > { %1612 = vmatmul.mubr.bf16.gmra.mrb[12].mxu0 %v1791_v15 }
  0x40   : > { %1615 = vmatprep.mubr.bf16.mxu0 %v1792_v16 }
  0x47   : > { %1616 = vmatmul.mubr.bf16.gmra.mrb[16].mxu0 %v1793_v17 }
  0x48   : > { %1619 = vmatprep.mubr.bf16.mxu0 %v1794_v18 }
  0x4f   : > { %1620 = vmatmul.mubr.bf16.gmra.mrb[20].mxu0 %v1795_v19 }
  0x50   : > { %1623 = vmatprep.mubr.bf16.mxu0 %v1796_v20 }
  0x57   : > { %1624 = vmatmul.mubr.bf16.gmra.mrb[24].mxu0 %v1797_v21 }
  0x58   : > { %1627 = vmatprep.mubr.bf16.mxu0 %v1798_v22 }
  0x5f   : > { %1628 = vmatmul.mubr.bf16.gmra.mrb[28].mxu0 %v1799_v23 }
  0xfa   : > { %v1601_v51 = vpop.f32.mrb[0].mxu0 }
  0xfb   : > { %v744_v52 = vmul.f32 %v1601_v51, %v2022_v50  ;;  %v608_v53 = vpop.f32.mrb[1].mxu0 }
  0xfc   : > { %v742_v55 = vmul.f32 %v2022_v50, %v608_v53  ;;  %v1602_v56 = vpop.f32.mrb[2].mxu0 }
  0xfd   : > { %v745_v57 = vmul.f32 %v1602_v56, %v2022_v50  ;;  %v611_v58 = vpop.f32.mrb[3].mxu0  ;;  %v783_v60 = vadd.f32 %v2028_v54, %v744_v52 }
  0xfe   : > { %v743_v59 = vmul.f32 %v2022_v50, %v611_v58  ;;  %v781_v62 = vadd.f32 %v2028_v54, %v742_v55 }
  0xff   : > { %v784_v61 = vadd.f32 %v2028_v54, %v745_v57 }
 0x100   : > { %v782_v63 = vadd.f32 %v2028_v54, %v743_v59 }
 0x101   : > { %v1438_v0 = vpack.c.bf16 %v784_v61, %v783_v60 }
 0x102   : > { %v1433_v1 = vpack.c.bf16 %v782_v63, %v781_v62  ;;  %v980_v2 = vadd.f32 %v782_v63, %v781_v62  ;;  %v1605_v3 = vpop.f32.mrb[4].mxu0 }
 0x103   : > { %1510 = vst [vmem:[%s2041_s26 + $0x8] sm:$0xff] %v1438_v0   ;;  %v748_v4 = vmul.f32 %v1605_v3, %v2022_v50  ;;  %v624_v5 = vpop.f32.mrb[5].mxu0 }
 0x104   : > { %1434 = vst [vmem:[%s2041_s26] sm:$0xff] %v1433_v1   ;;  %v981_v6 = vadd.f32 %v980_v2, %v783_v60  ;;  %v746_v7 = vmul.f32 %v2022_v50, %v624_v5  ;;  %v1606_v8 = vpop.f32.mrb[6].mxu0 }
 0x105   : > { %v749_v9 = vmul.f32 %v1606_v8, %v2022_v50  ;;  %v627_v10 = vpop.f32.mrb[7].mxu0  ;;  %v787_v14 = vadd.f32 %v2028_v54, %v748_v4 }
 0x106   : > { %v785_v11 = vadd.f32 %v2028_v54, %v746_v7  ;;  %v982_v12 = vadd.f32 %v981_v6, %v784_v61  ;;  %v747_v13 = vmul.f32 %v2022_v50, %v627_v10 }
 0x107   : > { %v788_v15 = vadd.f32 %v2028_v54, %v749_v9 }
 0x108   : > { %v983_v16 = vadd.f32 %v982_v12, %v785_v11  ;;  %v786_v17 = vadd.f32 %v2028_v54, %v747_v13 }
 0x109   : > { %v1448_v18 = vpack.c.bf16 %v788_v15, %v787_v14 }
 0x10a   : > { %v1443_v19 = vpack.c.bf16 %v786_v17, %v785_v11  ;;  %v984_v20 = vadd.f32 %v983_v16, %v786_v17  ;;  %v1609_v21 = vpop.f32.mrb[8].mxu0 }
 0x10b   : > { %1512 = vst [vmem:[%s2041_s26 + $0x18] sm:$0xff] %v1448_v18   ;;  %v752_v22 = vmul.f32 %v1609_v21, %v2022_v50  ;;  %v640_v23 = vpop.f32.mrb[9].mxu0 }
 0x10c   : > { %1511 = vst [vmem:[%s2041_s26 + $0x10] sm:$0xff] %v1443_v19   ;;  %v985_v24 = vadd.f32 %v984_v20, %v787_v14  ;;  %v750_v25 = vmul.f32 %v2022_v50, %v640_v23  ;;  %v1610_v26 = vpop.f32.mrb[10].mxu0 }
 0x10d   : > { %v753_v28 = vmul.f32 %v1610_v26, %v2022_v50  ;;  %v643_v29 = vpop.f32.mrb[11].mxu0  ;;  %v791_v33 = vadd.f32 %v2028_v54, %v752_v22 }
 0x10e   : > { %v789_v30 = vadd.f32 %v2028_v54, %v750_v25  ;;  %v986_v31 = vadd.f32 %v985_v24, %v788_v15  ;;  %v751_v32 = vmul.f32 %v2022_v50, %v643_v29 }
 0x10f   : > { %v792_v34 = vadd.f32 %v2028_v54, %v753_v28 }
 0x110   : > { %v987_v35 = vadd.f32 %v986_v31, %v789_v30  ;;  %v790_v36 = vadd.f32 %v2028_v54, %v751_v32 }
 0x111   : > { %v1458_v37 = vpack.c.bf16 %v792_v34, %v791_v33 }
 0x112   : > { %v1453_v38 = vpack.c.bf16 %v790_v36, %v789_v30  ;;  %v988_v40 = vadd.f32 %v987_v35, %v790_v36  ;;  %v1613_v41 = vpop.f32.mrb[12].mxu0 }
 0x113   : > { %1514 = vst [vmem:[%s2041_s26 + $0x28] sm:$0xff] %v1458_v37   ;;  %v756_v42 = vmul.f32 %v1613_v41, %v2022_v50  ;;  %v656_v43 = vpop.f32.mrb[13].mxu0 }
 0x114   : > { %1513 = vst [vmem:[%s2041_s26 + $0x20] sm:$0xff] %v1453_v38   ;;  %v989_v44 = vadd.f32 %v988_v40, %v791_v33  ;;  %v754_v45 = vmul.f32 %v2022_v50, %v656_v43  ;;  %v1614_v46 = vpop.f32.mrb[14].mxu0 }
 0x115   : > { %v757_v47 = vmul.f32 %v1614_v46, %v2022_v50  ;;  %v659_v48 = vpop.f32.mrb[15].mxu0  ;;  %v795_v53 = vadd.f32 %v2028_v54, %v756_v42 }
 0x116   : > { %v793_v49 = vadd.f32 %v2028_v54, %v754_v45  ;;  %v990_v51 = vadd.f32 %v989_v44, %v792_v34  ;;  %v755_v52 = vmul.f32 %v2022_v50, %v659_v48 }
 0x117   : > { %v796_v55 = vadd.f32 %v2028_v54, %v757_v47 }
 0x118   : > { %v991_v56 = vadd.f32 %v990_v51, %v793_v49  ;;  %v794_v57 = vadd.f32 %v2028_v54, %v755_v52 }
 0x119   : > { %v1468_v58 = vpack.c.bf16 %v796_v55, %v795_v53 }
 0x11a   : > { %v1463_v59 = vpack.c.bf16 %v794_v57, %v793_v49  ;;  %v992_v60 = vadd.f32 %v991_v56, %v794_v57  ;;  %v1617_v61 = vpop.f32.mrb[16].mxu0 }
 0x11b   : > { %1516 = vst [vmem:[%s2041_s26 + $0x38] sm:$0xff] %v1468_v58   ;;  %v760_v62 = vmul.f32 %v1617_v61, %v2022_v50  ;;  %v672_v63 = vpop.f32.mrb[17].mxu0 }
 0x11c   : > { %1515 = vst [vmem:[%s2041_s26 + $0x30] sm:$0xff] %v1463_v59   ;;  %v993_v0 = vadd.f32 %v992_v60, %v795_v53  ;;  %v758_v1 = vmul.f32 %v2022_v50, %v672_v63  ;;  %v1618_v2 = vpop.f32.mrb[18].mxu0 }
 0x11d   : > { %v761_v3 = vmul.f32 %v1618_v2, %v2022_v50  ;;  %v675_v4 = vpop.f32.mrb[19].mxu0  ;;  %v799_v8 = vadd.f32 %v2028_v54, %v760_v62 }
 0x11e   : > { %v797_v5 = vadd.f32 %v2028_v54, %v758_v1  ;;  %v994_v6 = vadd.f32 %v993_v0, %v796_v55  ;;  %v759_v7 = vmul.f32 %v2022_v50, %v675_v4 }
 0x11f   : > { %v800_v9 = vadd.f32 %v2028_v54, %v761_v3 }
 0x120   : > { %v995_v10 = vadd.f32 %v994_v6, %v797_v5  ;;  %v798_v11 = vadd.f32 %v2028_v54, %v759_v7 }
 0x121   : > { %v1478_v12 = vpack.c.bf16 %v800_v9, %v799_v8 }
 0x122   : > { %v1473_v13 = vpack.c.bf16 %v798_v11, %v797_v5  ;;  %v996_v14 = vadd.f32 %v995_v10, %v798_v11  ;;  %v1621_v15 = vpop.f32.mrb[20].mxu0 }
 0x123   : > { %1518 = vst [vmem:[%s2041_s26 + $0x48] sm:$0xff] %v1478_v12   ;;  %v764_v16 = vmul.f32 %v1621_v15, %v2022_v50  ;;  %v688_v17 = vpop.f32.mrb[21].mxu0 }
 0x124   : > { %1517 = vst [vmem:[%s2041_s26 + $0x40] sm:$0xff] %v1473_v13   ;;  %v997_v18 = vadd.f32 %v996_v14, %v799_v8  ;;  %v762_v19 = vmul.f32 %v2022_v50, %v688_v17  ;;  %v1622_v20 = vpop.f32.mrb[22].mxu0 }
 0x125   : > { %v765_v21 = vmul.f32 %v1622_v20, %v2022_v50  ;;  %v691_v22 = vpop.f32.mrb[23].mxu0  ;;  %v803_v26 = vadd.f32 %v2028_v54, %v764_v16  ;;  %v979_v16 = vld [vmem:[#allocation2] sm:$0x1] }
 0x126   : > { %v801_v23 = vadd.f32 %v2028_v54, %v762_v19  ;;  %v998_v24 = vadd.f32 %v997_v18, %v800_v9  ;;  %v763_v25 = vmul.f32 %v2022_v50, %v691_v22  ;;  %v1121_v19 = vld [vmem:[%s2195_s6 + $0x8] sm:$0xff]  ;;  %v1122_v22 = vld [vmem:[%s2195_s6 + $0x10] sm:$0xff] }
 0x127   : > { %v804_v28 = vadd.f32 %v2028_v54, %v765_v21 }
 0x128   : > { %v999_v29 = vadd.f32 %v998_v24, %v801_v23  ;;  %v802_v30 = vadd.f32 %v2028_v54, %v763_v25  ;;  %v1124_v25 = vld [vmem:[%s2195_s6 + $0x20] sm:$0xff] }
 0x129   : > { %v1488_v31 = vpack.c.bf16 %v804_v28, %v803_v26 }
 0x12a   : > { %v1483_v32 = vpack.c.bf16 %v802_v30, %v801_v23  ;;  %v1000_v33 = vadd.f32 %v999_v29, %v802_v30  ;;  %v1625_v34 = vpop.f32.mrb[24].mxu0  ;;  %v1123_v23 = vld [vmem:[%s2195_s6 + $0x18] sm:$0xff] }
 0x12b   : > { %1520 = vst [vmem:[%s2041_s26 + $0x58] sm:$0xff] %v1488_v31   ;;  %v768_v35 = vmul.f32 %v1625_v34, %v2022_v50  ;;  %v704_v36 = vpop.f32.mrb[25].mxu0  ;;  %v1729_v24 = vpack.c.bf16 %v1123_v23, %v1122_v22  ;;  %v1127_v29 = vld [vmem:[%s2195_s6 + $0x38] sm:$0xff]  ;;  %v1128_v31 = vld [vmem:[%s2195_s6 + $0x40] sm:$0xff]  ;;  %v1130_v34 = vld [vmem:[%s2195_s6 + $0x50] sm:$0xff] }
 0x12c   : > { %1519 = vst [vmem:[%s2041_s26 + $0x50] sm:$0xff] %v1483_v32   ;;  %v1001_v37 = vadd.f32 %v1000_v33, %v803_v26  ;;  %v766_v38 = vmul.f32 %v2022_v50, %v704_v36  ;;  %v1626_v40 = vpop.f32.mrb[26].mxu0  ;;  %v1129_v32 = vld [vmem:[%s2195_s6 + $0x48] sm:$0xff] }
 0x12d   : > { %v769_v41 = vmul.f32 %v1626_v40, %v2022_v50  ;;  %v707_v42 = vpop.f32.mrb[27].mxu0  ;;  %v807_v46 = vadd.f32 %v2028_v54, %v768_v35  ;;  %v1738_v33 = vpack.c.bf16 %v1129_v32, %v1128_v31  ;;  %v1131_v35 = vld [vmem:[%s2195_s6 + $0x58] sm:$0xff] }
 0x12e   : > { %v805_v43 = vadd.f32 %v2028_v54, %v766_v38  ;;  %v1002_v44 = vadd.f32 %v1001_v37, %v804_v28  ;;  %v767_v45 = vmul.f32 %v2022_v50, %v707_v42  ;;  %v1126_v28 = vld [vmem:[%s2195_s6 + $0x30] sm:$0xff]  ;;  %v1741_v36 = vpack.c.bf16 %v1131_v35, %v1130_v34  ;;  %v1132_v37 = vld [vmem:[%s2195_s6 + $0x60] sm:$0xff]  ;;  %v1133_v38 = vld [vmem:[%s2195_s6 + $0x68] sm:$0xff] }
 0x12f   : > { %v808_v47 = vadd.f32 %v2028_v54, %v769_v41  ;;  %v1735_v30 = vpack.c.bf16 %v1127_v29, %v1126_v28  ;;  %v1744_v40 = vpack.c.bf16 %v1133_v38, %v1132_v37  ;;  %v1134_v41 = vld [vmem:[%s2195_s6 + $0x70] sm:$0xff]  ;;  %v1135_v42 = vld [vmem:[%s2195_s6 + $0x78] sm:$0xff] }
 0x130   : > { %v1003_v48 = vadd.f32 %v1002_v44, %v805_v43  ;;  %v806_v49 = vadd.f32 %v2028_v54, %v767_v45  ;;  %v1040_v44 = vld [vmem:[%s2194_s5] sm:$0x1] }
 0x131   : > { %v1498_v51 = vpack.c.bf16 %v808_v47, %v807_v46 }
 0x132   : > { %v1493_v52 = vpack.c.bf16 %v806_v49, %v805_v43  ;;  %v1004_v53 = vadd.f32 %v1003_v48, %v806_v49  ;;  %v1629_v55 = vpop.f32.mrb[28].mxu0  ;;  %v1747_v43 = vpack.c.bf16 %v1135_v42, %v1134_v41 }
 0x133   : > { %1522 = vst [vmem:[%s2041_s26 + $0x68] sm:$0xff] %v1498_v51   ;;  %v772_v56 = vmul.f32 %v1629_v55, %v2022_v50  ;;  %v720_v57 = vpop.f32.mrb[29].mxu0 }
 0x134   : > { %1521 = vst [vmem:[%s2041_s26 + $0x60] sm:$0xff] %v1493_v52   ;;  %v1005_v58 = vadd.f32 %v1004_v53, %v807_v46  ;;  %v770_v59 = vmul.f32 %v2022_v50, %v720_v57  ;;  %v1630_v60 = vpop.f32.mrb[30].mxu0 }
 0x135   : > { %v773_v61 = vmul.f32 %v1630_v60, %v2022_v50  ;;  %v723_v62 = vpop.f32.mrb[31].mxu0  ;;  %v811_v2 = vadd.f32 %v2028_v54, %v772_v56 }
 0x136   : > { %v809_v63 = vadd.f32 %v2028_v54, %v770_v59  ;;  %v1006_v0 = vadd.f32 %v1005_v58, %v808_v47  ;;  %v771_v1 = vmul.f32 %v2022_v50, %v723_v62 }
 0x137   : > { %v812_v3 = vadd.f32 %v2028_v54, %v773_v61 }
 0x138   : > { %v1007_v4 = vadd.f32 %v1006_v0, %v809_v63  ;;  %v810_v5 = vadd.f32 %v2028_v54, %v771_v1  ;;  %v1120_v54 = vld [vmem:[%s2195_s6] sm:$0xff] }
 0x139   : > { %v1508_v6 = vpack.c.bf16 %v812_v3, %v811_v2  ;;  %v1726_v20 = vpack.c.bf16 %v1121_v19, %v1120_v54 }
 0x13a   : > { %v1503_v7 = vpack.c.bf16 %v810_v5, %v809_v63  ;;  %v1008_v8 = vadd.f32 %v1007_v4, %v810_v5 }
 0x13b   : > { %1524 = vst [vmem:[%s2041_s26 + $0x78] sm:$0xff] %v1508_v6  }
 0x13c   : > { %1523 = vst [vmem:[%s2041_s26 + $0x70] sm:$0xff] %v1503_v7   ;;  %v1009_v9 = vadd.f32 %v1008_v8, %v811_v2 }
 0x13e   : > { %v1010_v10 = vadd.f32 %v1009_v9, %v812_v3 }
 0x140   : > { %v1011_v11 = vrot.slane %v1010_v10, 4 }
 0x142   : > { %v1012_v12 = vadd.f32 %v1011_v11, %v1010_v10 }
 0x144   : > { %v1013_v13 = vrot.slane %v1012_v12, 2 }
 0x146   : > { %v1014_v14 = vadd.f32 %v1013_v13, %v1012_v12 }
 0x148   : > { %v1015_v15 = vrot.slane %v1014_v14, 1 }
 0x14a   : > { %v1016_v50 = vadd.f32 %v1015_v15, %v1014_v14 }
 0x14c   : > { %v1017_v17 = vmul.f32 0.00390625, %v1016_v50 }
 0x14e   : > { %v1018_v18 = vadd.f32 %v1017_v17, %v979_v16 }
 0x150   : > { %1019 = vst [vmem:[#allocation2] sm:$0x1] %v1018_v18 }
 0x157   : > { %v1023_v21 = vld [vmem:[#allocation2] sm:$0x1] }
 0x158   : > { %1664 = vmatmul.mubr.f32.vlgmr.msra.gmra.mrb[0].mxu1 %v1023_v21 }
 0x159   : > { %1727 = vmatpush3.bf16.msra.mxu1 %v1726_v20  ;;  %1698 = vmatprep.mubr.msk.f32.mxu1 %vm1832_vm0, %v1831_v39  ;;  %v1125_v39 = vld [vmem:[%s2195_s6 + $0x28] sm:$0xff] }
 0x15a   : > { %1728 = vmatprep.subr.bf16.mxu1 %v1830_v27  ;;  %v1732_v26 = vpack.c.bf16 %v1125_v39, %v1124_v25 }
 0x15d   : > { %1730 = vmatpush3.bf16.msra.mxu1 %v1729_v24 }
 0x15e   : > { %1731 = vmatprep.subr.bf16.mxu1 %v1830_v27 }
 0x161   : > { %1733 = vmatpush3.bf16.msra.mxu1 %v1732_v26 }
 0x162   : > { %1734 = vmatprep.subr.bf16.mxu1 %v1830_v27 }
 0x165   : > { %1736 = vmatpush3.bf16.msra.mxu1 %v1735_v30 }
 0x166   : > { %1737 = vmatprep.subr.bf16.mxu1 %v1830_v27 }
 0x169   : > { %1739 = vmatpush3.bf16.msra.mxu1 %v1738_v33 }
 0x16a   : > { %1740 = vmatprep.subr.bf16.mxu1 %v1830_v27 }
 0x16d   : > { %1742 = vmatpush3.bf16.msra.mxu1 %v1741_v36 }
 0x16e   : > { %1743 = vmatprep.subr.bf16.mxu1 %v1830_v27 }
 0x171   : > { %1745 = vmatpush3.bf16.msra.mxu1 %v1744_v40 }
 0x172   : > { %1746 = vmatprep.subr.bf16.mxu1 %v1830_v27  ;;  %v1136_v27 = vld [vmem:[%s2196_s7] sm:$0x1] }
 0x175   : > { %1748 = vmatpush3.bf16.msra.mxu1 %v1747_v43 }
 0x22b   : > { %v1107_v45 = vpop.f32.mrb[0].mxu1 }
 0x22c   : > { %v1108_v46 = vadd.f32 %v1107_v45, %v1040_v44  ;;  %v1665_v47 = vpop.f32.mrb[1].mxu1 }
 0x22e   : > { %v1112_v48 = vmul.f32 0.044715, %v1108_v46  ;;  %v1111_v56 = vmul.f32 0.5, %v1108_v46 }
 0x230   : > { %v1113_v49 = vmul.f32 %v1112_v48, %v1108_v46 }
 0x232   : > { %v1114_v51 = vmul.f32 %v1113_v49, %v1108_v46 }
 0x234   : > { %v1115_v52 = vadd.f32 %v1114_v51, %v1108_v46 }
 0x236   : > { %v1116_v53 = vmul.f32 0.7978846, %v1115_v52 }
 0x238   : > { %1800 = vtanh.f32 %v1116_v53 }
 0x242   : > { %v1801_v55 = vpop.eup %1800 }
 0x243   : > { %v1118_v57 = vadd.f32 1.0, %v1801_v55 }
 0x245   : > { %v1119_v58 = vmul.f32 %v1118_v57, %v1111_v56 }
 0x247   : > { %1699 = vmatmul.mubr.f32.vlgmr.msra.gmra.mrb[2].mxu1 %v1119_v58 }
 0x31a   : > { %v1203_v59 = vpop.f32.mrb[2].mxu1 }
 0x31b   : > { %v1204_v60 = vadd.f32 %v1203_v59, %v1136_v27  ;;  %v1700_v61 = vpop.f32.mrb[3].mxu1 }
 0x31d   : > { %v1393_v62 = vmul.f32 -1.442695, %v1204_v60 }
 0x31f   : > { %1802 = vpow2.f32 %v1393_v62 }
 0x329   : > { %v1803_v63 = vpop.eup %1802 }
 0x32a   : > { %v1210_v0 = vadd.f32 1.0, %v1803_v63 }
 0x32c   : > { %1804 = vrcp.f32 %v1210_v0 }
 0x336   : > { %v1805_v1 = vpop.eup %1804 }
 0x337   : > { %1213 = vst [vmem:[%s2001_s29] sm:$0x1] %v1805_v1 }
 0x338 PF: > { %s20_s11 = sadd.s32 1, %s1828_s11   ;;  %s2199_s30 = smov %s1824_s10 }
 0x339   : > { %p17_p5 = scmp.ge.s32.totalorder %s20_s11, 4   ;;  %s2200_s10 = smov %s2202_s12 }
 0x33b   :  { %19 = sbr.rel (!%p17_p5) target bundleno = 2 (0x2), region = 102 }

// kernel: se_bottleneck_forward.5
= control target key start
LH: loop header
LB: loop body
LE: loop exit
PB: predicated region body
PF: predicated region fallthrough
CT: control target
= control target key end

     0   :  { %s5105_s15 = smov 0   ;;  %s5107_s16 = smov 0   ;;  %s6765_s0 = inlined_call_operand.vmem [shape: bf16[2,16,16,128], index: 0, kind: input, shape index: {}]   ;;  %s6766_s1 = inlined_call_operand.vmem [shape: bf16[3,384,128], index: 1, kind: input, shape index: {}]   ;;  %s6767_s2 = inlined_call_operand.vmem [shape: f32[1,128], index: 2, kind: input, shape index: {}]   ;;  %s6768_s3 = inlined_call_operand.vmem [shape: f32[1,128], index: 3, kind: input, shape index: {}]   ;;  %s6769_s4 = inlined_call_operand.vmem [shape: bf16[2,16,16,128], index: 4, kind: output, shape index: {}]  }
   0x1   :  { %s5109_s17 = smov 0  }
   0x2 LB: > { %s26_s18 = sadd.s32 1, %s5073_s16  ;;  %p4182_p0 = scmp.ge.s32.totalorder %s5077_s17, 1  ;;  %s5077_s17 = sphi %s5109_s17, %s14_s17   ;;  %s5073_s16 = sphi %s5107_s16, %s6867_s16   ;;  %s5069_s15 = sphi %s5105_s15, %s6866_s15  }
   0x3   : > { %p28_p1 = scmp.ge.s32.totalorder %s26_s18, 2  ;;  %p201_p2 = scmp.lt.s32.totalorder %s5077_s17, 3 }
   0x5   : > { %s6869_s18 = smov (%p28_p1, %s26_s18), 0  ;;  %p202_p3 = pnand %p4182_p0, %p201_p2 }
   0x7   : > { %205 = sbr.rel (%p202_p3) target bundleno = 719 (0x2cf), region = 36 }
   0xe   : > { %v4941_v0 = vld [vmem:[%s6766_s1] sm:$0xff]   ;;  %v5079_v1 = vmov 0   ;;  %v4943_v3 = vld [vmem:[%s6766_s1 + $0x8] sm:$0xff]   ;;  %p240_p4 = scmp.lt.s32.totalorder %s5069_s15, 1  ;;  %v5203_v5 = vld [vmem:[%s6766_s1 + $0x90] sm:$0xff]   ;;  %vm393_vm0 = vcmask 1043456  }
   0xf   : > { %1227 = vmatprep.subr.bf16.mxu0 %v5079_v1  ;;  %268 = vst [vmem:[#allocation2] sm:$0xff] %v5079_v1  ;;  %271 = vst [vmem:[#allocation2 + $0x18] sm:$0xff] %v5079_v1  ;;  %v5184_v2 = vld [vmem:[%s6766_s1 + $0x80] sm:$0xff]   ;;  %1259 = vmatprep.mubr.bf16.mxu0 %v5079_v1  ;;  %v5196_v4 = vld [vmem:[%s6766_s1 + $0x88] sm:$0xff]   ;;  %vm434_vm1 = vcmask 1047559   ;;  %vm416_vm2 = vcmask 1047552  }
  0x10   : > { %272 = vst [vmem:[#allocation2 + $0x20] sm:$0xff] %v5079_v1  ;;  %273 = vst [vmem:[#allocation2 + $0x28] sm:$0xff] %v5079_v1  ;;  %1228 = vmatpush1.bf16.msra.mxu0 %v4941_v0  ;;  %4900 = vmatprep.subr.bf16.mxu1 %v5184_v2  ;;  %v4945_v6 = vld [vmem:[%s6766_s1 + $0x10] sm:$0xff]   ;;  %s6871_s15 = smov (!%p240_p4, %s5069_s15), 1  ;;  %v5217_v7 = vld [vmem:[%s6766_s1 + $0x98] sm:$0xff]   ;;  %vm387_vm9 = vcmask 1047555  }
  0x11   : > { %274 = vst [vmem:[#allocation2 + $0x30] sm:$0xff] %v5079_v1  ;;  %275 = vst [vmem:[#allocation2 + $0x38] sm:$0xff] %v5079_v1  ;;  %1229 = vmatprep.subr.bf16.mxu0 %v5079_v1  ;;  %4908 = vmatpush3.bf16.msra.mxu1 %v5184_v2  ;;  %v4947_v8 = vld [vmem:[%s6766_s1 + $0x18] sm:$0xff]   ;;  %s4483_s9 = sshll.u32 %s6871_s15, 7  ;;  %v5229_v9 = vld [vmem:[%s6766_s1 + $0xa0] sm:$0xff]   ;;  %vm365_vm12 = vcmask 1047556  }
  0x12   : > { %276 = vst [vmem:[#allocation2 + $0x40] sm:$0xff] %v5079_v1  ;;  %280 = vst [vmem:[#allocation2 + $0x60] sm:$0xff] %v5079_v1  ;;  %4901 = vmatprep.subr.bf16.mxu1 %v5196_v4  ;;  %s5236_s14 = scalar_lea.vmem %s6765_s0, %s4483_s9  ;;  %v4949_v10 = vld [vmem:[%s6766_s1 + $0x20] sm:$0xff]   ;;  %v4951_v12 = vld [vmem:[%s6766_s1 + $0x28] sm:$0xff]   ;;  %vm394_vm3 = vsmask.f32 3328  ;;  %s6616_s29 = scalar_lea.vmem %s6769_s4, %s4483_s9 }
  0x13   : > { %281 = vst [vmem:[#allocation2 + $0x68] sm:$0xff] %v5079_v1  ;;  %282 = vst [vmem:[#allocation2 + $0x70] sm:$0xff] %v5079_v1  ;;  %v4201_v11 = vld [vmem:[%s5236_s14 + $0x20] sm:$0xf]  ;;  %v5251_v13 = vld [vmem:[%s6766_s1 + $0xa8] sm:$0xff]   ;;  %vm371_vm14 = vcmask 1044480  }
  0x14   : > { %283 = vst [vmem:[#allocation2 + $0x78] sm:$0xff] %v5079_v1  ;;  %284 = vst [vmem:[#allocation2 + $0x80] sm:$0xff] %v5079_v1  ;;  %1230 = vmatpush1.bf16.msra.mxu0 %v4943_v3  ;;  %v4202_v14 = vld [vmem:[%s5236_s14 + $0x24] sm:$0xf]  ;;  %v4204_v15 = vcombine.low %v4201_v11, %v4201_v11  ;;  %v5260_v18 = vld [vmem:[%s6766_s1 + $0xb0] sm:$0xff]  }
  0x15   : > { %285 = vst [vmem:[#allocation2 + $0x88] sm:$0xff] %v5079_v1  ;;  %289 = vst [vmem:[#allocation2 + $0xa8] sm:$0xff] %v5079_v1  ;;  %1231 = vmatprep.subr.bf16.mxu0 %v5079_v1  ;;  %4909 = vmatpush3.bf16.msra.mxu1 %v5196_v4  ;;  %v5254_v16 = vcombine.low %v4201_v11, %v4202_v14  ;;  %v4205_v17 = vcombine.low %v4202_v14, %v4202_v14  ;;  %vm435_vm4 = vsmask.f32 7966  ;;  %v5263_v19 = vld [vmem:[%s5236_s14 + $0x28] sm:$0xff]   ;;  %v4953_v20 = vld [vmem:[%s6766_s1 + $0x30] sm:$0xff]  }
  0x16   : > { %290 = vst [vmem:[#allocation2 + $0xb0] sm:$0xff] %v5079_v1  ;;  %291 = vst [vmem:[#allocation2 + $0xb8] sm:$0xff] %v5079_v1  ;;  %4902 = vmatprep.subr.bf16.mxu1 %v5203_v5  ;;  %vm440_vm5 = vsmask.f32 7424  ;;  %v570_v25 = vshll.u32 %v5263_v19, 16  ;;  %v567_v26 = vshrl.u32 %v5263_v19, 16 }
  0x17   : > { %292 = vst [vmem:[#allocation2 + $0xc0] sm:$0xff] %v5079_v1  ;;  %293 = vst [vmem:[#allocation2 + $0xc8] sm:$0xff] %v5079_v1  ;;  %v528_v21 = vshrl.u32 %v5254_v16, 16  ;;  %v531_v22 = vshll.u32 %v5254_v16, 16  ;;  %v4209_v34 = vld [vmem:[%s5236_s14 + $0x30] sm:$0xf] }
  0x18   : > { %294 = vst [vmem:[#allocation2 + $0xd0] sm:$0xff] %v5079_v1  ;;  %298 = vst [vmem:[#allocation2 + $0xf0] sm:$0xff] %v5079_v1  ;;  %1232 = vmatpush1.bf16.msra.mxu0 %v4945_v6  ;;  %v583_v31 = vrot.slane %v570_v25, 1  ;;  %v4210_v35 = vld [vmem:[%s5236_s14 + $0x34] sm:$0xf]  ;;  %v5309_v36 = vld [vmem:[%s6766_s1 + $0xb8] sm:$0xff]   ;;  %v4212_v40 = vcombine.low %v4209_v34, %v4209_v34 }
  0x19   : > { %299 = vst [vmem:[#allocation2 + $0xf8] sm:$0xff] %v5079_v1  ;;  %300 = vst [vmem:[#allocation2 + $0x100] sm:$0xff] %v5079_v1  ;;  %1233 = vmatprep.subr.bf16.mxu0 %v5079_v1  ;;  %4910 = vmatpush3.bf16.msra.mxu1 %v5203_v5  ;;  %v548_v28 = vrot.slane %v528_v21, 4  ;;  %v549_v29 = vrot.slane %v531_v22, 5  ;;  %v5315_v39 = vcombine.low %v4209_v34, %v4210_v35  ;;  %v4955_v41 = vld [vmem:[%s6766_s1 + $0x38] sm:$0xff]   ;;  %v4959_v51 = vld [vmem:[%s6766_s1 + $0x40] sm:$0xff]  }
  0x1a   : > { %301 = vst [vmem:[#allocation2 + $0x108] sm:$0xff] %v5079_v1  ;;  %302 = vst [vmem:[#allocation2 + $0x110] sm:$0xff] %v5079_v1  ;;  %4903 = vmatprep.subr.bf16.mxu1 %v5217_v7  ;;  %v584_v38 = vor.u32 %v583_v31, %v567_v26  ;;  %vm388_vm10 = vsmask.f32 7950  ;;  %v4213_v43 = vcombine.low %v4210_v35, %v4210_v35  ;;  %v5329_v47 = vld [vmem:[%s5236_s14 + $0x38] sm:$0xff]   ;;  %v4960_v61 = vld [vmem:[%s6766_s1 + $0xc0] sm:$0xff]  }
  0x1b   : > { %303 = vst [vmem:[#allocation2 + $0x118] sm:$0xff] %v5079_v1  ;;  %307 = vst [vmem:[#allocation2 + $0x138] sm:$0xff] %v5079_v1  ;;  %v5301_v33 = vor.u32 %v549_v29, %v548_v28  ;;  %v602_v45 = vshrl.u32 %v5315_v39, 16  ;;  %v605_v46 = vshll.u32 %v5315_v39, 16  ;;  %v644_v55 = vshll.u32 %v5329_v47, 16  ;;  %v4962_v14 = vld [vmem:[%s6766_s1 + $0xc8] sm:$0xff]  }
  0x1c   : > { %308 = vst [vmem:[#allocation2 + $0x140] sm:$0xff] %v5079_v1  ;;  %309 = vst [vmem:[#allocation2 + $0x148] sm:$0xff] %v5079_v1  ;;  %1234 = vmatpush1.bf16.msra.mxu0 %v4947_v8  ;;  %v641_v58 = vshrl.u32 %v5329_v47, 16  ;;  %v4217_v59 = vld [vmem:[%s5236_s14 + $0x40] sm:$0xf]  ;;  %v4961_v8 = vld [vmem:[%s6766_s1 + $0x48] sm:$0xff]  }
  0x1d   : > { %310 = vst [vmem:[#allocation2 + $0x150] sm:$0xff] %v5079_v1  ;;  %311 = vst [vmem:[#allocation2 + $0x158] sm:$0xff] %v5079_v1  ;;  %1235 = vmatprep.subr.bf16.mxu0 %v5079_v1  ;;  %4911 = vmatpush3.bf16.msra.mxu1 %v5217_v7  ;;  %v622_v53 = vrot.slane %v602_v45, 4  ;;  %v623_v54 = vrot.slane %v605_v46, 5  ;;  %v657_v57 = vrot.slane %v644_v55, 1  ;;  %v4220_v11 = vcombine.low %v4217_v59, %v4217_v59  ;;  %v4964_v29 = vld [vmem:[%s6766_s1 + $0x50] sm:$0xff]  }
  0x1e   : > { %312 = vst [vmem:[#allocation2 + $0x160] sm:$0xff] %v5079_v1  ;;  %316 = vst [vmem:[#allocation2 + $0x180] sm:$0xff] %v5079_v1  ;;  %4904 = vmatprep.subr.bf16.mxu1 %v5229_v9  ;;  %v4218_v60 = vld [vmem:[%s5236_s14 + $0x44] sm:$0xf]  ;;  %vm366_vm13 = vsmask.f32 7954 }
  0x1f   : > { %317 = vst [vmem:[#allocation2 + $0x188] sm:$0xff] %v5079_v1  ;;  %318 = vst [vmem:[#allocation2 + $0x190] sm:$0xff] %v5079_v1  ;;  %v555_v24 = vld [vmem:[#allocation2 + $0xd0] sm:$0xf]  ;;  %v587_v30 = vld [vmem:[#allocation2 + $0xd0] sm:$0x80]  ;;  %v624_v56 = vor.u32 %v623_v54, %v622_v53  ;;  %v658_v3 = vor.u32 %v657_v57, %v641_v58 }
  0x20   : > { %319 = vst [vmem:[#allocation2 + $0x198] sm:$0xff] %v5079_v1  ;;  %320 = vst [vmem:[#allocation2 + $0x1a0] sm:$0xff] %v5079_v1  ;;  %1236 = vmatpush1.bf16.msra.mxu0 %v4949_v10  ;;  %v626_v48 = vld [vmem:[#allocation2 + $0x100] sm:$0xf8]  ;;  %v5370_v10 = vcombine.low %v4217_v59, %v4218_v60  ;;  %v5414_v54 = vld [vmem:[%s5236_s14 + $0x50] sm:$0xf] }
  0x21   : > { %321 = vst [vmem:[#allocation2 + $0x1a8] sm:$0xff] %v5079_v1  ;;  %325 = vst [vmem:[#allocation2 + $0x1c8] sm:$0xff] %v5079_v1  ;;  %1237 = vmatprep.subr.bf16.mxu0 %v5079_v1  ;;  %4912 = vmatpush3.bf16.msra.mxu1 %v5229_v9  ;;  %v4969_v59 = vld [vmem:[%s6766_s1 + $0x60] sm:$0xff]   ;;  %vm417_vm15 = vsmask.f32 7938  ;;  %v4987_v39 = vld [vmem:[%s6766_s1 + $0x118] sm:$0xff]  }
  0x22   : > { %326 = vst [vmem:[#allocation2 + $0x1d0] sm:$0xff] %v5079_v1  ;;  %327 = vst [vmem:[#allocation2 + $0x1d8] sm:$0xff] %v5079_v1  ;;  %4905 = vmatprep.subr.bf16.mxu1 %v5251_v13  ;;  %v629_v49 = vld [vmem:[#allocation2 + $0x118] sm:$0xf]  ;;  %v661_v50 = vld [vmem:[#allocation2 + $0x118] sm:$0x80] }
  0x23   : > { %328 = vst [vmem:[#allocation2 + $0x1e0] sm:$0xff] %v5079_v1  ;;  %329 = vst [vmem:[#allocation2 + $0x1e8] sm:$0xff] %v5079_v1  ;;  %v462_v16 = vld [vmem:[#allocation2 + $0x60] sm:$0xf0]  ;;  %v5031_v52 = vld [vmem:[%s6766_s1 + $0x1f0] sm:$0xff]  }
  0x24   : > { %330 = vst [vmem:[#allocation2 + $0x1f0] sm:$0xff] %v5079_v1  ;;  %334 = vst [vmem:[#allocation2 + $0x210] sm:$0xff] %v5079_v1  ;;  %1238 = vmatpush1.bf16.msra.mxu0 %v4951_v12 }
  0x25   : > { %335 = vst [vmem:[#allocation2 + $0x218] sm:$0xff] %v5079_v1  ;;  %336 = vst [vmem:[#allocation2 + $0x220] sm:$0xff] %v5079_v1  ;;  %1239 = vmatprep.subr.bf16.mxu0 %v5079_v1  ;;  %4913 = vmatpush3.bf16.msra.mxu1 %v5251_v13  ;;  %v703_v28 = vld [vmem:[#allocation2 + $0x160] sm:$0xf]  ;;  %v735_v35 = vld [vmem:[#allocation2 + $0x160] sm:$0x80] }
  0x26   : > { %337 = vst [vmem:[#allocation2 + $0x228] sm:$0xff] %v5079_v1  ;;  %338 = vst [vmem:[#allocation2 + $0x230] sm:$0xff] %v5079_v1  ;;  %4906 = vmatprep.subr.bf16.mxu1 %v5260_v18 }
  0x27   : > { %339 = vst [vmem:[#allocation2 + $0x238] sm:$0xff] %v5079_v1  ;;  %343 = vst [vmem:[#allocation2 + $0x258] sm:$0xff] %v5079_v1 }
  0x28   : > { %344 = vst [vmem:[#allocation2 + $0x260] sm:$0xff] %v5079_v1  ;;  %345 = vst [vmem:[#allocation2 + $0x268] sm:$0xff] %v5079_v1  ;;  %1240 = vmatpush1.bf16.msra.mxu0 %v4953_v20  ;;  %v5381_v20 = vld [vmem:[%s5236_s14 + $0x48] sm:$0xff]  }
  0x29   : > { %546 = vst [vmem:[#allocation2 + $0xb0] sm:$0xf0] %v4204_v15  ;;  %547 = vst [vmem:[#allocation2 + $0xc8] sm:$0xf] %v4205_v17  ;;  %1241 = vmatprep.subr.bf16.mxu0 %v5079_v1  ;;  %4914 = vmatpush3.bf16.msra.mxu1 %v5260_v18  ;;  %v6785_v15 = vshrl.u32 %v5370_v10, 16  ;;  %v6784_v17 = vshll.u32 %v5370_v10, 16 }
  0x2a   : > { %vm5274_vm6 = vmand %vm393_vm0, %vm394_vm3  ;;  %582 = vst [vmem:[#allocation2 + $0xe0] sm:$0xff] %v5263_v19  ;;  %4907 = vmatprep.subr.bf16.mxu1 %v5309_v36  ;;  %v6780_v34 = vshll.u32 %v5381_v20, 16 }
  0x2b   : > { %vm5283_vm7 = vmand %vm434_vm1, %vm435_vm4  ;;  %v556_v42 = vsel %vm5274_vm6, %v5301_v33, %v555_v24  ;;  %620 = vst [vmem:[#allocation2 + $0xf8] sm:$0xf0] %v4212_v40  ;;  %v630_v63 = vsel %vm5274_vm6, %v624_v56, %v629_v49  ;;  %v700_v24 = vld [vmem:[#allocation2 + $0x148] sm:$0xf8]  ;;  %v4967_v40 = vld [vmem:[%s6766_s1 + $0x58] sm:$0xff]  }
  0x2c   : > { %vm5296_vm8 = vmand %vm416_vm2, %vm440_vm5  ;;  %v588_v37 = vsel %vm5283_vm7, %v583_v31, %v587_v30  ;;  %557 = vst [vmem:[#allocation2 + $0xd0] sm:$0xf] %v556_v42  ;;  %1242 = vmatpush1.bf16.msra.mxu0 %v4955_v41  ;;  %v662_v0 = vsel %vm5283_vm7, %v657_v57, %v661_v50  ;;  %v696_v30 = vrot.slane %v6785_v15, 4  ;;  %v697_v31 = vrot.slane %v6784_v17, 5  ;;  %v4968_v57 = vld [vmem:[%s6766_s1 + $0xd8] sm:$0xff]  }
  0x2d   : > { %589 = vst [vmem:[#allocation2 + $0xd0] sm:$0x80] %v588_v37  ;;  %v591_v44 = vsel %vm5296_vm8, %v584_v38, 0  ;;  %621 = vst [vmem:[#allocation2 + $0x110] sm:$0xf] %v4213_v43  ;;  %1243 = vmatprep.subr.bf16.mxu0 %v5079_v1  ;;  %4915 = vmatpush3.bf16.msra.mxu1 %v5309_v36  ;;  %v665_v12 = vsel %vm5296_vm8, %v658_v3, 0  ;;  %v4221_v43 = vcombine.low %v4218_v60, %v4218_v60 }
  0x2e   : > { %592 = vst [vmem:[#allocation2 + $0xe8] sm:$0xff] %v591_v44  ;;  %vm5338_vm11 = vmand %vm387_vm9, %vm388_vm10  ;;  %2336 = vmatprep.subr.bf16.mxu1 %v5079_v1  ;;  %v4966_v37 = vld [vmem:[%s6766_s1 + $0xd0] sm:$0xff]   ;;  %v6781_v38 = vshrl.u32 %v5381_v20, 16  ;;  %v698_v41 = vor.u32 %v697_v31, %v696_v30  ;;  %v731_v42 = vrot.slane %v6780_v34, 1  ;;  %v777_v30 = vld [vmem:[#allocation2 + $0x1a8] sm:$0xf] }
  0x2f   : > { %656 = vst [vmem:[#allocation2 + $0x128] sm:$0xff] %v5329_v47  ;;  %v627_v62 = vsel %vm5338_vm11, %v624_v56, %v626_v48  ;;  %631 = vst [vmem:[#allocation2 + $0x118] sm:$0xf] %v630_v63  ;;  %v5417_v56 = vld [vmem:[%s5236_s14 + $0x54] sm:$0xf]  ;;  %v5438_v63 = vrot.slane %v567_v26, 7 }
  0x30   : > { %1244 = vmatpush1.bf16.msra.mxu0 %v4959_v51  ;;  %628 = vst [vmem:[#allocation2 + $0x100] sm:$0xf8] %v627_v62  ;;  %663 = vst [vmem:[#allocation2 + $0x118] sm:$0x80] %v662_v0  ;;  %v701_v49 = vsel %vm5338_vm11, %v698_v41, %v700_v24  ;;  %v704_v50 = vsel %vm5274_vm6, %v698_v41, %v703_v28  ;;  %v736_v51 = vsel %vm5283_vm7, %v731_v42, %v735_v35  ;;  %v5434_v62 = vld [vmem:[%s5236_s14 + $0x58] sm:$0xff]   ;;  %v4971_v26 = vld [vmem:[%s6766_s1 + $0xe0] sm:$0xff]  }
  0x31   : > { %1245 = vmatprep.subr.bf16.mxu0 %v5079_v1  ;;  %666 = vst [vmem:[#allocation2 + $0x130] sm:$0xff] %v665_v12  ;;  %694 = vst [vmem:[#allocation2 + $0x140] sm:$0xf0] %v4220_v11  ;;  %v732_v53 = vor.u32 %v731_v42, %v6781_v38  ;;  %v5427_v60 = vcombine.low %v5414_v54, %v5417_v56  ;;  %v6770_v11 = vshll.u32 %v5434_v62, 16  ;;  %v349_v24 = vld [vmem:[%s5236_s14] sm:$0xf] }
  0x32   : > { %730 = vst [vmem:[#allocation2 + $0x170] sm:$0xff] %v5381_v20  ;;  %695 = vst [vmem:[#allocation2 + $0x158] sm:$0xf] %v4221_v43  ;;  %v6771_v28 = vshrl.u32 %v5434_v62, 16  ;;  %v350_v35 = vld [vmem:[%s5236_s14 + $0x4] sm:$0xf] }
  0x33   : > { %702 = vst [vmem:[#allocation2 + $0x148] sm:$0xf8] %v701_v49  ;;  %705 = vst [vmem:[#allocation2 + $0x160] sm:$0xf] %v704_v50  ;;  %v6779_v0 = vshrl.u32 %v5427_v60, 16  ;;  %v6772_v3 = vshll.u32 %v5427_v60, 16  ;;  %v4189_v49 = vcombine.low %v350_v35, %v350_v35 }
  0x34   : > { %v989_v6 = vld [vmem:[#allocation2 + $0xd0] sm:$0xff]  ;;  %1246 = vmatpush1.bf16.msra.mxu0 %v4961_v8  ;;  %737 = vst [vmem:[#allocation2 + $0x160] sm:$0x80] %v736_v51  ;;  %804 = vst [vmem:[#allocation2 + $0x1b8] sm:$0xff] %v5434_v62  ;;  %v805_v31 = vrot.slane %v6770_v11, 1  ;;  %v4973_v50 = vld [vmem:[%s6766_s1 + $0xe8] sm:$0xff]  }
  0x35   : > { %4740 = vmatprep.mubr.bf16.mxu1 %v989_v6  ;;  %1247 = vmatprep.subr.bf16.mxu0 %v5079_v1  ;;  %v809_v6 = vld [vmem:[#allocation2 + $0x1a8] sm:$0x80]  ;;  %v774_v8 = vld [vmem:[#allocation2 + $0x190] sm:$0xf8]  ;;  %v5478_v51 = vld [vmem:[%s5236_s14 + $0x64] sm:$0xf] }
  0x36   : > { %4741 = vmatmul.mubr.bf16.vlgmr.msra.gmra.mrb[0].mxu1 %v591_v44  ;;  %v810_v19 = vsel %vm5283_vm7, %v805_v31, %v809_v6  ;;  %vm372_vm1 = vsmask.f32 4352  ;;  %382 = vst [vmem:[#allocation2 + $0x38] sm:$0xf] %v4189_v49  ;;  %vm5486_vm3 = vmand %vm416_vm2, %vm417_vm15  ;;  %vm422_vm5 = vcmask 1040384  }
  0x37   : > { %2337 = vmatpush1.bf16.msra.mxu1 %v4960_v61  ;;  %v995_v44 = vld [vmem:[#allocation2 + $0x100] sm:$0xff]  ;;  %v998_v48 = vld [vmem:[#allocation2 + $0x118] sm:$0xff]  ;;  %v5431_v61 = vsel %vm5296_vm8, %v732_v53, 0  ;;  %811 = vst [vmem:[#allocation2 + $0x1a8] sm:$0x80] %v810_v19  ;;  %vm5508_vm2 = vmand %vm365_vm12, %vm366_vm13 }
  0x38   : > { %2338 = vmatprep.subr.bf16.mxu1 %v5079_v1  ;;  %4744 = vmatprep.mubr.bf16.mxu1 %v995_v44  ;;  %740 = vst [vmem:[#allocation2 + $0x178] sm:$0xff] %v5431_v61  ;;  %v4187_v44 = vcombine.low %v349_v24, %v350_v35  ;;  %vm5522_vm4 = vmand %vm371_vm14, %vm372_vm1  ;;  %v4193_v38 = vld [vmem:[%s5236_s14 + $0x10] sm:$0xf]  ;;  %vm423_vm9 = vsmask.f32 256 }
  0x39   : > { %1248 = vmatpush1.bf16.msra.mxu0 %v4964_v29  ;;  %v4972_v29 = vld [vmem:[%s6766_s1 + $0x68] sm:$0xff]   ;;  %v4196_v17 = vcombine.low %v4193_v38, %v4193_v38  ;;  %v425_v15 = vld [vmem:[#allocation2 + $0x60] sm:$0x1]  ;;  %vm5644_vm10 = vmand %vm422_vm5, %vm423_vm9 }
  0x3a   : > { %1249 = vmatprep.subr.bf16.mxu0 %v5079_v1  ;;  %v1004_v41 = vld [vmem:[#allocation2 + $0x148] sm:$0xff] }
  0x3b   : > { %2339 = vmatpush1.bf16.msra.mxu1 %v4962_v14  ;;  %v771_v14 = vrot.slane %v6772_v3, 5  ;;  %v1007_v42 = vld [vmem:[#allocation2 + $0x160] sm:$0xff]  ;;  %v883_v3 = vld [vmem:[#allocation2 + $0x1f0] sm:$0x80]  ;;  %472 = vst [vmem:[#allocation2 + $0x68] sm:$0xf0] %v4196_v17 }
  0x3c   : > { %2340 = vmatprep.subr.bf16.mxu1 %v5079_v1 }
  0x3d   : > { %1250 = vmatpush1.bf16.msra.mxu0 %v4967_v40  ;;  %v572_v40 = vor.u32 %v570_v25, %v5438_v63  ;;  %v806_v25 = vor.u32 %v805_v31, %v6771_v28 }
  0x3e   : > { %4745 = vmatmul.mubr.bf16.gmra.mrb[4].mxu1 %v998_v48  ;;  %1251 = vmatprep.subr.bf16.mxu0 %v5079_v1  ;;  %v5467_v48 = vld [vmem:[%s5236_s14 + $0x60] sm:$0xf] }
  0x3f   : > { %2341 = vmatpush1.bf16.msra.mxu1 %v4966_v37  ;;  %4748 = vmatprep.mubr.bf16.mxu1 %v665_v12  ;;  %v770_v12 = vrot.slane %v6779_v0, 4  ;;  %v4188_v37 = vcombine.low %v349_v24, %v349_v24  ;;  %v5495_v24 = vsel %vm5296_vm8, %v806_v25, 0  ;;  %v5503_v31 = vsel %vm5486_vm3, %v572_v40, 0  ;;  %v922_v0 = vld [vmem:[#allocation2 + $0x220] sm:$0xf8] }
  0x40   : > { %2342 = vmatprep.subr.bf16.mxu1 %v5079_v1  ;;  %814 = vst [vmem:[#allocation2 + $0x1c0] sm:$0xff] %v5495_v24  ;;  %577 = vst [vmem:[#allocation2 + $0xd8] sm:$0xff] %v5503_v31 }
  0x41   : > { %1252 = vmatpush1.bf16.msra.mxu0 %v4969_v59  ;;  %v772_v43 = vor.u32 %v771_v14, %v770_v12  ;;  %381 = vst [vmem:[#allocation2 + $0x20] sm:$0xf0] %v4188_v37  ;;  %v357_v59 = vshrl.u32 %v4187_v44, 16  ;;  %v360_v12 = vshll.u32 %v4187_v44, 16  ;;  %v4975_v14 = vld [vmem:[%s6766_s1 + $0x70] sm:$0xff]  }
  0x42   : > { %1253 = vmatprep.subr.bf16.mxu0 %v5079_v1 }
  0x43   : > { %2343 = vmatpush1.bf16.msra.mxu1 %v4968_v57  ;;  %v775_v53 = vsel %vm5338_vm11, %v772_v43, %v774_v8  ;;  %v778_v57 = vsel %vm5274_vm6, %v772_v43, %v777_v30  ;;  %v368_v8 = vld [vmem:[#allocation2 + $0x18] sm:$0xf0]  ;;  %v5499_v30 = vcombine.low %v5467_v48, %v5478_v51  ;;  %v362_v35 = vrot.slane %v360_v12, 4  ;;  %v374_v43 = vld [vmem:[#allocation2 + $0x30] sm:$0x1f] }
  0x44   : > { %2344 = vmatprep.subr.bf16.mxu1 %v5079_v1  ;;  %776 = vst [vmem:[#allocation2 + $0x190] sm:$0xf8] %v775_v53  ;;  %779 = vst [vmem:[#allocation2 + $0x1a8] sm:$0xf] %v778_v57  ;;  %v383_v37 = vrot.slane %v357_v59, 4 }
  0x45   : > { %1254 = vmatpush1.bf16.msra.mxu0 %v4972_v29  ;;  %v4976_v29 = vld [vmem:[%s6766_s1 + $0xf0] sm:$0xff]   ;;  %v6778_v40 = vshrl.u32 %v5499_v30, 16  ;;  %v6773_v44 = vshll.u32 %v5499_v30, 16  ;;  %v848_v53 = vld [vmem:[#allocation2 + $0x1d8] sm:$0xf8] }
  0x46   : > { %4749 = vmatmul.mubr.bf16.gmra.mrb[8].mxu1 %v1004_v41  ;;  %v384_v41 = vrot.slane %v360_v12, 5  ;;  %1255 = vmatprep.subr.bf16.mxu0 %v5079_v1  ;;  %v851_v57 = vld [vmem:[#allocation2 + $0x1f0] sm:$0xf]  ;;  %v4228_v12 = vcombine.low %v5414_v54, %v5414_v54 }
  0x47   : > { %2345 = vmatpush1.bf16.msra.mxu1 %v4971_v26  ;;  %4752 = vmatprep.mubr.bf16.mxu1 %v1007_v42  ;;  %v359_v26 = vrot.slane %v357_v59, 3  ;;  %v5529_v59 = vld [vmem:[%s5236_s14 + $0x68] sm:$0xff]   ;;  %v844_v11 = vrot.slane %v6778_v40, 4  ;;  %v845_v28 = vrot.slane %v6773_v44, 5  ;;  %v4994_v44 = vld [vmem:[%s5236_s14 + $0x78] sm:$0xff]  }
  0x48   : > { %2346 = vmatprep.subr.bf16.mxu1 %v5079_v1  ;;  %v5526_v19 = vor.u32 %v384_v41, %v383_v37  ;;  %878 = vst [vmem:[#allocation2 + $0x200] sm:$0xff] %v5529_v59  ;;  %v6776_v37 = vshrl.u32 %v5529_v59, 16  ;;  %v5549_v41 = vld [vmem:[%s5236_s14 + $0x8] sm:$0xff]   ;;  %768 = vst [vmem:[#allocation2 + $0x188] sm:$0xf0] %v4228_v12 }
  0x49   : > { %v363_v25 = vor.u32 %v362_v35, %v359_v26  ;;  %1256 = vmatpush1.bf16.msra.mxu0 %v4975_v14  ;;  %v4977_v26 = vld [vmem:[%s6766_s1 + $0x78] sm:$0xff]   ;;  %v846_v14 = vor.u32 %v845_v28, %v844_v11  ;;  %v6775_v11 = vshrl.u32 %v5549_v41, 16  ;;  %429 = vst [vmem:[#allocation2 + $0x50] sm:$0xff] %v5549_v41  ;;  %v6777_v28 = vshll.u32 %v5549_v41, 16  ;;  %952 = vst [vmem:[#allocation2 + $0x248] sm:$0xff] %v4994_v44 }
  0x4a   : > { %1257 = vmatprep.subr.bf16.mxu0 %v5079_v1 }
  0x4b   : > { %2347 = vmatpush1.bf16.msra.mxu1 %v4973_v50  ;;  %v369_v35 = vsel %vm5508_vm2, %v363_v25, %v368_v8  ;;  %v375_v54 = vsel %vm5522_vm4, %v363_v25, %v374_v43  ;;  %v6774_v50 = vshll.u32 %v5529_v59, 16  ;;  %v5554_v8 = vrot.slane %v641_v58, 7  ;;  %v4978_v43 = vld [vmem:[%s6766_s1 + $0xf8] sm:$0xff]   ;;  %v1013_v25 = vld [vmem:[#allocation2 + $0x190] sm:$0xff] }
  0x4c   : > { %2348 = vmatprep.subr.bf16.mxu1 %v5079_v1  ;;  %370 = vst [vmem:[#allocation2 + $0x18] sm:$0xf0] %v369_v35  ;;  %376 = vst [vmem:[#allocation2 + $0x30] sm:$0x1f] %v375_v54  ;;  %v849_v58 = vsel %vm5338_vm11, %v846_v14, %v848_v53  ;;  %v5570_v35 = vld [vmem:[%s5236_s14 + $0x70] sm:$0xf] }
  0x4d   : > { %v879_v12 = vrot.slane %v6774_v50, 1  ;;  %v5573_v54 = vld [vmem:[%s5236_s14 + $0x74] sm:$0xf]  ;;  %v646_v50 = vor.u32 %v644_v55, %v5554_v8  ;;  %1258 = vmatpush1.bf16.msra.mxu0 %v4977_v26  ;;  %850 = vst [vmem:[#allocation2 + $0x1d8] sm:$0xf8] %v849_v58  ;;  %v1016_v55 = vld [vmem:[#allocation2 + $0x1a8] sm:$0xff] }
  0x4e   : > { %4753 = vmatmul.mubr.bf16.gmra.mrb[12].mxu1 %v5431_v61  ;;  %v852_v61 = vsel %vm5274_vm6, %v846_v14, %v851_v57  ;;  %v5586_v14 = vrot.slane %v6775_v11, 7  ;;  %v5590_v47 = vcombine.low %v5570_v35, %v5573_v54  ;;  %4708 = vmatprep.subr.bf16.mxu0 %v5184_v2  ;;  %v4981_v26 = vld [vmem:[%s6766_s1 + $0x100] sm:$0xff]  }
  0x4f   : > { %2349 = vmatpush1.bf16.msra.mxu1 %v4976_v29  ;;  %4756 = vmatprep.mubr.bf16.mxu1 %v1013_v25  ;;  %v967_v29 = vld [vmem:[#allocation2 + $0x20] sm:$0xff]  ;;  %853 = vst [vmem:[#allocation2 + $0x1f0] sm:$0xf] %v852_v61  ;;  %v884_v53 = vsel %vm5283_vm7, %v879_v12, %v883_v3  ;;  %v880_v57 = vor.u32 %v879_v12, %v6776_v37  ;;  %v937_v3 = vshrl.u32 %v4994_v44, 16  ;;  %v940_v25 = vshll.u32 %v4994_v44, 16 }
  0x50   : > { %2350 = vmatprep.subr.bf16.mxu1 %v5079_v1  ;;  %885 = vst [vmem:[#allocation2 + $0x1f0] sm:$0x80] %v884_v53  ;;  %v5598_v12 = vsel %vm5486_vm3, %v646_v50, 0  ;;  %v413_v61 = vor.u32 %v6777_v28, %v5586_v14  ;;  %v6782_v11 = vshrl.u32 %v5590_v47, 16  ;;  %v6783_v37 = vshll.u32 %v5590_v47, 16  ;;  %1260 = vmatmul.mubr.bf16.vlgmr.msra.gmra.mrb[0].mxu0 %v5079_v1 }
  0x51   : > { %v5602_v58 = vsel %vm5296_vm8, %v880_v57, 0  ;;  %v957_v53 = vld [vmem:[#allocation2 + $0x238] sm:$0x80]  ;;  %651 = vst [vmem:[#allocation2 + $0x120] sm:$0xff] %v5598_v12  ;;  %v5612_v44 = vrot.slane %v937_v3, 7  ;;  %v953_v50 = vrot.slane %v940_v25, 1  ;;  %v4229_v57 = vcombine.low %v5417_v56, %v5417_v56  ;;  %4709 = vmatpush3.bf16.msra.mxu0 %v5184_v2  ;;  %1267 = vmatprep.mubr.bf16.mxu0 %v967_v29 }
  0x52   : > { %888 = vst [vmem:[#allocation2 + $0x208] sm:$0xff] %v5602_v58  ;;  %v5620_v28 = vsel %vm5486_vm3, %v413_v61, 0  ;;  %v919_v40 = vrot.slane %v6783_v37, 5  ;;  %4710 = vmatprep.subr.bf16.mxu0 %v5196_v4  ;;  %v925_v56 = vld [vmem:[#allocation2 + $0x238] sm:$0xf] }
  0x53   : > { %2351 = vmatpush1.bf16.msra.mxu1 %v4978_v43  ;;  %v918_v43 = vrot.slane %v6782_v11, 4  ;;  %421 = vst [vmem:[#allocation2 + $0x48] sm:$0xff] %v5620_v28  ;;  %v5629_v2 = vor.u32 %v940_v25, %v5612_v44  ;;  %v5631_v34 = vor.u32 %v953_v50, %v937_v3  ;;  %v958_v61 = vsel %vm5283_vm7, %v953_v50, %v957_v53  ;;  %v4194_v11 = vld [vmem:[%s5236_s14 + $0x14] sm:$0xf]  ;;  %v4982_v3 = vld [vmem:[%s6766_s1 + $0x108] sm:$0xff]   ;;  %v5653_v53 = vld [vmem:[#allocation2 + $0x38] sm:$0xff] }
  0x54   : > { %2352 = vmatprep.subr.bf16.mxu1 %v5079_v1  ;;  %769 = vst [vmem:[#allocation2 + $0x1a0] sm:$0xf] %v4229_v57  ;;  %959 = vst [vmem:[#allocation2 + $0x238] sm:$0x80] %v958_v61  ;;  %v5637_v29 = vcombine.low %v4193_v38, %v4194_v11  ;;  %v533_v38 = vrot.slane %v531_v22, 4  ;;  %v4986_v22 = vld [vmem:[%s6766_s1 + $0x110] sm:$0xff]  }
  0x55   : > { %v920_v37 = vor.u32 %v919_v40, %v918_v43  ;;  %v530_v40 = vrot.slane %v528_v21, 3  ;;  %4711 = vmatpush3.bf16.msra.mxu0 %v5196_v4  ;;  %v1022_v4 = vld [vmem:[#allocation2 + $0x1d8] sm:$0xff]  ;;  %v604_v57 = vrot.slane %v602_v45, 3  ;;  %v5678_v43 = vld [vmem:[#allocation2] sm:$0xff]  ;;  %v504_v45 = vld [vmem:[#allocation2 + $0xa8] sm:$0x1] }
  0x56   : > { %4757 = vmatmul.mubr.bf16.gmra.mrb[16].mxu1 %v1016_v55  ;;  %v4197_v55 = vcombine.low %v4194_v11, %v4194_v11  ;;  %v454_v11 = vshrl.u32 %v5637_v29, 16  ;;  %v457_v21 = vshll.u32 %v5637_v29, 16  ;;  %4712 = vmatprep.subr.bf16.mxu0 %v5203_v5  ;;  %v6817_v29 = vshrl.u32 %v5549_v41, 16  ;;  %v5027_v25 = vld [vmem:[%s6766_s1 + $0x1e8] sm:$0xff]  }
  0x57   : > { %2353 = vmatpush1.bf16.msra.mxu1 %v4981_v26  ;;  %4760 = vmatprep.mubr.bf16.mxu1 %v5495_v24  ;;  %v966_v26 = vld [vmem:[#allocation2 + $0x18] sm:$0xff]  ;;  %v923_v24 = vsel %vm5338_vm11, %v920_v37, %v922_v0  ;;  %v926_v50 = vsel %vm5274_vm6, %v920_v37, %v925_v56  ;;  %v1025_v56 = vld [vmem:[#allocation2 + $0x1f0] sm:$0xff]  ;;  %v5981_v27 = vsel %vm5486_vm3, %v5629_v2, %v5678_v43  ;;  %v2018_v2 = vrot.slane %v5503_v31, 4 }
  0x58   : > { %2354 = vmatprep.subr.bf16.mxu1 %v5079_v1  ;;  %924 = vst [vmem:[#allocation2 + $0x220] sm:$0xf8] %v923_v24  ;;  %927 = vst [vmem:[#allocation2 + $0x238] sm:$0xf] %v926_v50  ;;  %v426_v1 = vsel %vm5644_vm10, %v5586_v14, %v425_v15  ;;  %v456_v0 = vrot.slane %v454_v11, 3  ;;  %v459_v17 = vrot.slane %v457_v21, 4  ;;  %1268 = vmatmul.mubr.bf16.gmra.mrb[4].mxu0 %v966_v26 }
  0x59   : > { %473 = vst [vmem:[#allocation2 + $0x80] sm:$0xf] %v4197_v55  ;;  %427 = vst [vmem:[#allocation2 + $0x60] sm:$0x1] %v426_v1  ;;  %v465_v37 = vld [vmem:[#allocation2 + $0x78] sm:$0x1f]  ;;  %v534_v14 = vor.u32 %v533_v38, %v530_v40  ;;  %1275 = vmatprep.mubr.bf16.mxu0 %v5653_v53  ;;  %4713 = vmatpush3.bf16.msra.mxu0 %v5203_v5 }
  0x5a   : > { %v5674_v15 = vld [vmem:[%s5236_s14 + $0x18] sm:$0xff]   ;;  %v460_v61 = vor.u32 %v459_v17, %v456_v0  ;;  %v607_v55 = vrot.slane %v605_v46, 4  ;;  %v536_v24 = vld [vmem:[#allocation2 + $0xa8] sm:$0xf0]  ;;  %4714 = vmatprep.subr.bf16.mxu0 %v5217_v7  ;;  %v539_v50 = vld [vmem:[#allocation2 + $0xc0] sm:$0x1f] }
  0x5b   : > { %2355 = vmatpush1.bf16.msra.mxu1 %v4982_v3  ;;  %v493_v3 = vshrl.u32 %v5674_v15, 16  ;;  %508 = vst [vmem:[#allocation2 + $0x98] sm:$0xff] %v5674_v15  ;;  %v496_v40 = vshll.u32 %v5674_v15, 16  ;;  %v537_v46 = vsel %vm5508_vm2, %v534_v14, %v536_v24  ;;  %v5701_v1 = vld [vmem:[#allocation2 + $0x30] sm:$0xff]  ;;  %v6803_v17 = vshll.u32 %v5370_v10, 16  ;;  %947 = vst [vmem:[#allocation2 + $0x240] sm:$0xff] %v5981_v27 }
  0x5c   : > { %2356 = vmatprep.subr.bf16.mxu1 %v5678_v43  ;;  %v463_v38 = vsel %vm5508_vm2, %v460_v61, %v462_v16  ;;  %v466_v26 = vsel %vm5522_vm4, %v460_v61, %v465_v37  ;;  %538 = vst [vmem:[#allocation2 + $0xa8] sm:$0xf0] %v537_v46  ;;  %v540_v16 = vsel %vm5522_vm4, %v534_v14, %v539_v50  ;;  %v1774_v46 = vld [vmem:[#allocation2 + $0x20] sm:$0xf0] }
  0x5d   : > { %464 = vst [vmem:[#allocation2 + $0x60] sm:$0xf0] %v463_v38  ;;  %467 = vst [vmem:[#allocation2 + $0x78] sm:$0x1f] %v466_v26  ;;  %v495_v5 = vrot.slane %v493_v3, 7  ;;  %v681_v37 = vrot.slane %v6803_v17, 4  ;;  %4715 = vmatpush3.bf16.msra.mxu0 %v5217_v7 }
  0x5e   : > { %4761 = vmatmul.mubr.bf16.gmra.mrb[20].mxu1 %v1022_v4  ;;  %v608_v4 = vor.u32 %v607_v55, %v604_v57  ;;  %541 = vst [vmem:[#allocation2 + $0xc0] sm:$0x1f] %v540_v16  ;;  %v578_v38 = vld [vmem:[#allocation2 + $0xf0] sm:$0x1]  ;;  %v610_v26 = vld [vmem:[#allocation2 + $0xf0] sm:$0xf0]  ;;  %4716 = vmatprep.subr.bf16.mxu0 %v5229_v9  ;;  %v4236_v16 = vcombine.low %v5467_v48, %v5467_v48 }
  0x5f   : > { %2357 = vmatpush1.bf16.msra.mxu1 %v4986_v22  ;;  %4764 = vmatprep.mubr.bf16.mxu1 %v1025_v56  ;;  %v6802_v22 = vshrl.u32 %v5370_v10, 16  ;;  %v498_v56 = vor.u32 %v496_v40, %v495_v5  ;;  %v505_v61 = vsel %vm5644_vm10, %v495_v5, %v504_v45  ;;  %v4990_v10 = vld [vmem:[%s6766_s1 + $0x120] sm:$0xff]   ;;  %v579_v57 = vsel %vm5644_vm10, %v5438_v63, %v578_v38  ;;  %v613_v45 = vld [vmem:[#allocation2 + $0x108] sm:$0x1f] }
  0x60   : > { %2358 = vmatprep.subr.bf16.mxu1 %v5678_v43  ;;  %506 = vst [vmem:[#allocation2 + $0xa8] sm:$0x1] %v505_v61  ;;  %1276 = vmatmul.mubr.bf16.gmra.mrb[8].mxu0 %v5701_v1  ;;  %v1031_v7 = vld [vmem:[#allocation2 + $0x220] sm:$0xff]  ;;  %v611_v55 = vsel %vm5508_vm2, %v608_v4, %v610_v26  ;;  %580 = vst [vmem:[#allocation2 + $0xf0] sm:$0x1] %v579_v57  ;;  %v614_v50 = vsel %vm5522_vm4, %v608_v4, %v613_v45  ;;  %v6805_v63 = vshll.u32 %v5381_v20, 16 }
  0x61   : > { %v678_v0 = vrot.slane %v6802_v22, 3  ;;  %v5722_v14 = vsel %vm5486_vm3, %v498_v56, %v5678_v43  ;;  %1283 = vmatprep.mubr.bf16.mxu0 %v5549_v41  ;;  %612 = vst [vmem:[#allocation2 + $0xf0] sm:$0xf0] %v611_v55  ;;  %4717 = vmatpush3.bf16.msra.mxu0 %v5229_v9  ;;  %615 = vst [vmem:[#allocation2 + $0x108] sm:$0x1f] %v614_v50  ;;  %v4991_v9 = vld [vmem:[%s6766_s1 + $0x128] sm:$0xff]   ;;  %v4237_v57 = vcombine.low %v5478_v51, %v5478_v51 }
  0x62   : > { %503 = vst [vmem:[#allocation2 + $0x90] sm:$0xff] %v5722_v14  ;;  %4718 = vmatprep.subr.bf16.mxu0 %v5251_v13  ;;  %v1977_v48 = vrot.slane %v5653_v53, 4  ;;  %v684_v4 = vld [vmem:[#allocation2 + $0x138] sm:$0xf0]  ;;  %842 = vst [vmem:[#allocation2 + $0x1d0] sm:$0xf0] %v4236_v16 }
  0x63   : > { %2359 = vmatpush1.bf16.msra.mxu1 %v4987_v39  ;;  %v682_v24 = vor.u32 %v681_v37, %v678_v0  ;;  %v6804_v39 = vshrl.u32 %v5381_v20, 16  ;;  %v6806_v0 = vshrl.u32 %v5427_v60, 16  ;;  %v6807_v37 = vshll.u32 %v5427_v60, 16  ;;  %v5762_v26 = vld [vmem:[#allocation2 + $0x68] sm:$0xff]  ;;  %v1034_v55 = vld [vmem:[#allocation2 + $0x238] sm:$0xff] }
  0x64   : > { %2360 = vmatprep.subr.bf16.mxu1 %v5678_v43  ;;  %v1976_v20 = vrot.slane %v1774_v46, 4  ;;  %v758_v46 = vld [vmem:[#allocation2 + $0x180] sm:$0xf0]  ;;  %843 = vst [vmem:[#allocation2 + $0x1e8] sm:$0xf] %v4237_v57  ;;  %v1982_v53 = vrot.slane %v5620_v28, 4 }
  0x65   : > { %v717_v5 = vrot.slane %v6804_v39, 7  ;;  %v752_v17 = vrot.slane %v6806_v0, 3  ;;  %v755_v56 = vrot.slane %v6807_v37, 4  ;;  %v685_v60 = vsel %vm5508_vm2, %v682_v24, %v684_v4  ;;  %4719 = vmatpush3.bf16.msra.mxu0 %v5251_v13  ;;  %v1773_v39 = vld [vmem:[#allocation2 + $0x18] sm:$0xf0] }
  0x66   : > { %4765 = vmatmul.mubr.bf16.gmra.mrb[24].mxu1 %v5602_v58  ;;  %v652_v58 = vld [vmem:[#allocation2 + $0x138] sm:$0x1]  ;;  %686 = vst [vmem:[#allocation2 + $0x138] sm:$0xf0] %v685_v60  ;;  %4720 = vmatprep.subr.bf16.mxu0 %v5260_v18  ;;  %v1978_v13 = vsel %vm393_vm0, %v1976_v20, %v1977_v48  ;;  %v726_v18 = vld [vmem:[#allocation2 + $0x180] sm:$0x1] }
  0x67   : > { %v720_v22 = vor.u32 %v6805_v63, %v717_v5  ;;  %2361 = vmatpush1.bf16.msra.mxu1 %v4990_v10  ;;  %4768 = vmatprep.mubr.bf16.mxu1 %v1031_v7  ;;  %v653_v61 = vsel %vm5644_vm10, %v5554_v8, %v652_v58  ;;  %v4995_v8 = vld [vmem:[%s6766_s1 + $0x130] sm:$0xff]   ;;  %v756_v7 = vor.u32 %v755_v56, %v752_v17  ;;  %v761_v16 = vld [vmem:[#allocation2 + $0x198] sm:$0x1f]  ;;  %v6808_v17 = vshrl.u32 %v5434_v62, 16  ;;  %v5797_v56 = vld [vmem:[#allocation2 + $0x60] sm:$0xff] }
  0x68   : > { %2362 = vmatprep.subr.bf16.mxu1 %v5678_v43  ;;  %654 = vst [vmem:[#allocation2 + $0x138] sm:$0x1] %v653_v61  ;;  %v687_v10 = vld [vmem:[#allocation2 + $0x150] sm:$0x1f]  ;;  %1284 = vmatmul.mubr.bf16.gmra.mrb[12].mxu0 %v5620_v28  ;;  %v727_v51 = vsel %vm5644_vm10, %v717_v5, %v726_v18  ;;  %v4996_v63 = vld [vmem:[%s6766_s1 + $0x138] sm:$0xff]   ;;  %v1973_v5 = vrot.slane %v1773_v39, 4 }
  0x69   : > { %v5760_v38 = vsel %vm5486_vm3, %v720_v22, %v5678_v43  ;;  %v688_v45 = vsel %vm5522_vm4, %v682_v24, %v687_v10  ;;  %1291 = vmatprep.mubr.bf16.mxu0 %v5762_v26  ;;  %v5046_v24 = vld [vmem:[%s6766_s1 + $0xb0] sm:$0xff]   ;;  %728 = vst [vmem:[#allocation2 + $0x180] sm:$0x1] %v727_v51  ;;  %v759_v50 = vsel %vm5508_vm2, %v756_v7, %v758_v46  ;;  %v1974_v22 = vrot.slane %v5701_v1, 4  ;;  %v5802_v20 = vld [vmem:[#allocation2 + $0x80] sm:$0xff] }
  0x6a   : > { %725 = vst [vmem:[#allocation2 + $0x168] sm:$0xff] %v5760_v38  ;;  %689 = vst [vmem:[#allocation2 + $0x150] sm:$0x1f] %v688_v45  ;;  %4721 = vmatpush3.bf16.msra.mxu0 %v5046_v24  ;;  %v762_v0 = vsel %vm5522_vm4, %v756_v7, %v761_v16  ;;  %v791_v37 = vrot.slane %v6808_v17, 7  ;;  %v6809_v58 = vshrl.u32 %v5499_v30, 16  ;;  %v6810_v1 = vshll.u32 %v5434_v62, 16 }
  0x6b   : > { %2363 = vmatpush1.bf16.msra.mxu1 %v4991_v9  ;;  %4722 = vmatprep.subr.bf16.mxu0 %v5309_v36  ;;  %760 = vst [vmem:[#allocation2 + $0x180] sm:$0xf0] %v759_v50  ;;  %v1984_v9 = vrot.slane %v5549_v41, 4  ;;  %763 = vst [vmem:[#allocation2 + $0x198] sm:$0x1f] %v762_v0  ;;  %v4999_v62 = vld [vmem:[%s6766_s1 + $0x180] sm:$0xff]  }
  0x6c   : > { %2364 = vmatprep.subr.bf16.mxu1 %v5678_v43  ;;  %v826_v4 = vrot.slane %v6809_v58, 3  ;;  %v794_v61 = vor.u32 %v6810_v1, %v791_v37  ;;  %v800_v60 = vld [vmem:[#allocation2 + $0x1c8] sm:$0x1]  ;;  %v832_v57 = vld [vmem:[#allocation2 + $0x1c8] sm:$0xf0]  ;;  %v6812_v46 = vshrl.u32 %v5529_v59, 16  ;;  %v1983_v58 = vsel %vm393_vm0, %v1974_v22, %v1982_v53 }
  0x6d   : > { %v801_v7 = vsel %vm5644_vm10, %v791_v37, %v800_v60  ;;  %v835_v45 = vld [vmem:[#allocation2 + $0x1e0] sm:$0x1f]  ;;  %v5837_v24 = vld [vmem:[#allocation2 + $0x78] sm:$0xff]  ;;  %v1990_v50 = vrot.slane %v5762_v26, 4  ;;  %v6813_v16 = vshll.u32 %v5529_v59, 16  ;;  %v6815_v17 = vshll.u32 %v5590_v47, 16 }
  0x6e   : > { %4769 = vmatmul.mubr.bf16.gmra.mrb[28].mxu1 %v1034_v55  ;;  %4723 = vmatpush3.bf16.msra.mxu0 %v5309_v36  ;;  %v1975_v55 = vsel %vm393_vm0, %v1973_v5, %v1974_v22  ;;  %802 = vst [vmem:[#allocation2 + $0x1c8] sm:$0x1] %v801_v7  ;;  %v865_v51 = vrot.slane %v6812_v46, 7  ;;  %v6814_v5 = vshrl.u32 %v5590_v47, 16  ;;  %v5004_v59 = vld [vmem:[%s6766_s1 + $0x190] sm:$0xff]   ;;  %v4244_v47 = vcombine.low %v5570_v35, %v5570_v35 }
  0x6f   : > { %2365 = vmatpush1.bf16.msra.mxu1 %v4995_v8  ;;  %2368 = vmatprep.mubr.bf16.mxu1 %v1978_v13  ;;  %v6811_v8 = vshll.u32 %v5499_v30, 16  ;;  %v5819_v30 = vsel %vm5486_vm3, %v794_v61, %v5678_v43  ;;  %v1985_v13 = vsel %vm393_vm0, %v1977_v48, %v1984_v9  ;;  %v5002_v48 = vld [vmem:[%s6766_s1 + $0x188] sm:$0xff]   ;;  %v903_v37 = vrot.slane %v6815_v17, 4  ;;  %v874_v26 = vld [vmem:[#allocation2 + $0x210] sm:$0x1]  ;;  %v5016_v17 = vld [vmem:[%s6766_s1 + $0x1c0] sm:$0xff]  }
  0x70   : > { %2366 = vmatprep.subr.bf16.mxu1 %v5678_v43  ;;  %1292 = vmatmul.mubr.bf16.gmra.mrb[16].mxu0 %v5797_v56  ;;  %799 = vst [vmem:[#allocation2 + $0x1b0] sm:$0xff] %v5819_v30  ;;  %v900_v0 = vrot.slane %v6814_v5, 3  ;;  %v906_v1 = vld [vmem:[#allocation2 + $0x210] sm:$0xf0]  ;;  %v1991_v61 = vsel %vm393_vm0, %v1984_v9, %v1990_v50  ;;  %v875_v22 = vsel %vm5644_vm10, %v865_v51, %v874_v26  ;;  %v1996_v60 = vrot.slane %v5802_v20, 4 }
  0x71   : > { %v829_v10 = vrot.slane %v6811_v8, 4  ;;  %1299 = vmatprep.mubr.bf16.mxu0 %v5802_v20  ;;  %916 = vst [vmem:[#allocation2 + $0x218] sm:$0xf0] %v4244_v47  ;;  %876 = vst [vmem:[#allocation2 + $0x210] sm:$0x1] %v875_v22  ;;  %v1988_v35 = vrot.slane %v5797_v56, 4  ;;  %v4245_v20 = vcombine.low %v5573_v54, %v5573_v54 }
  0x72   : > { %v5872_v9 = vld [vmem:[#allocation2 + $0xb0] sm:$0xff]  ;;  %v5008_v56 = vld [vmem:[%s6766_s1 + $0x1a0] sm:$0xff]   ;;  %v909_v7 = vld [vmem:[#allocation2 + $0x228] sm:$0x1f] }
  0x73   : > { %2367 = vmatpush1.bf16.msra.mxu1 %v4996_v63  ;;  %v830_v36 = vor.u32 %v829_v10, %v826_v4  ;;  %v868_v63 = vor.u32 %v6813_v16, %v865_v51  ;;  %v904_v4 = vor.u32 %v903_v37, %v900_v0  ;;  %v5006_v10 = vld [vmem:[%s6766_s1 + $0x198] sm:$0xff]   ;;  %v1989_v42 = vsel %vm393_vm0, %v1982_v53, %v1988_v35  ;;  %v396_v5 = vld [vmem:[#allocation2 + $0x40] sm:$0xf]  ;;  %v437_v0 = vld [vmem:[#allocation2 + $0x40] sm:$0x80] }
  0x74   : > { %3195 = vmatprep.subr.bf16.mxu1 %v5678_v43  ;;  %917 = vst [vmem:[#allocation2 + $0x230] sm:$0xf] %v4245_v20  ;;  %v2000_v53 = vrot.slane %v5722_v14, 4  ;;  %v6816_v16 = vshll.u32 %v5549_v41, 16  ;;  %v5926_v37 = vld [vmem:[%s6766_s1 + $0x140] sm:$0xff]   ;;  %v993_v23 = vld [vmem:[#allocation2 + $0xf0] sm:$0xff] }
  0x75   : > { %v833_v39 = vsel %vm5508_vm2, %v830_v36, %v832_v57  ;;  %v836_v18 = vsel %vm5522_vm4, %v830_v36, %v835_v45  ;;  %v5850_v28 = vsel %vm5486_vm3, %v868_v63, %v5678_v43  ;;  %v907_v8 = vsel %vm5508_vm2, %v904_v4, %v906_v1  ;;  %v5891_v36 = vld [vmem:[#allocation2 + $0xa8] sm:$0xff]  ;;  %v5047_v47 = vld [vmem:[#allocation2 + $0xe0] sm:$0xff]  ;;  %4772 = vmatprep.subr.bf16.mxu0 %v5926_v37 }
  0x76   : > { %2369 = vmatmul.mubr.bf16.vlgmr.msra.gmra.mrb[32].mxu1 %v1975_v55  ;;  %834 = vst [vmem:[#allocation2 + $0x1c8] sm:$0xf0] %v833_v39  ;;  %837 = vst [vmem:[#allocation2 + $0x1e0] sm:$0x1f] %v836_v18  ;;  %v1997_v57 = vsel %vm393_vm0, %v1990_v50, %v1996_v60  ;;  %v910_v54 = vsel %vm5522_vm4, %v904_v4, %v909_v7  ;;  %v1994_v55 = vrot.slane %v5837_v24, 4  ;;  %v2002_v45 = vrot.slane %v5674_v15, 4 }
  0x77   : > { %3196 = vmatpush1.bf16.msra.mxu1 %v4999_v62  ;;  %2376 = vmatprep.mubr.bf16.mxu1 %v1985_v13  ;;  %873 = vst [vmem:[#allocation2 + $0x1f8] sm:$0xff] %v5850_v28  ;;  %908 = vst [vmem:[#allocation2 + $0x210] sm:$0xf0] %v907_v8  ;;  %v5010_v62 = vld [vmem:[%s6766_s1 + $0x1a8] sm:$0xff]   ;;  %v5012_v39 = vld [vmem:[%s6766_s1 + $0x1b0] sm:$0xff]   ;;  %v2008_v50 = vrot.slane %v5872_v9, 4 }
  0x78   : > { %3197 = vmatprep.subr.bf16.mxu1 %v5678_v43  ;;  %1300 = vmatmul.mubr.bf16.gmra.mrb[20].mxu0 %v5837_v24  ;;  %911 = vst [vmem:[#allocation2 + $0x228] sm:$0x1f] %v910_v54  ;;  %v5895_v13 = vld [vmem:[#allocation2 + $0xc8] sm:$0xff]  ;;  %v1995_v49 = vsel %vm393_vm0, %v1988_v35, %v1994_v55  ;;  %v2003_v46 = vsel %vm393_vm0, %v1996_v60, %v2002_v45  ;;  %v5912_v24 = vld [vmem:[#allocation2 + $0xc0] sm:$0xff]  ;;  %v430_v63 = vrot.slane %v6816_v16, 1  ;;  %v474_v4 = vrot.slane %v454_v11, 4 }
  0x79   : > { %1307 = vmatprep.mubr.bf16.mxu0 %v5674_v15  ;;  %v390_v18 = vld [vmem:[#allocation2 + $0x28] sm:$0xf8]  ;;  %v2009_v26 = vsel %vm393_vm0, %v2002_v45, %v2008_v50  ;;  %v475_v1 = vrot.slane %v457_v21, 5  ;;  %v2014_v22 = vrot.slane %v5895_v13, 4  ;;  %v5946_v60 = vld [vmem:[#allocation2 + $0xf8] sm:$0xff]  ;;  %v509_v35 = vrot.slane %v496_v40, 1 }
  0x7a   : > { %v391_v51 = vsel %vm5338_vm11, %v5526_v19, %v390_v18  ;;  %v431_v21 = vor.u32 %v430_v63, %v6817_v29  ;;  %v478_v8 = vld [vmem:[#allocation2 + $0x70] sm:$0xf8]  ;;  %v513_v7 = vld [vmem:[#allocation2 + $0x88] sm:$0x80]  ;;  %v5024_v18 = vld [vmem:[%s6766_s1 + $0x1e0] sm:$0xff]   ;;  %v2024_v15 = vrot.slane %v993_v23, 4 }
  0x7b   : > { %3198 = vmatpush1.bf16.msra.mxu1 %v5002_v48  ;;  %392 = vst [vmem:[#allocation2 + $0x28] sm:$0xf8] %v391_v51  ;;  %v5014_v48 = vld [vmem:[%s6766_s1 + $0x1b8] sm:$0xff]   ;;  %v476_v11 = vor.u32 %v475_v1, %v474_v4  ;;  %v2015_v41 = vsel %vm393_vm0, %v2008_v50, %v2014_v22  ;;  %v514_v54 = vsel %vm5283_vm7, %v509_v35, %v513_v7  ;;  %v997_v45 = vld [vmem:[#allocation2 + $0x110] sm:$0xff]  ;;  %v996_v51 = vld [vmem:[#allocation2 + $0x108] sm:$0xff]  ;;  %v2036_v1 = vrot.slane %v5598_v12, 4 }
  0x7c   : > { %3199 = vmatprep.subr.bf16.mxu1 %v5678_v43  ;;  %v5965_v40 = vsel %vm5296_vm8, %v431_v21, %v5678_v43  ;;  %515 = vst [vmem:[#allocation2 + $0x88] sm:$0x80] %v514_v54  ;;  %v2032_v16 = vrot.slane %v997_v45, 4  ;;  %v1014_v54 = vld [vmem:[#allocation2 + $0x198] sm:$0xff] }
  0x7d   : > { %v479_v20 = vsel %vm5338_vm11, %v476_v11, %v478_v8  ;;  %444 = vst [vmem:[#allocation2 + $0x58] sm:$0xff] %v5965_v40  ;;  %v1012_v8 = vld [vmem:[#allocation2 + $0x188] sm:$0xff] }
  0x7e   : > { %2377 = vmatmul.mubr.bf16.gmra.mrb[36].mxu1 %v1983_v58  ;;  %v397_v58 = vsel %vm5274_vm6, %v5526_v19, %v396_v5  ;;  %v2006_v19 = vrot.slane %v5891_v36, 4  ;;  %480 = vst [vmem:[#allocation2 + $0x70] sm:$0xf8] %v479_v20  ;;  %v2025_v5 = vsel %vm393_vm0, %v2018_v2, %v2024_v15  ;;  %v1011_v20 = vld [vmem:[#allocation2 + $0x180] sm:$0xff] }
  0x7f   : > { %2384 = vmatprep.mubr.bf16.mxu1 %v1991_v61  ;;  %3200 = vmatpush1.bf16.msra.mxu1 %v5004_v59  ;;  %v438_v59 = vsel %vm5283_vm7, %v430_v63, %v437_v0  ;;  %398 = vst [vmem:[#allocation2 + $0x40] sm:$0xf] %v397_v58  ;;  %v5018_v61 = vld [vmem:[%s6766_s1 + $0x1c8] sm:$0xff]   ;;  %v1003_v63 = vld [vmem:[#allocation2 + $0x140] sm:$0xff]  ;;  %v1002_v58 = vld [vmem:[#allocation2 + $0x138] sm:$0xff] }
  0x80   : > { %3201 = vmatprep.subr.bf16.mxu1 %v5678_v43  ;;  %1308 = vmatmul.mubr.bf16.gmra.mrb[24].mxu0 %v5722_v14  ;;  %v2001_v14 = vsel %vm393_vm0, %v1994_v55, %v2000_v53  ;;  %439 = vst [vmem:[#allocation2 + $0x40] sm:$0x80] %v438_v59  ;;  %v2012_v55 = vrot.slane %v5912_v24, 4  ;;  %v2042_v29 = vrot.slane %v1002_v58, 4 }
  0x81   : > { %1315 = vmatprep.mubr.bf16.mxu0 %v5872_v9  ;;  %v5020_v9 = vld [vmem:[%s6766_s1 + $0x1d0] sm:$0xff]  }
  0x83   : > { %3202 = vmatpush1.bf16.msra.mxu1 %v5006_v10  ;;  %v2007_v10 = vsel %vm393_vm0, %v2000_v53, %v2006_v19  ;;  %v2026_v53 = vrot.slane %v5946_v60, 4 }
  0x84   : > { %3203 = vmatprep.subr.bf16.mxu1 %v5678_v43 }
  0x85   : > { %v2033_v0 = vsel %vm393_vm0, %v2026_v53, %v2032_v16 }
  0x86   : > { %2385 = vmatmul.mubr.bf16.gmra.mrb[40].mxu1 %v1989_v42  ;;  %v481_v42 = vld [vmem:[#allocation2 + $0x88] sm:$0xf] }
  0x87   : > { %2392 = vmatprep.mubr.bf16.mxu1 %v1997_v57  ;;  %3204 = vmatpush1.bf16.msra.mxu1 %v5008_v56  ;;  %v482_v56 = vsel %vm5274_vm6, %v476_v11, %v481_v42  ;;  %v1798_v57 = vld [vmem:[#allocation2 + $0xe0] sm:$0xff] }
  0x88   : > { %3205 = vmatprep.subr.bf16.mxu1 %v5678_v43  ;;  %1316 = vmatmul.mubr.bf16.gmra.mrb[28].mxu0 %v5891_v36  ;;  %483 = vst [vmem:[#allocation2 + $0x88] sm:$0xf] %v482_v56  ;;  %v2020_v36 = vrot.slane %v1798_v57, 4  ;;  %v2054_v57 = vrot.slane %v5760_v38, 4 }
  0x89   : > { %1323 = vmatprep.mubr.bf16.mxu0 %v5895_v13  ;;  %v948_v13 = vld [vmem:[#allocation2 + $0x258] sm:$0x1] }
  0x8a   : > { %v2021_v6 = vsel %vm393_vm0, %v2014_v22, %v2020_v36  ;;  %v2027_v50 = vsel %vm393_vm0, %v2020_v36, %v2026_v53  ;;  %v2072_v53 = vrot.slane %v5819_v30, 4 }
  0x8b   : > { %3206 = vmatpush1.bf16.msra.mxu1 %v5010_v62  ;;  %v5022_v62 = vld [vmem:[%s6766_s1 + $0x1d8] sm:$0xff]  }
  0x8c   : > { %3207 = vmatprep.subr.bf16.mxu1 %v5678_v43 }
  0x8e   : > { %2393 = vmatmul.mubr.bf16.gmra.mrb[44].mxu1 %v1995_v49  ;;  %v949_v49 = vsel %vm5644_vm10, %v5612_v44, %v948_v13 }
  0x8f   : > { %2400 = vmatprep.mubr.bf16.mxu1 %v2003_v46  ;;  %3208 = vmatpush1.bf16.msra.mxu1 %v5012_v39  ;;  %v2013_v39 = vsel %vm393_vm0, %v2006_v19, %v2012_v55  ;;  %v552_v46 = vld [vmem:[#allocation2 + $0xb8] sm:$0xf8]  ;;  %950 = vst [vmem:[#allocation2 + $0x258] sm:$0x1] %v949_v49  ;;  %v1005_v19 = vld [vmem:[#allocation2 + $0x150] sm:$0xff] }
  0x90   : > { %3209 = vmatprep.subr.bf16.mxu1 %v5678_v43  ;;  %1324 = vmatmul.mubr.bf16.gmra.mrb[32].mxu0 %v5912_v24  ;;  %v553_v44 = vsel %vm5338_vm11, %v5301_v33, %v552_v46  ;;  %v2019_v33 = vsel %vm393_vm0, %v2012_v55, %v2018_v2  ;;  %v5048_v24 = vld [vmem:[#allocation2 + $0x128] sm:$0xff]  ;;  %v2062_v55 = vrot.slane %v1012_v8, 4  ;;  %v1021_v49 = vld [vmem:[#allocation2 + $0x1d0] sm:$0xff]  ;;  %v2066_v46 = vrot.slane %v1014_v54, 4 }
  0x91   : > { %1331 = vmatprep.mubr.bf16.mxu0 %v5047_v47  ;;  %554 = vst [vmem:[#allocation2 + $0xb8] sm:$0xf8] %v553_v44  ;;  %v1006_v47 = vld [vmem:[#allocation2 + $0x158] sm:$0xff]  ;;  %v1024_v2 = vld [vmem:[#allocation2 + $0x1e8] sm:$0xff] }
  0x92   : > { %v2050_v21 = vrot.slane %v1006_v47, 4 }
  0x93   : > { %3210 = vmatpush1.bf16.msra.mxu1 %v5014_v48  ;;  %v510_v48 = vor.u32 %v509_v35, %v493_v3  ;;  %v5035_v3 = vld [vmem:[%s6766_s1 + $0x1f8] sm:$0xff]   ;;  %v2043_v35 = vsel %vm393_vm0, %v2036_v1, %v2042_v29 }
  0x94   : > { %3211 = vmatprep.subr.bf16.mxu1 %v5678_v43 }
  0x96   : > { %2401 = vmatmul.mubr.bf16.gmra.mrb[48].mxu1 %v2001_v14  ;;  %v1807_v14 = vld [vmem:[#allocation2 + $0x128] sm:$0xff] }
  0x97   : > { %2408 = vmatprep.mubr.bf16.mxu1 %v2009_v26  ;;  %3212 = vmatpush1.bf16.msra.mxu1 %v5016_v17  ;;  %v2030_v17 = vrot.slane %v996_v51, 4  ;;  %v2038_v59 = vrot.slane %v1807_v14, 4  ;;  %v1029_v14 = vld [vmem:[#allocation2 + $0x210] sm:$0xff] }
  0x98   : > { %3213 = vmatprep.subr.bf16.mxu1 %v5678_v43  ;;  %1332 = vmatmul.mubr.bf16.gmra.mrb[36].mxu0 %v5503_v31  ;;  %v6011_v31 = vsel %vm5296_vm8, %v510_v48, %v5678_v43  ;;  %v1023_v48 = vld [vmem:[#allocation2 + $0x1e0] sm:$0xff]  ;;  %v2096_v32 = vrot.slane %v1029_v14, 4 }
  0x99   : > { %1339 = vmatprep.mubr.bf16.mxu0 %v5946_v60  ;;  %v2031_v26 = vsel %vm393_vm0, %v2024_v15, %v2030_v17  ;;  %v2039_v4 = vsel %vm393_vm0, %v2032_v16, %v2038_v59  ;;  %v2037_v22 = vsel %vm393_vm0, %v2030_v17, %v2036_v1  ;;  %v5049_v60 = vld [vmem:[#allocation2 + $0x170] sm:$0xff]  ;;  %v1030_v16 = vld [vmem:[#allocation2 + $0x218] sm:$0xff] }
  0x9a   : > { %v2098_v1 = vrot.slane %v1030_v16, 4 }
  0x9b   : > { %3214 = vmatpush1.bf16.msra.mxu1 %v5018_v61  ;;  %v2044_v61 = vrot.slane %v1003_v63, 4 }
  0x9c   : > { %3215 = vmatprep.subr.bf16.mxu1 %v5678_v43 }
  0x9d   : > { %v2045_v11 = vsel %vm393_vm0, %v2038_v59, %v2044_v61 }
  0x9e   : > { %2409 = vmatmul.mubr.bf16.gmra.mrb[52].mxu1 %v2007_v10  ;;  %v1816_v10 = vld [vmem:[#allocation2 + $0x170] sm:$0xff] }
  0x9f   : > { %2416 = vmatprep.mubr.bf16.mxu1 %v2015_v41  ;;  %3216 = vmatpush1.bf16.msra.mxu1 %v5020_v9  ;;  %v2048_v9 = vrot.slane %v1005_v19, 4  ;;  %v2056_v42 = vrot.slane %v1816_v10, 4  ;;  %v1015_v41 = vld [vmem:[#allocation2 + $0x1a0] sm:$0xff] }
  0xa0   : > { %3217 = vmatprep.subr.bf16.mxu1 %v5678_v43  ;;  %1340 = vmatmul.mubr.bf16.gmra.mrb[40].mxu0 %v993_v23  ;;  %v5050_v23 = vld [vmem:[#allocation2 + $0x1b8] sm:$0xff]  ;;  %v2068_v13 = vrot.slane %v1015_v41, 4 }
  0xa1   : > { %1347 = vmatprep.mubr.bf16.mxu0 %v997_v45  ;;  %v2049_v56 = vsel %vm393_vm0, %v2042_v29, %v2048_v9  ;;  %v2057_v7 = vsel %vm393_vm0, %v2050_v21, %v2056_v42  ;;  %v2063_v36 = vsel %vm393_vm0, %v2056_v42, %v2062_v55  ;;  %v2060_v45 = vrot.slane %v1011_v20, 4 }
  0xa3   : > { %3218 = vmatpush1.bf16.msra.mxu1 %v5022_v62  ;;  %v2055_v62 = vsel %vm393_vm0, %v2048_v9, %v2054_v57 }
  0xa4   : > { %3219 = vmatprep.subr.bf16.mxu1 %v5678_v43 }
  0xa6   : > { %2417 = vmatmul.mubr.bf16.gmra.mrb[56].mxu1 %v2013_v39  ;;  %v2061_v39 = vsel %vm393_vm0, %v2054_v57, %v2060_v45 }
  0xa7   : > { %2424 = vmatprep.mubr.bf16.mxu1 %v2021_v6  ;;  %3220 = vmatpush1.bf16.msra.mxu1 %v5024_v18  ;;  %v1825_v18 = vld [vmem:[#allocation2 + $0x1b8] sm:$0xff]  ;;  %v1020_v6 = vld [vmem:[#allocation2 + $0x1c8] sm:$0xff] }
  0xa8   : > { %3221 = vmatprep.subr.bf16.mxu1 %v5678_v43  ;;  %1348 = vmatmul.mubr.bf16.gmra.mrb[44].mxu0 %v996_v51  ;;  %v2074_v44 = vrot.slane %v1825_v18, 4  ;;  %v2078_v15 = vrot.slane %v1020_v6, 4  ;;  %v6104_v18 = vld [vmem:[#allocation2 + $0x88] sm:$0xff] }
  0xa9   : > { %1355 = vmatprep.mubr.bf16.mxu0 %v5048_v24  ;;  %v5051_v24 = vld [vmem:[#allocation2 + $0x200] sm:$0xff] }
  0xaa   : > { %v2075_v51 = vsel %vm393_vm0, %v2068_v13, %v2074_v44 }
  0xab   : > { %3222 = vmatpush1.bf16.msra.mxu1 %v5027_v25  ;;  %v2067_v25 = vsel %vm393_vm0, %v2060_v45, %v2066_v46 }
  0xac   : > { %3223 = vmatprep.subr.bf16.mxu1 %v5678_v43 }
  0xae   : > { %2425 = vmatmul.mubr.bf16.gmra.mrb[60].mxu1 %v2019_v33  ;;  %v2080_v33 = vrot.slane %v1021_v49, 4 }
  0xaf   : > { %2432 = vmatprep.mubr.bf16.mxu1 %v2027_v50  ;;  %3224 = vmatpush1.bf16.msra.mxu1 %v5031_v52  ;;  %v2073_v52 = vsel %vm393_vm0, %v2066_v46, %v2072_v53 }
  0xb0   : > { %3225 = vmatprep.subr.bf16.mxu1 %v5678_v43  ;;  %1356 = vmatmul.mubr.bf16.gmra.mrb[48].mxu0 %v5598_v12  ;;  %v2051_v12 = vsel %vm393_vm0, %v2044_v61, %v2050_v21  ;;  %v2081_v50 = vsel %vm393_vm0, %v2074_v44, %v2080_v33  ;;  %v5033_v44 = vld [vmem:[%s6766_s1 + $0x168] sm:$0xff]  }
  0xb1   : > { %1363 = vmatprep.mubr.bf16.mxu0 %v1003_v63  ;;  %v2079_v63 = vsel %vm393_vm0, %v2072_v53, %v2078_v15 }
  0xb3   : > { %3226 = vmatpush1.bf16.msra.mxu1 %v5035_v3  ;;  %v2086_v3 = vrot.slane %v1024_v2, 4 }
  0xb6   : > { %2433 = vmatmul.mubr.bf16.gmra.mrb[64].mxu1 %v2025_v5  ;;  %v1834_v5 = vld [vmem:[#allocation2 + $0x200] sm:$0xff] }
  0xb7   : > { %2440 = vmatprep.mubr.bf16.mxu1 %v2033_v0  ;;  %v2084_v0 = vrot.slane %v1023_v48, 4  ;;  %v2092_v17 = vrot.slane %v1834_v5, 4 }
  0xb8   : > { %1364 = vmatmul.mubr.bf16.gmra.mrb[52].mxu0 %v1002_v58  ;;  %v1033_v58 = vld [vmem:[#allocation2 + $0x230] sm:$0xff] }
  0xb9   : > { %1371 = vmatprep.mubr.bf16.mxu0 %v1006_v47  ;;  %v2085_v59 = vsel %vm393_vm0, %v2078_v15, %v2084_v0  ;;  %v2093_v47 = vsel %vm393_vm0, %v2086_v3, %v2092_v17  ;;  %v2099_v29 = vsel %vm393_vm0, %v2092_v17, %v2098_v1  ;;  %v2104_v21 = vrot.slane %v1033_v58, 4 }
  0xbb   : > { %v2105_v42 = vsel %vm393_vm0, %v2098_v1, %v2104_v21  ;;  %v2931_v1 = vld [vmem:[#allocation2 + $0x50] sm:$0xff] }
  0xbe   : > { %2441 = vmatmul.mubr.bf16.gmra.mrb[68].mxu1 %v2031_v26  ;;  %v2090_v26 = vrot.slane %v5850_v28, 4 }
  0xbf   : > { %2448 = vmatprep.mubr.bf16.mxu1 %v2039_v4  ;;  %v6049_v4 = vld [vmem:[#allocation2 + $0x228] sm:$0xff] }
  0xc0   : > { %1372 = vmatmul.mubr.bf16.gmra.mrb[56].mxu0 %v1005_v19  ;;  %v6055_v19 = vsel %vm5296_vm8, %v5631_v34, %v5678_v43  ;;  %v968_v34 = vld [vmem:[#allocation2 + $0x28] sm:$0xff] }
  0xc1   : > { %1379 = vmatprep.mubr.bf16.mxu0 %v5049_v60  ;;  %962 = vst [vmem:[#allocation2 + $0x250] sm:$0xff] %v6055_v19 }
  0xc6   : > { %2449 = vmatmul.mubr.bf16.gmra.mrb[72].mxu1 %v2037_v22 }
  0xc7   : > { %2456 = vmatprep.mubr.bf16.mxu1 %v2045_v11 }
  0xc8   : > { %1380 = vmatmul.mubr.bf16.gmra.mrb[60].mxu0 %v5760_v38  ;;  %v2069_v38 = vsel %vm393_vm0, %v2062_v55, %v2068_v13  ;;  %v6088_v55 = vld [vmem:[#allocation2 + $0x70] sm:$0xff] }
  0xc9   : > { %1387 = vmatprep.mubr.bf16.mxu0 %v1012_v8 }
  0xce   : > { %2457 = vmatmul.mubr.bf16.gmra.mrb[76].mxu1 %v2043_v35  ;;  %v5028_v35 = vld [vmem:[%s6766_s1 + $0x148] sm:$0xff]  }
  0xcf   : > { %2464 = vmatprep.mubr.bf16.mxu1 %v2051_v12  ;;  %v6073_v12 = vld [vmem:[#allocation2 + $0x40] sm:$0xff] }
  0xd0   : > { %1388 = vmatmul.mubr.bf16.gmra.mrb[64].mxu0 %v1011_v20 }
  0xd1   : > { %1395 = vmatprep.mubr.bf16.mxu0 %v1015_v41  ;;  %v5029_v41 = vld [vmem:[%s6766_s1 + $0x150] sm:$0xff]  }
  0xd6   : > { %2465 = vmatmul.mubr.bf16.gmra.mrb[80].mxu1 %v2049_v56  ;;  %v1843_v56 = vld [vmem:[#allocation2 + $0x248] sm:$0xff] }
  0xd7   : > { %2472 = vmatprep.mubr.bf16.mxu1 %v2057_v7  ;;  %v2102_v7 = vrot.slane %v6049_v4, 4  ;;  %v2110_v57 = vrot.slane %v1843_v56, 4  ;;  %v1998_v56 = vrot.slane %v6104_v18, 4 }
  0xd8   : > { %1396 = vmatmul.mubr.bf16.gmra.mrb[68].mxu0 %v1014_v54 }
  0xd9   : > { %1403 = vmatprep.mubr.bf16.mxu0 %v5050_v23  ;;  %v2111_v13 = vsel %vm393_vm0, %v2104_v21, %v2110_v57 }
  0xde   : > { %2473 = vmatmul.mubr.bf16.gmra.mrb[84].mxu1 %v2055_v62 }
  0xdf   : > { %2480 = vmatprep.mubr.bf16.mxu1 %v2063_v36  ;;  %v2103_v36 = vsel %vm393_vm0, %v2096_v32, %v2102_v7 }
  0xe0   : > { %1404 = vmatmul.mubr.bf16.gmra.mrb[72].mxu0 %v5819_v30  ;;  %v2087_v30 = vsel %vm393_vm0, %v2080_v33, %v2086_v3  ;;  %v1845_v33 = vld [vmem:[#allocation2 + $0x258] sm:$0xf] }
  0xe1   : > { %1411 = vmatprep.mubr.bf16.mxu0 %v1021_v49  ;;  %v5032_v49 = vld [vmem:[%s6766_s1 + $0x160] sm:$0xff]  }
  0xe6   : > { %2481 = vmatmul.mubr.bf16.gmra.mrb[88].mxu1 %v2061_v39  ;;  %v1846_v39 = vld [vmem:[#allocation2 + $0x260] sm:$0xf] }
  0xe7   : > { %2488 = vmatprep.mubr.bf16.mxu1 %v2069_v38  ;;  %v2108_v38 = vrot.slane %v5981_v27, 4  ;;  %v2116_v46 = vrot.slane %v1846_v39, 4 }
  0xe8   : > { %1412 = vmatmul.mubr.bf16.gmra.mrb[76].mxu0 %v1020_v6 }
  0xe9   : > { %1419 = vmatprep.mubr.bf16.mxu0 %v1024_v2  ;;  %v2109_v27 = vsel %vm393_vm0, %v2102_v7, %v2108_v38  ;;  %v2934_v7 = vld [vmem:[#allocation2 + $0x68] sm:$0xff] }
  0xee   : > { %2489 = vmatmul.mubr.bf16.gmra.mrb[92].mxu1 %v2067_v25  ;;  %v1775_v25 = vld [vmem:[#allocation2 + $0x28] sm:$0xf0] }
  0xef   : > { %2496 = vmatprep.mubr.bf16.mxu1 %v2075_v51 }
  0xf0   : > { %1420 = vmatmul.mubr.bf16.gmra.mrb[80].mxu0 %v1023_v48  ;;  %v2117_v48 = vsel %vm393_vm0, %v2110_v57, %v2116_v46  ;;  %v2004_v57 = vrot.slane %v6011_v31, 4 }
  0xf1   : > { %1427 = vmatprep.mubr.bf16.mxu0 %v5051_v24  ;;  %v1979_v24 = vrot.slane %v1775_v25, 4 }
  0xf2   : > { %v2005_v46 = vsel %vm393_vm0, %v1998_v56, %v2004_v57 }
  0xf6   : > { %2497 = vmatmul.mubr.bf16.gmra.mrb[96].mxu1 %v2073_v52  ;;  %v5034_v52 = vld [vmem:[%s6766_s1 + $0x170] sm:$0xff]  }
  0xf7   : > { %2504 = vmatprep.mubr.bf16.mxu1 %v2081_v50  ;;  %v1980_v50 = vrot.slane %v6073_v12, 4 }
  0xf8   : > { %1428 = vmatmul.mubr.bf16.gmra.mrb[84].mxu0 %v5850_v28  ;;  %v2091_v28 = vsel %vm393_vm0, %v2084_v0, %v2090_v26 }
  0xf9   : > { %1435 = vmatprep.mubr.bf16.mxu0 %v1030_v16  ;;  %v2114_v16 = vrot.slane %v1845_v33, 4  ;;  %v1981_v17 = vsel %vm393_vm0, %v1979_v24, %v1980_v50  ;;  %v2937_v24 = vld [vmem:[#allocation2 + $0x80] sm:$0xff] }
  0xfe   : > { %2505 = vmatmul.mubr.bf16.gmra.mrb[100].mxu1 %v2079_v63 }
  0xff   : > { %2512 = vmatprep.mubr.bf16.mxu1 %v2087_v30  ;;  %v6127_v30 = vld [vmem:[#allocation2 + $0xb8] sm:$0xff] }
 0x100   : > { %1436 = vmatmul.mubr.bf16.gmra.mrb[88].mxu0 %v1029_v14  ;;  %v5036_v14 = vld [vmem:[%s6766_s1 + $0x178] sm:$0xff]  }
 0x101   : > { %1443 = vmatprep.mubr.bf16.mxu0 %v1033_v58 }
 0x106   : > { %2513 = vmatmul.mubr.bf16.gmra.mrb[104].mxu1 %v2085_v59 }
 0x107   : > { %2520 = vmatprep.mubr.bf16.mxu1 %v2093_v47  ;;  %v2115_v47 = vsel %vm393_vm0, %v2108_v38, %v2114_v16 }
 0x108   : > { %1444 = vmatmul.mubr.bf16.gmra.mrb[92].mxu0 %v6049_v4  ;;  %v1986_v4 = vrot.slane %v5965_v40, 4 }
 0x109   : > { %v6057_v61 = vpop.f32.mrb[0].mxu1  ;;  %4724 = vmatprep.mubr.bf16.mxu0 %v5678_v43  ;;  %v2097_v43 = vsel %vm393_vm0, %v2090_v26, %v2096_v32 }
 0x10a   : > { %v6060_v22 = vpop.f32.mrb[1].mxu1  ;;  %v1987_v21 = vsel %vm393_vm0, %v1980_v50, %v1986_v4 }
 0x10b   : > { %v6062_v60 = vpop.f32.mrb[2].mxu1 }
 0x10c   : > { %v1553_v11 = vpop.f32.mrb[3].mxu1 }
 0x10d   : > { %v1992_v11 = vrot.slane %v6088_v55, 4 }
 0x10e   : > { %2521 = vmatmul.mubr.bf16.gmra.mrb[108].mxu1 %v2091_v28  ;;  %v5037_v28 = vld [vmem:[%s6766_s1 + $0x200] sm:$0xff]  }
 0x10f   : > { %2528 = vmatprep.mubr.bf16.mxu1 %v2099_v29 }
 0x110   : > { %4725 = vmatmul.mubr.bf16.vlgmr.msra.gmra.mrb[96].mxu0 %v968_v34 }
 0x111   : > { %v6068_v8 = vpop.f32.mrb[4].mxu1  ;;  %4773 = vmatpush3.bf16.msra.mxu0 %v5926_v37  ;;  %4728 = vmatprep.mubr.bf16.mxu0 %v6073_v12  ;;  %v5030_v37 = vld [vmem:[%s6766_s1 + $0x158] sm:$0xff]  }
 0x112   : > { %v1566_v10 = vpop.f32.mrb[5].mxu1  ;;  %4774 = vmatprep.subr.bf16.mxu0 %v5028_v35 }
 0x113   : > { %v4747_v9 = vpop.f32.mrb[6].mxu1  ;;  %v5038_v10 = vld [vmem:[%s6766_s1 + $0x208] sm:$0xff]  }
 0x114   : > { %v6076_v20 = vpop.f32.mrb[7].mxu1 }
 0x115   : > { %4775 = vmatpush3.bf16.msra.mxu0 %v5028_v35 }
 0x116   : > { %2529 = vmatmul.mubr.bf16.gmra.mrb[112].mxu1 %v2097_v43  ;;  %4776 = vmatprep.subr.bf16.mxu0 %v5029_v41 }
 0x117   : > { %2536 = vmatprep.mubr.bf16.mxu1 %v2105_v42  ;;  %v2930_v42 = vld [vmem:[#allocation2 + $0x48] sm:$0xff] }
 0x118   : > { %4729 = vmatmul.mubr.bf16.gmra.mrb[100].mxu0 %v5965_v40  ;;  %v1993_v40 = vsel %vm393_vm0, %v1986_v4, %v1992_v11  ;;  %v6190_v4 = vld [vmem:[#allocation2 + $0xe8] sm:$0xff] }
 0x119   : > { %v4750_v54 = vpop.f32.mrb[8].mxu1  ;;  %4777 = vmatpush3.bf16.msra.mxu0 %v5029_v41  ;;  %4732 = vmatprep.mubr.bf16.mxu0 %v6088_v55 }
 0x11a   : > { %v6090_v62 = vpop.f32.mrb[9].mxu1  ;;  %4778 = vmatprep.subr.bf16.mxu0 %v5030_v37  ;;  %v5039_v54 = vld [vmem:[%s6766_s1 + $0x210] sm:$0xff]  }
 0x11b   : > { %v6092_v23 = vpop.f32.mrb[10].mxu1 }
 0x11c   : > { %v6096_v45 = vpop.f32.mrb[11].mxu1 }
 0x11d   : > { %4779 = vmatpush3.bf16.msra.mxu0 %v5030_v37 }
 0x11e   : > { %2537 = vmatmul.mubr.bf16.gmra.mrb[116].mxu1 %v2103_v36  ;;  %4780 = vmatprep.subr.bf16.mxu0 %v5032_v49 }
 0x11f   : > { %2544 = vmatprep.mubr.bf16.mxu1 %v2111_v13 }
 0x120   : > { %4733 = vmatmul.mubr.bf16.gmra.mrb[104].mxu0 %v6104_v18 }
 0x121   : > { %v6106_v6 = vpop.f32.mrb[12].mxu1  ;;  %4781 = vmatpush3.bf16.msra.mxu0 %v5032_v49  ;;  %4736 = vmatprep.mubr.bf16.mxu0 %v6011_v31  ;;  %v1999_v49 = vsel %vm393_vm0, %v1992_v11, %v1998_v56  ;;  %v6195_v11 = vld [vmem:[#allocation2 + $0x100] sm:$0xff] }
 0x122   : > { %v6111_v2 = vpop.f32.mrb[13].mxu1  ;;  %4782 = vmatprep.subr.bf16.mxu0 %v5033_v44 }
 0x123   : > { %v6113_v51 = vpop.f32.mrb[14].mxu1  ;;  %v6123_v15 = vpop.f32.mrb[0].mxu0 }
 0x124   : > { %v1601_v53 = vpop.f32.mrb[15].mxu1  ;;  %v1263_v3 = vpop.f32.mrb[1].mxu0 }
 0x125   : > { %v6125_v63 = vpop.f32.mrb[2].mxu0  ;;  %4783 = vmatpush3.bf16.msra.mxu0 %v5033_v44  ;;  %v5040_v44 = vld [vmem:[%s6766_s1 + $0x218] sm:$0xff]   ;;  %v5041_v3 = vld [vmem:[%s6766_s1 + $0x220] sm:$0xff]  }
 0x126   : > { %2545 = vmatmul.mubr.bf16.gmra.mrb[120].mxu1 %v2109_v27  ;;  %v1266_v0 = vpop.f32.mrb[3].mxu0  ;;  %4784 = vmatprep.subr.bf16.mxu0 %v5034_v52  ;;  %v6173_v27 = vld [vmem:[#allocation2 + $0xd0] sm:$0xff] }
 0x127   : > { %2552 = vmatprep.mubr.bf16.mxu1 %v2117_v48  ;;  %v2933_v48 = vld [vmem:[#allocation2 + $0x60] sm:$0xff]  ;;  %v2016_v50 = vrot.slane %v6173_v27, 4 }
 0x128   : > { %4737 = vmatmul.mubr.bf16.gmra.mrb[108].mxu0 %v6127_v30 }
 0x129   : > { %v6129_v5 = vpop.f32.mrb[16].mxu1  ;;  %4785 = vmatpush3.bf16.msra.mxu0 %v5034_v52  ;;  %4788 = vmatprep.mubr.bf16.mxu0 %v1981_v17  ;;  %v2010_v52 = vrot.slane %v6127_v30, 4 }
 0x12a   : > { %v1614_v58 = vpop.f32.mrb[17].mxu1  ;;  %4786 = vmatprep.subr.bf16.mxu0 %v5036_v14 }
 0x12b   : > { %v4759_v59 = vpop.f32.mrb[18].mxu1  ;;  %v1269_v29 = vpop.f32.mrb[4].mxu0  ;;  %v2011_v17 = vsel %vm393_vm0, %v2004_v57, %v2010_v52 }
 0x12c   : > { %v6137_v26 = vpop.f32.mrb[19].mxu1  ;;  %v1271_v32 = vpop.f32.mrb[5].mxu0 }
 0x12d   : > { %v6144_v34 = vpop.f32.mrb[6].mxu0  ;;  %4787 = vmatpush3.bf16.msra.mxu0 %v5036_v14  ;;  %v2936_v32 = vld [vmem:[#allocation2 + $0x78] sm:$0xff] }
 0x12e   : > { %2553 = vmatmul.mubr.bf16.gmra.mrb[124].mxu1 %v2115_v47  ;;  %v1274_v12 = vpop.f32.mrb[7].mxu0  ;;  %4836 = vmatprep.subr.bf16.mxu0 %v5037_v28  ;;  %v2017_v47 = vsel %vm393_vm0, %v2010_v52, %v2016_v50 }
 0x12f   : > { %3227 = vmatprep.mubr.bf16.mxu1 %v2931_v1  ;;  %v5042_v1 = vld [vmem:[%s6766_s1 + $0x228] sm:$0xff]   ;;  %v2940_v12 = vld [vmem:[#allocation2 + $0x98] sm:$0xff] }
 0x130   : > { %4789 = vmatmul.mubr.bf16.vlgmr.msra.gmra.mrb[112].mxu0 %v1987_v21 }
 0x131   : > { %v4762_v35 = vpop.f32.mrb[20].mxu1  ;;  %4837 = vmatpush3.bf16.msra.mxu0 %v5037_v28  ;;  %4792 = vmatprep.mubr.bf16.mxu0 %v1993_v40  ;;  %v2028_v40 = vrot.slane %v6195_v11, 4 }
 0x132   : > { %v6151_v9 = vpop.f32.mrb[21].mxu1  ;;  %4838 = vmatprep.subr.bf16.mxu0 %v5038_v10  ;;  %v2022_v35 = vrot.slane %v6190_v4, 4 }
 0x133   : > { %v6153_v43 = vpop.f32.mrb[22].mxu1  ;;  %v6162_v37 = vpop.f32.mrb[8].mxu0 }
 0x134   : > { %v6155_v41 = vpop.f32.mrb[23].mxu1  ;;  %v1279_v36 = vpop.f32.mrb[9].mxu0  ;;  %v2023_v57 = vsel %vm393_vm0, %v2016_v50, %v2022_v35  ;;  %v2943_v50 = vld [vmem:[#allocation2 + $0xb0] sm:$0xff] }
 0x135   : > { %v1280_v13 = vpop.f32.mrb[10].mxu0  ;;  %4839 = vmatpush3.bf16.msra.mxu0 %v5038_v10  ;;  %v5043_v10 = vld [vmem:[%s6766_s1 + $0x230] sm:$0xff]  }
 0x136   : > { %3228 = vmatmul.mubr.bf16.vlgmr.msra.gmra.mrb[128].mxu1 %v2930_v42  ;;  %v1282_v38 = vpop.f32.mrb[11].mxu0  ;;  %4840 = vmatprep.subr.bf16.mxu0 %v5039_v54  ;;  %v2029_v13 = vsel %vm393_vm0, %v2022_v35, %v2028_v40 }
 0x137   : > { %3235 = vmatprep.mubr.bf16.mxu1 %v2934_v7  ;;  %v5044_v38 = vld [vmem:[%s6766_s1 + $0x238] sm:$0xff]  }
 0x138   : > { %4793 = vmatmul.mubr.bf16.gmra.mrb[116].mxu0 %v1999_v49  ;;  %v6210_v49 = vld [vmem:[#allocation2 + $0x118] sm:$0xff] }
 0x139   : > { %v6165_v39 = vpop.f32.mrb[24].mxu1  ;;  %4796 = vmatprep.mubr.bf16.mxu0 %v2005_v46  ;;  %4841 = vmatpush3.bf16.msra.mxu0 %v5039_v54 }
 0x13a   : > { %v6171_v25 = vpop.f32.mrb[25].mxu1  ;;  %4842 = vmatprep.subr.bf16.mxu0 %v5040_v44 }
 0x13b   : > { %v6175_v53 = vpop.f32.mrb[26].mxu1  ;;  %v6182_v16 = vpop.f32.mrb[12].mxu0 }
 0x13c   : > { %v1649_v33 = vpop.f32.mrb[27].mxu1  ;;  %v1287_v0 = vpop.f32.mrb[13].mxu0 }
 0x13d   : > { %v6184_v14 = vpop.f32.mrb[14].mxu0  ;;  %4843 = vmatpush3.bf16.msra.mxu0 %v5040_v44  ;;  %v6215_v44 = vld [vmem:[#allocation2 + $0x130] sm:$0xff] }
 0x13e   : > { %3236 = vmatmul.mubr.bf16.gmra.mrb[132].mxu1 %v2933_v48  ;;  %v1290_v59 = vpop.f32.mrb[15].mxu0  ;;  %4844 = vmatprep.subr.bf16.mxu0 %v5041_v3  ;;  %v2939_v33 = vld [vmem:[#allocation2 + $0x90] sm:$0xff] }
 0x13f   : > { %3243 = vmatprep.mubr.bf16.mxu1 %v2937_v24  ;;  %v2034_v24 = vrot.slane %v6210_v49, 4 }
 0x140   : > { %4797 = vmatmul.mubr.bf16.gmra.mrb[120].mxu0 %v2011_v17 }
 0x141   : > { %v6187_v58 = vpop.f32.mrb[28].mxu1  ;;  %4800 = vmatprep.mubr.bf16.mxu0 %v2017_v47  ;;  %4845 = vmatpush3.bf16.msra.mxu0 %v5041_v3  ;;  %v2040_v3 = vrot.slane %v6215_v44, 4  ;;  %v2035_v47 = vsel %vm393_vm0, %v2028_v40, %v2034_v24 }
 0x142   : > { %v1662_v28 = vpop.f32.mrb[29].mxu1  ;;  %4846 = vmatprep.subr.bf16.mxu0 %v5042_v1 }
 0x143   : > { %v4771_v29 = vpop.f32.mrb[30].mxu1  ;;  %v1293_v42 = vpop.f32.mrb[16].mxu0 }
 0x144   : > { %v6197_v21 = vpop.f32.mrb[31].mxu1  ;;  %v1295_v56 = vpop.f32.mrb[17].mxu0  ;;  %v2041_v29 = vsel %vm393_vm0, %v2034_v24, %v2040_v3  ;;  %v2942_v42 = vld [vmem:[#allocation2 + $0xa8] sm:$0xff] }
 0x145   : > { %v6204_v7 = vpop.f32.mrb[18].mxu0  ;;  %4847 = vmatpush3.bf16.msra.mxu0 %v5042_v1 }
 0x146   : > { %3244 = vmatmul.mubr.bf16.gmra.mrb[136].mxu1 %v2936_v32  ;;  %v1298_v36 = vpop.f32.mrb[19].mxu0  ;;  %4848 = vmatprep.subr.bf16.mxu0 %v5043_v10  ;;  %v6225_v32 = vld [vmem:[#allocation2 + $0x148] sm:$0xff] }
 0x147   : > { %3251 = vmatprep.mubr.bf16.mxu1 %v2940_v12  ;;  %v6227_v12 = vld [vmem:[#allocation2 + $0x160] sm:$0xff]  ;;  %v2946_v36 = vld [vmem:[#allocation2 + $0xc8] sm:$0xff] }
 0x148   : > { %4801 = vmatmul.mubr.bf16.gmra.mrb[124].mxu0 %v2023_v57  ;;  %v2046_v57 = vrot.slane %v6225_v32, 4  ;;  %v2052_v40 = vrot.slane %v6227_v12, 4 }
 0x149   : > { %v6207_v54 = vpop.f32.mrb[32].mxu1  ;;  %4804 = vmatprep.mubr.bf16.mxu0 %v2029_v13  ;;  %4849 = vmatpush3.bf16.msra.mxu0 %v5043_v10 }
 0x14a   : > { %6818 = vst [vmem:[#allocation4_spill] sm:$0xff] %v6207_v54  ;;  %v2372_v46 = vpop.f32.mrb[33].mxu1  ;;  %4850 = vmatprep.subr.bf16.mxu0 %v5044_v38  ;;  %v6268_v54 = vld [vmem:[#allocation2 + $0x1f0] sm:$0xff] }
 0x14b   : > { %v6217_v48 = vpop.f32.mrb[34].mxu1  ;;  %v6221_v0 = vpop.f32.mrb[20].mxu0 }
 0x14c   : > { %6819 = vst [vmem:[#allocation5_spill] sm:$0xff] %v6217_v48  ;;  %v2375_v52 = vpop.f32.mrb[35].mxu1  ;;  %v1303_v17 = vpop.f32.mrb[21].mxu0 }
 0x14d   : > { %v1304_v59 = vpop.f32.mrb[22].mxu0  ;;  %4851 = vmatpush3.bf16.msra.mxu0 %v5044_v38  ;;  %v6241_v17 = vld [vmem:[#allocation2 + $0x178] sm:$0xff] }
 0x14e   : > { %3252 = vmatmul.mubr.bf16.gmra.mrb[140].mxu1 %v2939_v33  ;;  %v1306_v28 = vpop.f32.mrb[23].mxu0  ;;  %v2047_v33 = vsel %vm393_vm0, %v2040_v3, %v2046_v57 }
 0x14f   : > { %3259 = vmatprep.mubr.bf16.mxu1 %v2943_v50  ;;  %v2053_v50 = vsel %vm393_vm0, %v2046_v57, %v2052_v40  ;;  %v2945_v28 = vld [vmem:[#allocation2 + $0xc0] sm:$0xff] }
 0x150   : > { %4805 = vmatmul.mubr.bf16.gmra.mrb[128].mxu0 %v2035_v47  ;;  %v6243_v47 = vld [vmem:[#allocation2 + $0x190] sm:$0xff] }
 0x151   : > { %v2378_v1 = vpop.f32.mrb[36].mxu1  ;;  %4808 = vmatprep.mubr.bf16.mxu0 %v2041_v29  ;;  %v2064_v3 = vrot.slane %v6243_v47, 4 }
 0x152   : > { %v2380_v35 = vpop.f32.mrb[37].mxu1 }
 0x153   : > { %v6229_v10 = vpop.f32.mrb[38].mxu1  ;;  %v6233_v13 = vpop.f32.mrb[24].mxu0  ;;  %v2058_v35 = vrot.slane %v6241_v17, 4 }
 0x154   : > { %6820 = vst [vmem:[#allocation6_spill] sm:$0xff] %v6229_v10  ;;  %v2383_v56 = vpop.f32.mrb[39].mxu1  ;;  %v1311_v38 = vpop.f32.mrb[25].mxu0 }
 0x155   : > { %v6235_v46 = vpop.f32.mrb[26].mxu0  ;;  %v2059_v38 = vsel %vm393_vm0, %v2052_v40, %v2058_v35 }
 0x156   : > { %3260 = vmatmul.mubr.bf16.gmra.mrb[144].mxu1 %v2942_v42  ;;  %6821 = vst [vmem:[#allocation7_spill] sm:$0xff] %v6235_v46  ;;  %v1314_v24 = vpop.f32.mrb[27].mxu0  ;;  %v2949_v42 = vld [vmem:[#allocation2 + $0xe0] sm:$0xff] }
 0x157   : > { %3267 = vmatprep.mubr.bf16.mxu1 %v2946_v36 }
 0x158   : > { %4809 = vmatmul.mubr.bf16.gmra.mrb[132].mxu0 %v2047_v33  ;;  %v2065_v33 = vsel %vm393_vm0, %v2058_v35, %v2064_v3 }
 0x159   : > { %v6238_v52 = vpop.f32.mrb[40].mxu1  ;;  %4812 = vmatprep.mubr.bf16.mxu0 %v2053_v50 }
 0x15a   : > { %6822 = vst [vmem:[#allocation8_spill] sm:$0xff] %v6238_v52  ;;  %v2388_v59 = vpop.f32.mrb[41].mxu1 }
 0x15b   : > { %v2389_v1 = vpop.f32.mrb[42].mxu1  ;;  %v1317_v56 = vpop.f32.mrb[28].mxu0 }
 0x15c   : > { %v2391_v29 = vpop.f32.mrb[43].mxu1  ;;  %v1319_v36 = vpop.f32.mrb[29].mxu0  ;;  %v6253_v1 = vld [vmem:[#allocation2 + $0x1a8] sm:$0xff] }
 0x15d   : > { %v6247_v57 = vpop.f32.mrb[30].mxu0  ;;  %v6255_v29 = vld [vmem:[#allocation2 + $0x1c0] sm:$0xff]  ;;  %v2952_v36 = vld [vmem:[#allocation2 + $0xf8] sm:$0xff] }
 0x15e   : > { %3268 = vmatmul.mubr.bf16.gmra.mrb[148].mxu1 %v2945_v28  ;;  %6823 = vst [vmem:[#allocation9_spill] sm:$0xff] %v6247_v57  ;;  %v1322_v59 = vpop.f32.mrb[31].mxu0  ;;  %v2948_v28 = vld [vmem:[#allocation2 + $0xd8] sm:$0xff]  ;;  %v2076_v40 = vrot.slane %v6255_v29, 4 }
 0x15f   : > { %3275 = vmatprep.mubr.bf16.mxu1 %v2949_v42  ;;  %v2070_v42 = vrot.slane %v6253_v1, 4 }
 0x160   : > { %4813 = vmatmul.mubr.bf16.gmra.mrb[136].mxu0 %v2059_v38 }
 0x161   : > { %v6250_v24 = vpop.f32.mrb[44].mxu1  ;;  %4816 = vmatprep.mubr.bf16.mxu0 %v2065_v33  ;;  %v2071_v48 = vsel %vm393_vm0, %v2064_v3, %v2070_v42  ;;  %v6266_v33 = vld [vmem:[#allocation2 + $0x1d8] sm:$0xff]  ;;  %v2088_v3 = vrot.slane %v6268_v54, 4 }
 0x162   : > { %6824 = vst [vmem:[#allocation10_spill] sm:$0xff] %v6250_v24  ;;  %v2396_v50 = vpop.f32.mrb[45].mxu1 }
 0x163   : > { %v6257_v52 = vpop.f32.mrb[46].mxu1  ;;  %v1325_v59 = vpop.f32.mrb[32].mxu0 }
 0x164   : > { %6825 = vst [vmem:[#allocation11_spill] sm:$0xff] %v6257_v52  ;;  %v2399_v56 = vpop.f32.mrb[47].mxu1  ;;  %v6262_v35 = vadd.f32 %v6060_v22, %v1325_v59  ;;  %v1327_v24 = vpop.f32.mrb[33].mxu0 }
 0x165   : > { %v1328_v50 = vpop.f32.mrb[34].mxu0  ;;  %v2077_v56 = vsel %vm393_vm0, %v2070_v42, %v2076_v40  ;;  %v2082_v24 = vrot.slane %v6266_v33, 4 }
 0x166   : > { %3276 = vmatmul.mubr.bf16.gmra.mrb[152].mxu1 %v2948_v28  ;;  %6826 = vst [vmem:[#allocation12_spill] sm:$0xff] %v6262_v35  ;;  %v1330_v38 = vpop.f32.mrb[35].mxu0  ;;  %v2951_v28 = vld [vmem:[#allocation2 + $0xf0] sm:$0xff]  ;;  %v6284_v35 = vld [vmem:[#allocation2 + $0x208] sm:$0xff] }
 0x167   : > { %3283 = vmatprep.mubr.bf16.mxu1 %v2952_v36  ;;  %v2955_v36 = vld [vmem:[#allocation2 + $0x110] sm:$0xff]  ;;  %v2083_v50 = vsel %vm393_vm0, %v2076_v40, %v2082_v24  ;;  %v2094_v40 = vrot.slane %v6284_v35, 4 }
 0x168   : > { %4817 = vmatmul.mubr.bf16.gmra.mrb[140].mxu0 %v2071_v48 }
 0x169   : > { %v2402_v52 = vpop.f32.mrb[48].mxu1  ;;  %4820 = vmatprep.mubr.bf16.mxu0 %v2077_v56 }
 0x16a   : > { %v2404_v10 = vpop.f32.mrb[49].mxu1 }
 0x16b   : > { %v6270_v46 = vpop.f32.mrb[50].mxu1  ;;  %v1333_v52 = vpop.f32.mrb[36].mxu0 }
 0x16c   : > { %6827 = vst [vmem:[#allocation13_spill] sm:$0xff] %v6270_v46  ;;  %v2407_v22 = vpop.f32.mrb[51].mxu1  ;;  %v6275_v42 = vadd.f32 %v6057_v61, %v1333_v52  ;;  %v1335_v59 = vpop.f32.mrb[37].mxu0  ;;  %v6286_v46 = vld [vmem:[#allocation2 + $0x220] sm:$0xff]  ;;  %v2954_v52 = vld [vmem:[#allocation2 + $0x108] sm:$0xff] }
 0x16d   : > { %v1336_v10 = vpop.f32.mrb[38].mxu0  ;;  %v2089_v22 = vsel %vm393_vm0, %v2082_v24, %v2088_v3  ;;  %v2958_v59 = vld [vmem:[#allocation2 + $0x128] sm:$0xff] }
 0x16e   : > { %3284 = vmatmul.mubr.bf16.gmra.mrb[156].mxu1 %v2951_v28  ;;  %6828 = vst [vmem:[#allocation14_spill] sm:$0xff] %v6275_v42  ;;  %v6281_v48 = vadd.f32 %v6062_v60, %v1336_v10  ;;  %v1338_v56 = vpop.f32.mrb[39].mxu0  ;;  %v2100_v42 = vrot.slane %v6286_v46, 4 }
 0x16f   : > { %3291 = vmatprep.mubr.bf16.mxu1 %v2955_v36  ;;  %v2095_v56 = vsel %vm393_vm0, %v2088_v3, %v2094_v40  ;;  %v2961_v3 = vld [vmem:[#allocation2 + $0x140] sm:$0xff] }
 0x170   : > { %6830 = vst [vmem:[#allocation16_spill] sm:$0xff] %v6281_v48  ;;  %4821 = vmatmul.mubr.bf16.gmra.mrb[144].mxu0 %v2083_v50 }
 0x171   : > { %v6278_v38 = vpop.f32.mrb[52].mxu1  ;;  %4824 = vmatprep.mubr.bf16.mxu0 %v2089_v22  ;;  %v2101_v22 = vsel %vm393_vm0, %v2094_v40, %v2100_v42 }
 0x172   : > { %6829 = vst [vmem:[#allocation15_spill] sm:$0xff] %v6278_v38  ;;  %v2412_v28 = vpop.f32.mrb[53].mxu1 }
 0x173   : > { %v2413_v61 = vpop.f32.mrb[54].mxu1  ;;  %v1341_v60 = vpop.f32.mrb[40].mxu0 }
 0x174   : > { %v2415_v36 = vpop.f32.mrb[55].mxu1  ;;  %v1343_v10 = vpop.f32.mrb[41].mxu0 }
 0x175   : > { %v1344_v24 = vpop.f32.mrb[42].mxu0  ;;  %v6297_v36 = vld [vmem:[#allocation2 + $0x238] sm:$0xff]  ;;  %v2112_v10 = vrot.slane %v6055_v19, 4 }
 0x176   : > { %3292 = vmatmul.mubr.bf16.gmra.mrb[160].mxu1 %v2954_v52  ;;  %v6294_v61 = vadd.f32 %v6076_v20, %v1344_v24  ;;  %v1346_v50 = vpop.f32.mrb[43].mxu0  ;;  %v2957_v52 = vld [vmem:[#allocation2 + $0x120] sm:$0xff]  ;;  %v2960_v19 = vld [vmem:[#allocation2 + $0x138] sm:$0xff] }
 0x177   : > { %3299 = vmatprep.mubr.bf16.mxu1 %v2958_v59  ;;  %v2106_v59 = vrot.slane %v6297_v36, 4 }
 0x178   : > { %6832 = vst [vmem:[#allocation18_spill] sm:$0xff] %v6294_v61  ;;  %4825 = vmatmul.mubr.bf16.gmra.mrb[148].mxu0 %v2095_v56 }
 0x179   : > { %v6291_v28 = vpop.f32.mrb[56].mxu1  ;;  %4828 = vmatprep.mubr.bf16.mxu0 %v2101_v22  ;;  %v1847_v22 = vld [vmem:[#allocation2 + $0x268] sm:$0xf] }
 0x17a   : > { %6831 = vst [vmem:[#allocation17_spill] sm:$0xff] %v6291_v28  ;;  %v2420_v48 = vpop.f32.mrb[57].mxu1  ;;  %v2118_v57 = vrot.slane %v1847_v22, 4 }
 0x17b   : > { %v6299_v38 = vpop.f32.mrb[58].mxu1  ;;  %v1349_v20 = vpop.f32.mrb[44].mxu0  ;;  %v2107_v48 = vsel %vm393_vm0, %v2100_v42, %v2106_v59 }
 0x17c   : > { %6833 = vst [vmem:[#allocation19_spill] sm:$0xff] %v6299_v38  ;;  %v2423_v60 = vpop.f32.mrb[59].mxu1  ;;  %v6304_v24 = vadd.f32 %v6068_v8, %v1349_v20  ;;  %v1351_v40 = vpop.f32.mrb[45].mxu0  ;;  %v2964_v8 = vld [vmem:[#allocation2 + $0x158] sm:$0xff] }
 0x17d   : > { %v1352_v50 = vpop.f32.mrb[46].mxu0  ;;  %v2113_v60 = vsel %vm393_vm0, %v2106_v59, %v2112_v10  ;;  %v2119_v59 = vsel %vm393_vm0, %v2112_v10, %v2118_v57 }
 0x17e   : > { %3300 = vmatmul.mubr.bf16.gmra.mrb[164].mxu1 %v2957_v52  ;;  %v1354_v56 = vpop.f32.mrb[47].mxu0 }
 0x17f   : > { %3307 = vmatprep.mubr.bf16.mxu1 %v2961_v3 }
 0x180   : > { %4829 = vmatmul.mubr.bf16.gmra.mrb[152].mxu0 %v2107_v48 }
 0x181   : > { %v2426_v61 = vpop.f32.mrb[60].mxu1  ;;  %4832 = vmatprep.mubr.bf16.mxu0 %v2113_v60  ;;  %v2963_v60 = vld [vmem:[#allocation2 + $0x150] sm:$0xff] }
 0x182   : > { %v2428_v38 = vpop.f32.mrb[61].mxu1 }
 0x183   : > { %v6308_v28 = vpop.f32.mrb[62].mxu1  ;;  %v1357_v20 = vpop.f32.mrb[48].mxu0 }
 0x184   : > { %v2431_v52 = vpop.f32.mrb[63].mxu1  ;;  %v6311_v3 = vadd.f32 %v6090_v62, %v1357_v20  ;;  %v1359_v42 = vpop.f32.mrb[49].mxu0  ;;  %v2967_v62 = vld [vmem:[#allocation2 + $0x170] sm:$0xff] }
 0x185   : > { %v1360_v61 = vpop.f32.mrb[50].mxu0 }
 0x186   : > { %3308 = vmatmul.mubr.bf16.gmra.mrb[168].mxu1 %v2960_v19  ;;  %v6317_v38 = vadd.f32 %v6096_v45, %v1360_v61  ;;  %v1362_v50 = vpop.f32.mrb[51].mxu0  ;;  %v5052_v19 = vld [vmem:[#allocation2 + $0x58] sm:$0xff] }
 0x187   : > { %3315 = vmatprep.mubr.bf16.mxu1 %v2964_v8 }
 0x188   : > { %4833 = vmatmul.mubr.bf16.gmra.mrb[156].mxu0 %v2119_v59  ;;  %v2966_v59 = vld [vmem:[#allocation2 + $0x168] sm:$0xff] }
 0x189   : > { %v6314_v40 = vpop.f32.mrb[64].mxu1  ;;  %4852 = vmatprep.mubr.bf16.mxu0 %v5052_v19 }
 0x18a   : > { %v2436_v48 = vpop.f32.mrb[65].mxu1 }
 0x18b   : > { %v2437_v56 = vpop.f32.mrb[66].mxu1  ;;  %v1365_v52 = vpop.f32.mrb[52].mxu0  ;;  %v2970_v48 = vld [vmem:[#allocation2 + $0x188] sm:$0xff] }
 0x18c   : > { %v2439_v22 = vpop.f32.mrb[67].mxu1  ;;  %v1367_v8 = vpop.f32.mrb[53].mxu0 }
 0x18d   : > { %v1368_v20 = vpop.f32.mrb[54].mxu0 }
 0x18e   : > { %3316 = vmatmul.mubr.bf16.gmra.mrb[172].mxu1 %v2963_v60  ;;  %v6322_v10 = vadd.f32 %v6092_v23, %v1368_v20  ;;  %v1370_v45 = vpop.f32.mrb[55].mxu0 }
 0x18f   : > { %3323 = vmatprep.mubr.bf16.mxu1 %v2967_v62 }
 0x190   : > { %4853 = vmatmul.mubr.bf16.vlgmr.msra.gmra.mrb[160].mxu0 %v6088_v55  ;;  %v2969_v55 = vld [vmem:[#allocation2 + $0x180] sm:$0xff] }
 0x191   : > { %v6319_v57 = vpop.f32.mrb[68].mxu1  ;;  %4856 = vmatprep.mubr.bf16.mxu0 %v6104_v18  ;;  %v2973_v18 = vld [vmem:[#allocation2 + $0x1a0] sm:$0xff] }
 0x192   : > { %v2444_v42 = vpop.f32.mrb[69].mxu1 }
 0x193   : > { %v6324_v61 = vpop.f32.mrb[70].mxu1  ;;  %v1373_v56 = vpop.f32.mrb[56].mxu0 }
 0x194   : > { %v2447_v50 = vpop.f32.mrb[71].mxu1  ;;  %v6329_v60 = vadd.f32 %v6111_v2, %v1373_v56  ;;  %v1375_v22 = vpop.f32.mrb[57].mxu0 }
 0x195   : > { %v1376_v23 = vpop.f32.mrb[58].mxu0 }
 0x196   : > { %3324 = vmatmul.mubr.bf16.gmra.mrb[176].mxu1 %v2966_v59  ;;  %v1378_v62 = vpop.f32.mrb[59].mxu0 }
 0x197   : > { %3331 = vmatprep.mubr.bf16.mxu1 %v2970_v48 }
 0x198   : > { %4857 = vmatmul.mubr.bf16.gmra.mrb[164].mxu0 %v6011_v31 }
 0x199   : > { %v2450_v19 = vpop.f32.mrb[72].mxu1  ;;  %4860 = vmatprep.mubr.bf16.mxu0 %v6127_v30  ;;  %v2972_v30 = vld [vmem:[#allocation2 + $0x198] sm:$0xff] }
 0x19a   : > { %v2452_v52 = vpop.f32.mrb[73].mxu1  ;;  %v2976_v19 = vld [vmem:[#allocation2 + $0x1b8] sm:$0xff] }
 0x19b   : > { %v6331_v8 = vpop.f32.mrb[74].mxu1  ;;  %v1381_v45 = vpop.f32.mrb[60].mxu0 }
 0x19c   : > { %v2455_v20 = vpop.f32.mrb[75].mxu1  ;;  %v6336_v2 = vadd.f32 %v6106_v6, %v1381_v45  ;;  %v1383_v42 = vpop.f32.mrb[61].mxu0 }
 0x19d   : > { %v1384_v59 = vpop.f32.mrb[62].mxu0 }
 0x19e   : > { %3332 = vmatmul.mubr.bf16.gmra.mrb[180].mxu1 %v2969_v55  ;;  %v6341_v48 = vadd.f32 %v6113_v51, %v1384_v59  ;;  %v1386_v56 = vpop.f32.mrb[63].mxu0 }
 0x19f   : > { %3339 = vmatprep.mubr.bf16.mxu1 %v2973_v18 }
 0x1a0   : > { %4861 = vmatmul.mubr.bf16.gmra.mrb[168].mxu0 %v6173_v27  ;;  %v2975_v27 = vld [vmem:[#allocation2 + $0x1b0] sm:$0xff] }
 0x1a1   : > { %v6338_v50 = vpop.f32.mrb[76].mxu1  ;;  %4864 = vmatprep.mubr.bf16.mxu0 %v6190_v4  ;;  %v2979_v4 = vld [vmem:[#allocation2 + $0x1d0] sm:$0xff] }
 0x1a2   : > { %v2460_v31 = vpop.f32.mrb[77].mxu1 }
 0x1a3   : > { %v2461_v22 = vpop.f32.mrb[78].mxu1  ;;  %v1389_v6 = vpop.f32.mrb[64].mxu0 }
 0x1a4   : > { %v2463_v23 = vpop.f32.mrb[79].mxu1  ;;  %v1391_v62 = vpop.f32.mrb[65].mxu0 }
 0x1a5   : > { %v1392_v52 = vpop.f32.mrb[66].mxu0 }
 0x1a6   : > { %3340 = vmatmul.mubr.bf16.gmra.mrb[184].mxu1 %v2972_v30  ;;  %v6348_v51 = vadd.f32 %v6137_v26, %v1392_v52  ;;  %v1394_v20 = vpop.f32.mrb[67].mxu0 }
 0x1a7   : > { %3347 = vmatprep.mubr.bf16.mxu1 %v2976_v19 }
 0x1a8   : > { %4865 = vmatmul.mubr.bf16.gmra.mrb[172].mxu0 %v6195_v11  ;;  %v2978_v11 = vld [vmem:[#allocation2 + $0x1c8] sm:$0xff] }
 0x1a9   : > { %v6345_v55 = vpop.f32.mrb[80].mxu1  ;;  %4868 = vmatprep.mubr.bf16.mxu0 %v6210_v49  ;;  %v2982_v49 = vld [vmem:[#allocation2 + $0x1e8] sm:$0xff] }
 0x1aa   : > { %v2468_v18 = vpop.f32.mrb[81].mxu1 }
 0x1ab   : > { %v6350_v45 = vpop.f32.mrb[82].mxu1  ;;  %v1397_v59 = vpop.f32.mrb[68].mxu0 }
 0x1ac   : > { %v2471_v42 = vpop.f32.mrb[83].mxu1  ;;  %v6355_v56 = vadd.f32 %v6129_v5, %v1397_v59  ;;  %v1399_v31 = vpop.f32.mrb[69].mxu0 }
 0x1ad   : > { %v1400_v26 = vpop.f32.mrb[70].mxu0  ;;  %v2985_v31 = vld [vmem:[#allocation2 + $0x200] sm:$0xff] }
 0x1ae   : > { %3348 = vmatmul.mubr.bf16.gmra.mrb[188].mxu1 %v2975_v27  ;;  %v1402_v30 = vpop.f32.mrb[71].mxu0 }
 0x1af   : > { %3355 = vmatprep.mubr.bf16.mxu1 %v2979_v4 }
 0x1b0   : > { %4869 = vmatmul.mubr.bf16.gmra.mrb[176].mxu0 %v6215_v44 }
 0x1b1   : > { %v2474_v22 = vpop.f32.mrb[84].mxu1  ;;  %4872 = vmatprep.mubr.bf16.mxu0 %v6225_v32  ;;  %v2981_v32 = vld [vmem:[#allocation2 + $0x1e0] sm:$0xff] }
 0x1b2   : > { %v2476_v23 = vpop.f32.mrb[85].mxu1 }
 0x1b3   : > { %v6357_v19 = vpop.f32.mrb[86].mxu1  ;;  %v1405_v62 = vpop.f32.mrb[72].mxu0 }
 0x1b4   : > { %v2479_v6 = vpop.f32.mrb[87].mxu1  ;;  %v6362_v5 = vadd.f32 %v6151_v9, %v1405_v62  ;;  %v1407_v52 = vpop.f32.mrb[73].mxu0 }
 0x1b5   : > { %v1408_v20 = vpop.f32.mrb[74].mxu0 }
 0x1b6   : > { %3356 = vmatmul.mubr.bf16.gmra.mrb[192].mxu1 %v2978_v11  ;;  %v6367_v27 = vadd.f32 %v6155_v41, %v1408_v20  ;;  %v1410_v42 = vpop.f32.mrb[75].mxu0 }
 0x1b7   : > { %3363 = vmatprep.mubr.bf16.mxu1 %v2982_v49 }
 0x1b8   : > { %4873 = vmatmul.mubr.bf16.gmra.mrb[180].mxu0 %v6227_v12  ;;  %v2984_v12 = vld [vmem:[#allocation2 + $0x1f8] sm:$0xff] }
 0x1b9   : > { %v6364_v18 = vpop.f32.mrb[88].mxu1  ;;  %4876 = vmatprep.mubr.bf16.mxu0 %v6241_v17  ;;  %v2988_v17 = vld [vmem:[#allocation2 + $0x218] sm:$0xff] }
 0x1ba   : > { %v2484_v44 = vpop.f32.mrb[89].mxu1 }
 0x1bb   : > { %v2485_v4 = vpop.f32.mrb[90].mxu1  ;;  %v1413_v9 = vpop.f32.mrb[76].mxu0 }
 0x1bc   : > { %v2487_v59 = vpop.f32.mrb[91].mxu1  ;;  %v1415_v26 = vpop.f32.mrb[77].mxu0 }
 0x1bd   : > { %v1416_v22 = vpop.f32.mrb[78].mxu0 }
 0x1be   : > { %3364 = vmatmul.mubr.bf16.gmra.mrb[196].mxu1 %v2981_v32  ;;  %v6374_v41 = vadd.f32 %v6153_v43, %v1416_v22  ;;  %v1418_v23 = vpop.f32.mrb[79].mxu0 }
 0x1bf   : > { %3371 = vmatprep.mubr.bf16.mxu1 %v2985_v31 }
 0x1c0   : > { %4877 = vmatmul.mubr.bf16.gmra.mrb[184].mxu0 %v6243_v47  ;;  %v2987_v47 = vld [vmem:[#allocation2 + $0x210] sm:$0xff] }
 0x1c1   : > { %v6371_v30 = vpop.f32.mrb[92].mxu1  ;;  %4880 = vmatprep.mubr.bf16.mxu0 %v6253_v1  ;;  %v2991_v1 = vld [vmem:[#allocation2 + $0x230] sm:$0xff] }
 0x1c2   : > { %v2492_v11 = vpop.f32.mrb[93].mxu1 }
 0x1c3   : > { %v6376_v6 = vpop.f32.mrb[94].mxu1  ;;  %v1421_v62 = vpop.f32.mrb[80].mxu0 }
 0x1c4   : > { %v2495_v49 = vpop.f32.mrb[95].mxu1  ;;  %v6381_v52 = vadd.f32 %v6171_v25, %v1421_v62  ;;  %v1423_v20 = vpop.f32.mrb[81].mxu0 }
 0x1c5   : > { %v1424_v43 = vpop.f32.mrb[82].mxu0 }
 0x1c6   : > { %3372 = vmatmul.mubr.bf16.gmra.mrb[200].mxu1 %v2984_v12  ;;  %v1426_v44 = vpop.f32.mrb[83].mxu0 }
 0x1c7   : > { %3379 = vmatprep.mubr.bf16.mxu1 %v2988_v17  ;;  %v2994_v17 = vld [vmem:[#allocation2 + $0x248] sm:$0xff] }
 0x1c8   : > { %4881 = vmatmul.mubr.bf16.gmra.mrb[188].mxu0 %v6255_v29 }
 0x1c9   : > { %v2498_v42 = vpop.f32.mrb[96].mxu1  ;;  %4884 = vmatprep.mubr.bf16.mxu0 %v6266_v33  ;;  %v2990_v33 = vld [vmem:[#allocation2 + $0x228] sm:$0xff] }
 0x1ca   : > { %v2500_v4 = vpop.f32.mrb[97].mxu1 }
 0x1cb   : > { %v6383_v32 = vpop.f32.mrb[98].mxu1  ;;  %v1429_v31 = vpop.f32.mrb[84].mxu0 }
 0x1cc   : > { %v2503_v59 = vpop.f32.mrb[99].mxu1  ;;  %v6388_v25 = vadd.f32 %v6165_v39, %v1429_v31  ;;  %v1431_v9 = vpop.f32.mrb[85].mxu0  ;;  %v5053_v31 = vld [vmem:[#allocation2] sm:$0xff] }
 0x1cd   : > { %v1432_v26 = vpop.f32.mrb[86].mxu0 }
 0x1ce   : > { %3380 = vmatmul.mubr.bf16.gmra.mrb[204].mxu1 %v2987_v47  ;;  %v6393_v23 = vadd.f32 %v6175_v53, %v1432_v26  ;;  %v1434_v11 = vpop.f32.mrb[87].mxu0 }
 0x1cf   : > { %3387 = vmatprep.mubr.bf16.mxu1 %v2991_v1 }
 0x1d0   : > { %6834 = vst [vmem:[#allocation20_spill] sm:$0xff] %v6393_v23  ;;  %4885 = vmatmul.mubr.bf16.gmra.mrb[192].mxu0 %v6268_v54  ;;  %v2993_v54 = vld [vmem:[#allocation2 + $0x240] sm:$0xff] }
 0x1d1   : > { %v6390_v22 = vpop.f32.mrb[100].mxu1  ;;  %4888 = vmatprep.mubr.bf16.mxu0 %v6284_v35 }
 0x1d2   : > { %v2508_v29 = vpop.f32.mrb[101].mxu1 }
 0x1d3   : > { %v2509_v12 = vpop.f32.mrb[102].mxu1  ;;  %v1437_v39 = vpop.f32.mrb[88].mxu0 }
 0x1d4   : > { %v2511_v49 = vpop.f32.mrb[103].mxu1  ;;  %v1439_v62 = vpop.f32.mrb[89].mxu0  ;;  %v5054_v12 = vld [vmem:[#allocation2 + $0x250] sm:$0xff] }
 0x1d5   : > { %v1440_v20 = vpop.f32.mrb[90].mxu0 }
 0x1d6   : > { %3388 = vmatmul.mubr.bf16.gmra.mrb[208].mxu1 %v2990_v33  ;;  %v6400_v53 = vadd.f32 %v6197_v21, %v1440_v20  ;;  %v1442_v42 = vpop.f32.mrb[91].mxu0 }
 0x1d7   : > { %3395 = vmatprep.mubr.bf16.mxu1 %v2994_v17 }
 0x1d8   : > { %6835 = vst [vmem:[#allocation21_spill] sm:$0xff] %v6400_v53  ;;  %4889 = vmatmul.mubr.bf16.gmra.mrb[196].mxu0 %v6286_v46  ;;  %v2996_v46 = vld [vmem:[#allocation2 + $0x258] sm:$0xff] }
 0x1d9   : > { %v6397_v43 = vpop.f32.mrb[104].mxu1  ;;  %4892 = vmatprep.mubr.bf16.mxu0 %v6297_v36 }
 0x1da   : > { %v2516_v44 = vpop.f32.mrb[105].mxu1 }
 0x1db   : > { %v6402_v4 = vpop.f32.mrb[106].mxu1  ;;  %v1445_v35 = vpop.f32.mrb[92].mxu0 }
 0x1dc   : > { %v2519_v47 = vpop.f32.mrb[107].mxu1  ;;  %v6407_v59 = vadd.f32 %v6187_v58, %v1445_v35  ;;  %v1447_v1 = vpop.f32.mrb[93].mxu0 }
 0x1dd   : > { %v1448_v21 = vpop.f32.mrb[94].mxu0 }
 0x1de   : > { %3396 = vmatmul.mubr.bf16.gmra.mrb[212].mxu1 %v2993_v54  ;;  %6836 = vst [vmem:[#allocation22_spill] sm:$0xff] %v6407_v59  ;;  %v1450_v26 = vpop.f32.mrb[95].mxu0 }
 0x1df   : > { %3403 = vmatprep.mubr.bf16.mxu1 %v5053_v31 }
 0x1e0   : > { %4893 = vmatmul.mubr.bf16.gmra.mrb[200].mxu0 %v5054_v12 }
 0x1e1   : > { %v2522_v9 = vpop.f32.mrb[108].mxu1  ;;  %4896 = vmatprep.mubr.bf16.mxu0 %v5053_v31 }
 0x1e2   : > { %v2524_v11 = vpop.f32.mrb[109].mxu1 }
 0x1e3   : > { %v6409_v29 = vpop.f32.mrb[110].mxu1  ;;  %v4726_v36 = vpop.f32.mrb[96].mxu0 }
 0x1e4   : > { %v2527_v33 = vpop.f32.mrb[111].mxu1  ;;  %v1486_v49 = vpop.f32.mrb[97].mxu0 }
 0x1e5   : > { %v1487_v58 = vadd.f32 %v1486_v49, %v6123_v15  ;;  %v4727_v17 = vpop.f32.mrb[98].mxu0 }
 0x1e6   : > { %3404 = vmatmul.mubr.bf16.gmra.mrb[216].mxu1 %v2996_v46  ;;  %v1498_v62 = vadd.f32 %v4727_v17, %v6144_v34  ;;  %v1489_v20 = vpop.f32.mrb[99].mxu0 }
 0x1e7   : > { %3411 = vmatprep.mubr.bf16.mxu1 %v5053_v31  ;;  %v1490_v44 = vadd.f32 %v1489_v20, %v6125_v63 }
 0x1e8   : > { %4897 = vmatmul.mubr.bf16.gmra.mrb[204].mxu0 %v5053_v31 }
 0x1e9   : > { %v6412_v39 = vpop.f32.mrb[112].mxu1 }
 0x1ea   : > { %v2532_v42 = vpop.f32.mrb[113].mxu1 }
 0x1eb   : > { %v2533_v54 = vpop.f32.mrb[114].mxu1  ;;  %v4730_v35 = vpop.f32.mrb[100].mxu0 }
 0x1ec   : > { %v2535_v47 = vpop.f32.mrb[115].mxu1  ;;  %v1511_v1 = vadd.f32 %v4730_v35, %v6182_v16  ;;  %v1502_v21 = vpop.f32.mrb[101].mxu0 }
 0x1ed   : > { %v1503_v9 = vadd.f32 %v1502_v21, %v6162_v37  ;;  %v4731_v15 = vpop.f32.mrb[102].mxu0 }
 0x1ee   : > { %3412 = vmatmul.mubr.bf16.gmra.mrb[220].mxu1 %v5053_v31  ;;  %v1514_v11 = vadd.f32 %v4731_v15, %v6184_v14  ;;  %v1505_v34 = vpop.f32.mrb[103].mxu0 }
 0x1ef   : > { %v6839_v34 = vld [vmem:[#allocation9_spill] sm:$0xff] }
 0x1f1   : > { %v6418_v26 = vpop.f32.mrb[116].mxu1 }
 0x1f2   : > { %v2540_v12 = vpop.f32.mrb[117].mxu1 }
 0x1f3   : > { %v6421_v46 = vpop.f32.mrb[118].mxu1  ;;  %v4734_v33 = vpop.f32.mrb[104].mxu0 }
 0x1f4   : > { %v2543_v63 = vpop.f32.mrb[119].mxu1  ;;  %v1527_v36 = vadd.f32 %v4734_v33, %v6221_v0  ;;  %v1518_v31 = vpop.f32.mrb[105].mxu0  ;;  %v6840_v33 = vld [vmem:[#allocation7_spill] sm:$0xff] }
 0x1f5   : > { %v4735_v49 = vpop.f32.mrb[106].mxu0 }
 0x1f6   : > { %v1521_v16 = vpop.f32.mrb[107].mxu0 }
 0x1f7   : > { %v1522_v37 = vadd.f32 %v1521_v16, %v6204_v7  ;;  %v6841_v16 = vld [vmem:[#allocation4_spill] sm:$0xff] }
 0x1f9   : > { %v2546_v17 = vpop.f32.mrb[120].mxu1 }
 0x1fa   : > { %v2548_v20 = vpop.f32.mrb[121].mxu1 }
 0x1fb   : > { %v6425_v42 = vpop.f32.mrb[122].mxu1  ;;  %v4738_v47 = vpop.f32.mrb[108].mxu0 }
 0x1fc   : > { %6837 = vst [vmem:[#allocation23_spill] sm:$0xff] %v6425_v42  ;;  %v2551_v54 = vpop.f32.mrb[123].mxu1  ;;  %v1534_v14 = vpop.f32.mrb[109].mxu0  ;;  %v6843_v42 = vld [vmem:[#allocation6_spill] sm:$0xff] }
 0x1fd   : > { %v1535_v35 = vadd.f32 %v1534_v14, %v6233_v13  ;;  %v4739_v21 = vpop.f32.mrb[110].mxu0 }
 0x1fe   : > { %v1546_v12 = vadd.f32 %v4739_v21, %v6839_v34  ;;  %v1537_v0 = vpop.f32.mrb[111].mxu0  ;;  %v6844_v21 = vld [vmem:[#allocation5_spill] sm:$0xff] }
 0x1ff   : > { %v1538_v31 = vadd.f32 %v1537_v0, %v6840_v33 }
 0x201   : > { %v6428_v15 = vpop.f32.mrb[124].mxu1 }
 0x202   : > { %6838 = vst [vmem:[#allocation24_spill] sm:$0xff] %v6428_v15  ;;  %v2556_v63 = vpop.f32.mrb[125].mxu1 }
 0x203   : > { %v2557_v49 = vpop.f32.mrb[126].mxu1  ;;  %v4790_v20 = vpop.f32.mrb[112].mxu0 }
 0x204   : > { %v2559_v17 = vpop.f32.mrb[127].mxu1  ;;  %v2595_v7 = vpop.f32.mrb[113].mxu0  ;;  %v6846_v20 = vld [vmem:[#allocation10_spill] sm:$0xff] }
 0x205   : > { %v2596_v53 = vadd.f32 %v2595_v7, %v6841_v16  ;;  %v4791_v54 = vpop.f32.mrb[114].mxu0 }
 0x206   : > { %v2607_v13 = vadd.f32 %v4791_v54, %v6843_v42  ;;  %v2598_v14 = vpop.f32.mrb[115].mxu0 }
 0x207   : > { %v6436_v59 = vadd.f32 %v2596_v53, %v1487_v58  ;;  %v2599_v34 = vadd.f32 %v2598_v14, %v6844_v21  ;;  %v6848_v58 = vld [vmem:[#allocation11_spill] sm:$0xff] }
 0x208   : > { %v6439_v63 = vadd.f32 %v2607_v13, %v1498_v62 }
 0x209   : > { %v6433_v47 = vpop.f32.mrb[128].mxu1  ;;  %v6443_v33 = vadd.f32 %v2599_v34, %v1490_v44 }
 0x20a   : > { %6842 = vst [vmem:[#allocation9_spill] sm:$0xff] %v6433_v47  ;;  %v3231_v15 = vpop.f32.mrb[129].mxu1  ;;  %v6847_v47 = vld [vmem:[#allocation8_spill] sm:$0xff] }
 0x20b   : > { %v6441_v0 = vpop.f32.mrb[130].mxu1  ;;  %6845 = vst [vmem:[#allocation7_spill] sm:$0xff] %v6443_v33  ;;  %v4794_v17 = vpop.f32.mrb[116].mxu0 }
 0x20c   : > { %v3234_v49 = vpop.f32.mrb[131].mxu1  ;;  %v2620_v7 = vadd.f32 %v4794_v17, %v6846_v20  ;;  %v2611_v16 = vpop.f32.mrb[117].mxu0  ;;  %v6850_v17 = vld [vmem:[#allocation15_spill] sm:$0xff] }
 0x20d   : > { %v2612_v23 = vadd.f32 %v2611_v16, %v6847_v47  ;;  %v4795_v42 = vpop.f32.mrb[118].mxu0 }
 0x20e   : > { %v6447_v54 = vadd.f32 %v2620_v7, %v1511_v1  ;;  %v2623_v15 = vadd.f32 %v4795_v42, %v6848_v58  ;;  %v2614_v14 = vpop.f32.mrb[119].mxu0 }
 0x20f   : > { %v6450_v62 = vadd.f32 %v2612_v23, %v1503_v9 }
 0x210   : > { %v6452_v21 = vadd.f32 %v2623_v15, %v1514_v11 }
 0x211   : > { %v3237_v53 = vpop.f32.mrb[132].mxu1 }
 0x212   : > { %v3239_v13 = vpop.f32.mrb[133].mxu1  ;;  %6849 = vst [vmem:[#allocation4_spill] sm:$0xff] %v6452_v21  ;;  %v6851_v53 = vld [vmem:[#allocation13_spill] sm:$0xff] }
 0x213   : > { %v6454_v44 = vpop.f32.mrb[134].mxu1  ;;  %v4798_v49 = vpop.f32.mrb[120].mxu0  ;;  %v6852_v13 = vld [vmem:[#allocation17_spill] sm:$0xff] }
 0x214   : > { %v3242_v34 = vpop.f32.mrb[135].mxu1  ;;  %v2636_v20 = vadd.f32 %v4798_v49, %v6850_v17  ;;  %v2627_v33 = vpop.f32.mrb[121].mxu0 }
 0x215   : > { %v4799_v47 = vpop.f32.mrb[122].mxu0 }
 0x216   : > { %v6457_v16 = vadd.f32 %v2636_v20, %v1527_v36  ;;  %v2630_v7 = vpop.f32.mrb[123].mxu0  ;;  %v6853_v47 = vld [vmem:[#allocation19_spill] sm:$0xff] }
 0x217   : > { %v2631_v23 = vadd.f32 %v2630_v7, %v6851_v53 }
 0x219   : > { %v6459_v1 = vpop.f32.mrb[136].mxu1  ;;  %v6462_v58 = vadd.f32 %v2631_v23, %v1522_v37 }
 0x21a   : > { %v3247_v42 = vpop.f32.mrb[137].mxu1 }
 0x21b   : > { %v3248_v9 = vpop.f32.mrb[138].mxu1  ;;  %v4802_v15 = vpop.f32.mrb[124].mxu0 }
 0x21c   : > { %v3250_v11 = vpop.f32.mrb[139].mxu1  ;;  %v2643_v14 = vpop.f32.mrb[125].mxu0 }
 0x21d   : > { %v2644_v34 = vadd.f32 %v2643_v14, %v6852_v13  ;;  %v4803_v21 = vpop.f32.mrb[126].mxu0 }
 0x21e   : > { %v2655_v36 = vadd.f32 %v4803_v21, %v6308_v28  ;;  %v2646_v33 = vpop.f32.mrb[127].mxu0  ;;  %v6854_v21 = vld [vmem:[#allocation14_spill] sm:$0xff] }
 0x21f   : > { %v6468_v17 = vadd.f32 %v2644_v34, %v1535_v35  ;;  %v2647_v42 = vadd.f32 %v2646_v33, %v6853_v47 }
 0x220   : > { %v6471_v7 = vadd.f32 %v2655_v36, %v1546_v12  ;;  %v6855_v36 = vld [vmem:[#allocation12_spill] sm:$0xff] }
 0x221   : > { %v6465_v49 = vpop.f32.mrb[140].mxu1  ;;  %v6475_v53 = vadd.f32 %v2647_v42, %v1538_v31 }
 0x222   : > { %v3255_v20 = vpop.f32.mrb[141].mxu1 }
 0x223   : > { %v6473_v37 = vpop.f32.mrb[142].mxu1  ;;  %v4806_v9 = vpop.f32.mrb[128].mxu0  ;;  %v6856_v20 = vld [vmem:[#allocation16_spill] sm:$0xff] }
 0x224   : > { %v3258_v23 = vpop.f32.mrb[143].mxu1  ;;  %v2668_v11 = vadd.f32 %v4806_v9, %v6319_v57  ;;  %v2659_v15 = vpop.f32.mrb[129].mxu0 }
 0x225   : > { %v2660_v14 = vadd.f32 %v2659_v15, %v6314_v40  ;;  %v4807_v28 = vpop.f32.mrb[130].mxu0 }
 0x226   : > { %v6480_v35 = vadd.f32 %v2668_v11, %v6854_v21  ;;  %v2671_v34 = vadd.f32 %v4807_v28, %v6324_v61  ;;  %v2662_v12 = vpop.f32.mrb[131].mxu0 }
 0x227   : > { %v6484_v33 = vadd.f32 %v2660_v14, %v6855_v36 }
 0x228   : > { %v6487_v47 = vadd.f32 %v2671_v34, %v6856_v20  ;;  %v6857_v34 = vld [vmem:[#allocation18_spill] sm:$0xff] }
 0x229   : > { %v3261_v13 = vpop.f32.mrb[144].mxu1 }
 0x22a   : > { %v3263_v31 = vpop.f32.mrb[145].mxu1 }
 0x22b   : > { %v6489_v42 = vpop.f32.mrb[146].mxu1  ;;  %v4810_v23 = vpop.f32.mrb[132].mxu0 }
 0x22c   : > { %v3266_v57 = vpop.f32.mrb[147].mxu1  ;;  %v2684_v40 = vadd.f32 %v4810_v23, %v6338_v50  ;;  %v2675_v9 = vpop.f32.mrb[133].mxu0 }
 0x22d   : > { %v4811_v11 = vpop.f32.mrb[134].mxu0 }
 0x22e   : > { %v6493_v15 = vadd.f32 %v2684_v40, %v6304_v24  ;;  %v2678_v28 = vpop.f32.mrb[135].mxu0 }
 0x22f   : > { %v2679_v21 = vadd.f32 %v2678_v28, %v6331_v8 }
 0x231   : > { %v6495_v61 = vpop.f32.mrb[148].mxu1  ;;  %v6499_v12 = vadd.f32 %v2679_v21, %v6857_v34 }
 0x232   : > { %v3271_v14 = vpop.f32.mrb[149].mxu1 }
 0x233   : > { %v3272_v13 = vpop.f32.mrb[150].mxu1  ;;  %v4814_v31 = vpop.f32.mrb[136].mxu0 }
 0x234   : > { %v3274_v36 = vpop.f32.mrb[151].mxu1  ;;  %v2691_v20 = vpop.f32.mrb[137].mxu0 }
 0x235   : > { %v2692_v50 = vadd.f32 %v2691_v20, %v6345_v55  ;;  %v4815_v57 = vpop.f32.mrb[138].mxu0 }
 0x236   : > { %v2703_v24 = vadd.f32 %v4815_v57, %v6357_v19  ;;  %v2694_v40 = vpop.f32.mrb[139].mxu0 }
 0x237   : > { %v6506_v9 = vadd.f32 %v2692_v50, %v6311_v3  ;;  %v2695_v8 = vadd.f32 %v2694_v40, %v6350_v45 }
 0x238   : > { %v6510_v28 = vadd.f32 %v2703_v24, %v6322_v10 }
 0x239   : > { %v6502_v23 = vpop.f32.mrb[152].mxu1  ;;  %v6515_v21 = vadd.f32 %v2695_v8, %v6317_v38 }
 0x23a   : > { %v3279_v11 = vpop.f32.mrb[153].mxu1 }
 0x23b   : > { %v6512_v14 = vpop.f32.mrb[154].mxu1  ;;  %v4818_v13 = vpop.f32.mrb[140].mxu0 }
 0x23c   : > { %v3282_v55 = vpop.f32.mrb[155].mxu1  ;;  %v2716_v34 = vadd.f32 %v4818_v13, %v6371_v30  ;;  %v2707_v19 = vpop.f32.mrb[141].mxu0 }
 0x23d   : > { %v2708_v36 = vadd.f32 %v2707_v19, %v6364_v18  ;;  %v4819_v3 = vpop.f32.mrb[142].mxu0 }
 0x23e   : > { %v6520_v31 = vadd.f32 %v2716_v34, %v6336_v2  ;;  %v2719_v10 = vadd.f32 %v4819_v3, %v6376_v6  ;;  %v2710_v20 = vpop.f32.mrb[143].mxu0 }
 0x23f   : > { %v6524_v50 = vadd.f32 %v2708_v36, %v6329_v60 }
 0x240   : > { %v6527_v57 = vadd.f32 %v2719_v10, %v6341_v48 }
 0x241   : > { %v3285_v45 = vpop.f32.mrb[156].mxu1 }
 0x242   : > { %v3287_v38 = vpop.f32.mrb[157].mxu1 }
 0x243   : > { %v6529_v24 = vpop.f32.mrb[158].mxu1  ;;  %v4822_v40 = vpop.f32.mrb[144].mxu0 }
 0x244   : > { %v3290_v30 = vpop.f32.mrb[159].mxu1  ;;  %v2732_v18 = vadd.f32 %v4822_v40, %v6390_v22  ;;  %v2723_v11 = vpop.f32.mrb[145].mxu0 }
 0x245   : > { %v4823_v2 = vpop.f32.mrb[146].mxu0 }
 0x246   : > { %v6533_v8 = vadd.f32 %v2732_v18, %v6355_v56  ;;  %v2726_v55 = vpop.f32.mrb[147].mxu0 }
 0x247   : > { %v2727_v13 = vadd.f32 %v2726_v55, %v6383_v32 }
 0x249   : > { %v6535_v6 = vpop.f32.mrb[160].mxu1  ;;  %v6539_v48 = vadd.f32 %v2727_v13, %v6348_v51 }
 0x24a   : > { %v3295_v60 = vpop.f32.mrb[161].mxu1 }
 0x24b   : > { %v3296_v34 = vpop.f32.mrb[162].mxu1  ;;  %v4826_v36 = vpop.f32.mrb[148].mxu0 }
 0x24c   : > { %v3298_v19 = vpop.f32.mrb[163].mxu1  ;;  %v2739_v3 = vpop.f32.mrb[149].mxu0 }
 0x24d   : > { %v2740_v22 = vadd.f32 %v2739_v3, %v6397_v43  ;;  %v4827_v45 = vpop.f32.mrb[150].mxu0  ;;  %v6858_v19 = vld [vmem:[#allocation20_spill] sm:$0xff] }
 0x24e   : > { %v2751_v56 = vadd.f32 %v4827_v45, %v6409_v29  ;;  %v2742_v20 = vpop.f32.mrb[151].mxu0 }
 0x24f   : > { %v6546_v38 = vadd.f32 %v2740_v22, %v6362_v5  ;;  %v2743_v32 = vadd.f32 %v2742_v20, %v6402_v4  ;;  %v6860_v20 = vld [vmem:[#allocation22_spill] sm:$0xff] }
 0x250   : > { %v6550_v51 = vadd.f32 %v2751_v56, %v6374_v41 }
 0x251   : > { %v6542_v10 = vpop.f32.mrb[164].mxu1  ;;  %v6555_v18 = vadd.f32 %v2743_v32, %v6367_v27 }
 0x252   : > { %v3303_v30 = vpop.f32.mrb[165].mxu1 }
 0x253   : > { %v6552_v40 = vpop.f32.mrb[166].mxu1  ;;  %v4830_v11 = vpop.f32.mrb[152].mxu0 }
 0x254   : > { %v3306_v43 = vpop.f32.mrb[167].mxu1  ;;  %v2764_v2 = vadd.f32 %v4830_v11, %v6418_v26  ;;  %v2755_v29 = vpop.f32.mrb[153].mxu0 }
 0x255   : > { %v2756_v55 = vadd.f32 %v2755_v29, %v6412_v39  ;;  %v4831_v5 = vpop.f32.mrb[154].mxu0  ;;  %v6859_v39 = vld [vmem:[#allocation24_spill] sm:$0xff]  ;;  %v6861_v43 = vld [vmem:[#allocation23_spill] sm:$0xff]  ;;  %v6862_v29 = vld [vmem:[#allocation21_spill] sm:$0xff] }
 0x256   : > { %v6560_v60 = vadd.f32 %v2764_v2, %v6388_v25  ;;  %v2767_v41 = vadd.f32 %v4831_v5, %v6421_v46  ;;  %v2758_v13 = vpop.f32.mrb[155].mxu0 }
 0x257   : > { %v6564_v34 = vadd.f32 %v2756_v55, %v6381_v52  ;;  %v6863_v13 = vld [vmem:[#allocation9_spill] sm:$0xff] }
 0x258   : > { %v6567_v36 = vadd.f32 %v2767_v41, %v6858_v19 }
 0x259   : > { %v3309_v4 = vpop.f32.mrb[168].mxu1 }
 0x25a   : > { %v3311_v27 = vpop.f32.mrb[169].mxu1 }
 0x25b   : > { %v6569_v3 = vpop.f32.mrb[170].mxu1  ;;  %v4834_v22 = vpop.f32.mrb[156].mxu0 }
 0x25c   : > { %v3314_v26 = vpop.f32.mrb[171].mxu1  ;;  %v2780_v45 = vadd.f32 %v4834_v22, %v6859_v39  ;;  %v2771_v56 = vpop.f32.mrb[157].mxu0  ;;  %v6587_v22 = vld [vmem:[%s6767_s2] ss:$0 sm:$0xff] }
 0x25d   : > { %v4835_v25 = vpop.f32.mrb[158].mxu0 }
 0x25e   : > { %v6573_v30 = vadd.f32 %v2780_v45, %v6860_v20  ;;  %v2774_v32 = vpop.f32.mrb[159].mxu0 }
 0x25f   : > { %v2775_v11 = vadd.f32 %v2774_v32, %v6861_v43  ;;  %v6595_v32 = vld [vmem:[%s6768_s3] ss:$0 sm:$0xff] }
 0x261   : > { %v6575_v46 = vpop.f32.mrb[172].mxu1  ;;  %v6579_v55 = vadd.f32 %v2775_v11, %v6862_v29 }
 0x262   : > { %v3319_v52 = vpop.f32.mrb[173].mxu1 }
 0x263   : > { %v3320_v2 = vpop.f32.mrb[174].mxu1  ;;  %v4854_v4 = vpop.f32.mrb[160].mxu0 }
 0x264   : > { %v3322_v5 = vpop.f32.mrb[175].mxu1  ;;  %v3454_v41 = vpop.f32.mrb[161].mxu0  ;;  %v6864_v2 = vld [vmem:[#allocation7_spill] sm:$0xff] }
 0x265   : > { %v3455_v27 = vadd.f32 %v3454_v41, %v6863_v13  ;;  %v4855_v19 = vpop.f32.mrb[162].mxu0 }
 0x266   : > { %v3466_v39 = vadd.f32 %v4855_v19, %v6454_v44  ;;  %v3457_v45 = vpop.f32.mrb[163].mxu0 }
 0x267   : > { %v3645_v56 = vadd.f32 %v3455_v27, %v6436_v59  ;;  %v3458_v20 = vadd.f32 %v3457_v45, %v6441_v0 }
 0x268   : > { %v3648_v52 = vadd.f32 %v3466_v39, %v6439_v63 }
 0x269   : > { %v6582_v26 = vpop.f32.mrb[176].mxu1  ;;  %v3751_v11 = vmul.f32 %v6587_v22, %v3645_v56  ;;  %v3646_v29 = vadd.f32 %v3458_v20, %v6864_v2 }
 0x26a   : > { %v3327_v25 = vpop.f32.mrb[177].mxu1  ;;  %v3775_v13 = vmul.f32 %v6587_v22, %v3648_v52 }
 0x26b   : > { %v6598_v43 = vpop.f32.mrb[178].mxu1  ;;  %v3759_v5 = vadd.f32 %v6595_v32, %v3751_v11  ;;  %v3752_v59 = vmul.f32 %v6587_v22, %v3646_v29  ;;  %v4858_v0 = vpop.f32.mrb[164].mxu0 }
 0x26c   : > { %v3330_v44 = vpop.f32.mrb[179].mxu1  ;;  %v3479_v4 = vadd.f32 %v4858_v0, %v6465_v49  ;;  %v3470_v41 = vpop.f32.mrb[165].mxu0  ;;  %v6865_v49 = vld [vmem:[#allocation4_spill] sm:$0xff] }
 0x26d   : > { %v3760_v63 = vadd.f32 %v6595_v32, %v3752_v59  ;;  %v3471_v27 = vadd.f32 %v3470_v41, %v6459_v1  ;;  %v4859_v19 = vpop.f32.mrb[166].mxu0  ;;  %v3761_v20 = vmax.f32 %v3759_v5, 0.0 }
 0x26e   : > { %v3651_v39 = vadd.f32 %v3479_v4, %v6447_v54  ;;  %v3482_v56 = vadd.f32 %v4859_v19, %v6473_v37  ;;  %v3473_v25 = vpop.f32.mrb[167].mxu0  ;;  %v3777_v37 = vadd.f32 %v6595_v32, %v3775_v13 }
 0x26f   : > { %v3762_v11 = vmax.f32 %v3760_v63, 0.0  ;;  %v3649_v2 = vadd.f32 %v3471_v27, %v6450_v62 }
 0x270   : > { %v3794_v1 = vmul.f32 %v6587_v22, %v3651_v39  ;;  %v3652_v54 = vadd.f32 %v3482_v56, %v6865_v49  ;;  %v3779_v39 = vmax.f32 %v3777_v37, 0.0 }
 0x271   : > { %v3333_v45 = vpop.f32.mrb[180].mxu1  ;;  %v4520_v44 = vpack.c.bf16 %v3762_v11, %v3761_v20  ;;  %v3776_v5 = vmul.f32 %v6587_v22, %v3649_v2 }
 0x272   : > { %v3335_v29 = vpop.f32.mrb[181].mxu1  ;;  %v3796_v59 = vadd.f32 %v6595_v32, %v3794_v1  ;;  %v3795_v0 = vmul.f32 %v6587_v22, %v3652_v54 }
 0x273   : > { %v6620_v52 = vpop.f32.mrb[182].mxu1  ;;  %4521 = vst [vmem:[%s6616_s29] sm:$0xff] %v4520_v44   ;;  %v3778_v4 = vadd.f32 %v6595_v32, %v3776_v5  ;;  %v4862_v41 = vpop.f32.mrb[168].mxu0 }
 0x274   : > { %v3338_v62 = vpop.f32.mrb[183].mxu1  ;;  %v3797_v63 = vadd.f32 %v6595_v32, %v3795_v0  ;;  %v3495_v27 = vadd.f32 %v4862_v41, %v6495_v61  ;;  %v3486_v19 = vpop.f32.mrb[169].mxu0  ;;  %v3798_v56 = vmax.f32 %v3796_v59, 0.0 }
 0x275   : > { %v3780_v13 = vmax.f32 %v3778_v4, 0.0  ;;  %v4863_v45 = vpop.f32.mrb[170].mxu0 }
 0x276   : > { %v3799_v25 = vmax.f32 %v3797_v63, 0.0  ;;  %v3655_v20 = vadd.f32 %v3495_v27, %v6457_v16  ;;  %v3489_v2 = vpop.f32.mrb[171].mxu0 }
 0x277   : > { %v4525_v29 = vpack.c.bf16 %v3780_v13, %v3779_v39  ;;  %v3490_v49 = vadd.f32 %v3489_v2, %v6489_v42 }
 0x278   : > { %v4530_v54 = vpack.c.bf16 %v3799_v25, %v3798_v56  ;;  %v3814_v61 = vmul.f32 %v6587_v22, %v3655_v20 }
 0x279   : > { %v6631_v11 = vpop.f32.mrb[184].mxu1  ;;  %4597 = vst [vmem:[%s6616_s29 + $0x8] sm:$0xff] %v4525_v29   ;;  %v3654_v37 = vadd.f32 %v3490_v49, %v6462_v58 }
 0x27a   : > { %v3343_v1 = vpop.f32.mrb[185].mxu1  ;;  %4598 = vst [vmem:[%s6616_s29 + $0x10] sm:$0xff] %v4530_v54   ;;  %v3816_v62 = vadd.f32 %v6595_v32, %v3814_v61 }
 0x27b   : > { %v3344_v44 = vpop.f32.mrb[186].mxu1  ;;  %v3813_v16 = vmul.f32 %v6587_v22, %v3654_v37  ;;  %v4866_v59 = vpop.f32.mrb[172].mxu0 }
 0x27c   : > { %v3346_v5 = vpop.f32.mrb[187].mxu1  ;;  %v3502_v0 = vpop.f32.mrb[173].mxu0  ;;  %v3818_v58 = vmax.f32 %v3816_v62, 0.0 }
 0x27d   : > { %v3815_v4 = vadd.f32 %v6595_v32, %v3813_v16  ;;  %v3503_v41 = vadd.f32 %v3502_v0, %v6502_v23  ;;  %v4867_v42 = vpop.f32.mrb[174].mxu0 }
 0x27e   : > { %v3514_v27 = vadd.f32 %v4867_v42, %v6529_v24  ;;  %v3505_v19 = vpop.f32.mrb[175].mxu0 }
 0x27f   : > { %v3817_v39 = vmax.f32 %v3815_v4, 0.0  ;;  %v3657_v13 = vadd.f32 %v3503_v41, %v6468_v17  ;;  %v3506_v56 = vadd.f32 %v3505_v19, %v6512_v14 }
 0x280   : > { %v3660_v25 = vadd.f32 %v3514_v27, %v6471_v7 }
 0x281   : > { %v6642_v63 = vpop.f32.mrb[188].mxu1  ;;  %v4535_v2 = vpack.c.bf16 %v3818_v58, %v3817_v39  ;;  %v3832_v23 = vmul.f32 %v6587_v22, %v3657_v13  ;;  %v3658_v29 = vadd.f32 %v3506_v56, %v6475_v53 }
 0x282   : > { %v3351_v45 = vpop.f32.mrb[189].mxu1  ;;  %v3851_v14 = vmul.f32 %v6587_v22, %v3660_v25 }
 0x283   : > { %v6648_v20 = vpop.f32.mrb[190].mxu1  ;;  %4599 = vst [vmem:[%s6616_s29 + $0x18] sm:$0xff] %v4535_v2   ;;  %v3834_v24 = vadd.f32 %v6595_v32, %v3832_v23  ;;  %v3833_v49 = vmul.f32 %v6587_v22, %v3658_v29  ;;  %v4870_v54 = vpop.f32.mrb[176].mxu0 }
 0x284   : > { %v3354_v1 = vpop.f32.mrb[191].mxu1  ;;  %v3527_v17 = vadd.f32 %v4870_v54, %v6542_v10  ;;  %v3518_v61 = vpop.f32.mrb[177].mxu0 }
 0x285   : > { %v3835_v7 = vadd.f32 %v6595_v32, %v3833_v49  ;;  %v3519_v44 = vadd.f32 %v3518_v61, %v6535_v6  ;;  %v4871_v37 = vpop.f32.mrb[178].mxu0  ;;  %v3836_v59 = vmax.f32 %v3834_v24, 0.0  ;;  %v3853_v6 = vadd.f32 %v6595_v32, %v3851_v14 }
 0x286   : > { %v3663_v5 = vadd.f32 %v3527_v17, %v6480_v35  ;;  %v3530_v62 = vadd.f32 %v4871_v37, %v6552_v40  ;;  %v3521_v16 = vpop.f32.mrb[179].mxu0 }
 0x287   : > { %v3837_v0 = vmax.f32 %v3835_v7, 0.0  ;;  %v3661_v4 = vadd.f32 %v3519_v44, %v6484_v33  ;;  %v3855_v25 = vmax.f32 %v3853_v6, 0.0 }
 0x288   : > { %v3870_v41 = vmul.f32 %v6587_v22, %v3663_v5  ;;  %v3664_v42 = vadd.f32 %v3530_v62, %v6487_v47 }
 0x289   : > { %v3357_v53 = vpop.f32.mrb[192].mxu1  ;;  %v4540_v19 = vpack.c.bf16 %v3837_v0, %v3836_v59  ;;  %v3852_v35 = vmul.f32 %v6587_v22, %v3661_v4 }
 0x28a   : > { %v3359_v10 = vpop.f32.mrb[193].mxu1  ;;  %v3872_v40 = vadd.f32 %v6595_v32, %v3870_v41  ;;  %v3871_v39 = vmul.f32 %v6587_v22, %v3664_v42 }
 0x28b   : > { %v6664_v27 = vpop.f32.mrb[194].mxu1  ;;  %4600 = vst [vmem:[%s6616_s29 + $0x20] sm:$0xff] %v4540_v19   ;;  %v3854_v33 = vadd.f32 %v6595_v32, %v3852_v35  ;;  %v4874_v13 = vpop.f32.mrb[180].mxu0 }
 0x28c   : > { %v3362_v58 = vpop.f32.mrb[195].mxu1  ;;  %v3873_v45 = vadd.f32 %v6595_v32, %v3871_v39  ;;  %v3543_v47 = vadd.f32 %v4874_v13, %v6575_v46  ;;  %v3534_v56 = vpop.f32.mrb[181].mxu0  ;;  %v3874_v29 = vmax.f32 %v3872_v40, 0.0 }
 0x28d   : > { %v3856_v2 = vmax.f32 %v3854_v33, 0.0  ;;  %v4875_v23 = vpop.f32.mrb[182].mxu0 }
 0x28e   : > { %v3875_v1 = vmax.f32 %v3873_v45, 0.0  ;;  %v3667_v24 = vadd.f32 %v3543_v47, %v6493_v15  ;;  %v3537_v54 = vpop.f32.mrb[183].mxu0 }
 0x28f   : > { %v4545_v17 = vpack.c.bf16 %v3856_v2, %v3855_v25  ;;  %v3538_v14 = vadd.f32 %v3537_v54, %v6569_v3 }
 0x290   : > { %v4550_v7 = vpack.c.bf16 %v3875_v1, %v3874_v29  ;;  %v3890_v46 = vmul.f32 %v6587_v22, %v3667_v24 }
 0x291   : > { %v6675_v49 = vpop.f32.mrb[196].mxu1  ;;  %4601 = vst [vmem:[%s6616_s29 + $0x28] sm:$0xff] %v4545_v17   ;;  %v3666_v37 = vadd.f32 %v3538_v14, %v6499_v12 }
 0x292   : > { %v3367_v61 = vpop.f32.mrb[197].mxu1  ;;  %4602 = vst [vmem:[%s6616_s29 + $0x30] sm:$0xff] %v4550_v7   ;;  %v3892_v53 = vadd.f32 %v6595_v32, %v3890_v46 }
 0x293   : > { %v3368_v44 = vpop.f32.mrb[198].mxu1  ;;  %v3889_v15 = vmul.f32 %v6587_v22, %v3666_v37  ;;  %v4878_v62 = vpop.f32.mrb[184].mxu0 }
 0x294   : > { %v3370_v5 = vpop.f32.mrb[199].mxu1  ;;  %v3550_v16 = vpop.f32.mrb[185].mxu0  ;;  %v3894_v12 = vmax.f32 %v3892_v53, 0.0 }
 0x295   : > { %v3891_v59 = vadd.f32 %v6595_v32, %v3889_v15  ;;  %v3551_v0 = vadd.f32 %v3550_v16, %v6582_v26  ;;  %v4879_v3 = vpop.f32.mrb[186].mxu0 }
 0x296   : > { %v3562_v10 = vadd.f32 %v4879_v3, %v6620_v52  ;;  %v3553_v41 = vpop.f32.mrb[187].mxu0 }
 0x297   : > { %v3893_v42 = vmax.f32 %v3891_v59, 0.0  ;;  %v3669_v6 = vadd.f32 %v3551_v0, %v6506_v9  ;;  %v3554_v35 = vadd.f32 %v3553_v41, %v6598_v43 }
 0x298   : > { %v3672_v58 = vadd.f32 %v3562_v10, %v6510_v28 }
 0x299   : > { %v6686_v4 = vpop.f32.mrb[200].mxu1  ;;  %v4555_v39 = vpack.c.bf16 %v3894_v12, %v3893_v42  ;;  %v3908_v26 = vmul.f32 %v6587_v22, %v3669_v6  ;;  %v3670_v33 = vadd.f32 %v3554_v35, %v6515_v21 }
 0x29a   : > { %v3375_v19 = vpop.f32.mrb[201].mxu1  ;;  %v3927_v43 = vmul.f32 %v6587_v22, %v3672_v58 }
 0x29b   : > { %v6692_v40 = vpop.f32.mrb[202].mxu1  ;;  %4603 = vst [vmem:[%s6616_s29 + $0x38] sm:$0xff] %v4555_v39   ;;  %v3910_v52 = vadd.f32 %v6595_v32, %v3908_v26  ;;  %v3909_v45 = vmul.f32 %v6587_v22, %v3670_v33  ;;  %v4882_v47 = vpop.f32.mrb[188].mxu0 }
 0x29c   : > { %v3378_v13 = vpop.f32.mrb[203].mxu1  ;;  %v3575_v9 = vadd.f32 %v4882_v47, %v6642_v63  ;;  %v3566_v56 = vpop.f32.mrb[189].mxu0 }
 0x29d   : > { %v3911_v28 = vadd.f32 %v6595_v32, %v3909_v45  ;;  %v3567_v25 = vadd.f32 %v3566_v56, %v6631_v11  ;;  %v4883_v2 = vpop.f32.mrb[190].mxu0  ;;  %v3912_v24 = vmax.f32 %v3910_v52, 0.0  ;;  %v3929_v11 = vadd.f32 %v6595_v32, %v3927_v43 }
 0x29e   : > { %v3675_v23 = vadd.f32 %v3575_v9, %v6520_v31  ;;  %v3578_v29 = vadd.f32 %v4883_v2, %v6648_v20  ;;  %v3569_v1 = vpop.f32.mrb[191].mxu0 }
 0x29f   : > { %v3913_v54 = vmax.f32 %v3911_v28, 0.0  ;;  %v3673_v17 = vadd.f32 %v3567_v25, %v6524_v50  ;;  %v3931_v62 = vmax.f32 %v3929_v11, 0.0 }
 0x2a0   : > { %v3946_v61 = vmul.f32 %v6587_v22, %v3675_v23  ;;  %v3676_v14 = vadd.f32 %v3578_v29, %v6527_v57 }
 0x2a1   : > { %v3381_v21 = vpop.f32.mrb[204].mxu1  ;;  %v4560_v46 = vpack.c.bf16 %v3913_v54, %v3912_v24  ;;  %v3928_v31 = vmul.f32 %v6587_v22, %v3673_v17 }
 0x2a2   : > { %v3383_v63 = vpop.f32.mrb[205].mxu1  ;;  %v3948_v37 = vadd.f32 %v6595_v32, %v3946_v61  ;;  %v3947_v20 = vmul.f32 %v6587_v22, %v3676_v14 }
 0x2a3   : > { %v3384_v7 = vpop.f32.mrb[206].mxu1  ;;  %4604 = vst [vmem:[%s6616_s29 + $0x40] sm:$0xff] %v4560_v46   ;;  %v3930_v5 = vadd.f32 %v6595_v32, %v3928_v31  ;;  %v4886_v50 = vpop.f32.mrb[192].mxu0 }
 0x2a4   : > { %v3386_v44 = vpop.f32.mrb[207].mxu1  ;;  %v3949_v53 = vadd.f32 %v6595_v32, %v3947_v20  ;;  %v3591_v15 = vadd.f32 %v4886_v50, %v6675_v49  ;;  %v3582_v57 = vpop.f32.mrb[193].mxu0  ;;  %v3950_v0 = vmax.f32 %v3948_v37, 0.0 }
 0x2a5   : > { %v3932_v16 = vmax.f32 %v3930_v5, 0.0  ;;  %v4887_v59 = vpop.f32.mrb[194].mxu0 }
 0x2a6   : > { %v3951_v3 = vmax.f32 %v3949_v53, 0.0  ;;  %v3679_v10 = vadd.f32 %v3591_v15, %v6533_v8  ;;  %v3585_v12 = vpop.f32.mrb[195].mxu0 }
 0x2a7   : > { %v4565_v42 = vpack.c.bf16 %v3932_v16, %v3931_v62  ;;  %v3586_v19 = vadd.f32 %v3585_v12, %v6664_v27 }
 0x2a8   : > { %v4570_v35 = vpack.c.bf16 %v3951_v3, %v3950_v0  ;;  %v3966_v58 = vmul.f32 %v6587_v22, %v3679_v10 }
 0x2a9   : > { %v3389_v41 = vpop.f32.mrb[208].mxu1  ;;  %4605 = vst [vmem:[%s6616_s29 + $0x48] sm:$0xff] %v4565_v42   ;;  %v3678_v39 = vadd.f32 %v3586_v19, %v6539_v48 }
 0x2aa   : > { %v3391_v6 = vpop.f32.mrb[209].mxu1  ;;  %4606 = vst [vmem:[%s6616_s29 + $0x50] sm:$0xff] %v4570_v35   ;;  %v3968_v33 = vadd.f32 %v6595_v32, %v3966_v58 }
 0x2ab   : > { %v3392_v49 = vpop.f32.mrb[210].mxu1  ;;  %v3965_v13 = vmul.f32 %v6587_v22, %v3678_v39  ;;  %v4890_v8 = vpop.f32.mrb[196].mxu0 }
 0x2ac   : > { %v3394_v26 = vpop.f32.mrb[211].mxu1  ;;  %v3598_v52 = vpop.f32.mrb[197].mxu0  ;;  %v3970_v28 = vmax.f32 %v3968_v33, 0.0 }
 0x2ad   : > { %v3967_v45 = vadd.f32 %v6595_v32, %v3965_v13  ;;  %v3599_v47 = vadd.f32 %v3598_v52, %v6686_v4  ;;  %v4891_v27 = vpop.f32.mrb[198].mxu0 }
 0x2ae   : > { %v3610_v56 = vadd.f32 %v4891_v27, %v3384_v7  ;;  %v3601_v43 = vpop.f32.mrb[199].mxu0 }
 0x2af   : > { %v3969_v25 = vmax.f32 %v3967_v45, 0.0  ;;  %v3681_v48 = vadd.f32 %v3599_v47, %v6546_v38  ;;  %v3602_v23 = vadd.f32 %v3601_v43, %v6692_v40 }
 0x2b0   : > { %v3684_v21 = vadd.f32 %v3610_v56, %v6550_v51 }
 0x2b1   : > { %v3397_v9 = vpop.f32.mrb[212].mxu1  ;;  %v4575_v1 = vpack.c.bf16 %v3970_v28, %v3969_v25  ;;  %v3984_v24 = vmul.f32 %v6587_v22, %v3681_v48  ;;  %v3682_v4 = vadd.f32 %v3602_v23, %v6555_v18 }
 0x2b2   : > { %v3399_v2 = vpop.f32.mrb[213].mxu1  ;;  %v4003_v7 = vmul.f32 %v6587_v22, %v3684_v21 }
 0x2b3   : > { %v3400_v29 = vpop.f32.mrb[214].mxu1  ;;  %4607 = vst [vmem:[%s6616_s29 + $0x58] sm:$0xff] %v4575_v1   ;;  %v3986_v17 = vadd.f32 %v6595_v32, %v3984_v24  ;;  %v3985_v63 = vmul.f32 %v6587_v22, %v3682_v4  ;;  %v4894_v61 = vpop.f32.mrb[200].mxu0 }
 0x2b4   : > { %v3402_v54 = vpop.f32.mrb[215].mxu1  ;;  %v3623_v14 = vadd.f32 %v4894_v61, %v3397_v9  ;;  %v3614_v38 = vpop.f32.mrb[201].mxu0  ;;  %v4005_v62 = vadd.f32 %v6595_v32, %v4003_v7 }
 0x2b5   : > { %v3987_v40 = vadd.f32 %v6595_v32, %v3985_v63  ;;  %v3615_v51 = vadd.f32 %v3614_v38, %v3389_v41  ;;  %v4895_v11 = vpop.f32.mrb[202].mxu0  ;;  %v3988_v37 = vmax.f32 %v3986_v17, 0.0 }
 0x2b6   : > { %v3687_v46 = vadd.f32 %v3623_v14, %v6560_v60  ;;  %v3626_v18 = vadd.f32 %v4895_v11, %v3400_v29  ;;  %v3617_v44 = vpop.f32.mrb[203].mxu0 }
 0x2b7   : > { %v3989_v20 = vmax.f32 %v3987_v40, 0.0  ;;  %v3685_v5 = vadd.f32 %v3615_v51, %v6564_v34 }
 0x2b8   : > { %v4022_v53 = vmul.f32 %v6587_v22, %v3687_v46  ;;  %v3688_v15 = vadd.f32 %v3626_v18, %v6567_v36  ;;  %v4007_v36 = vmax.f32 %v4005_v62, 0.0 }
 0x2b9   : > { %v3405_v31 = vpop.f32.mrb[216].mxu1  ;;  %v4580_v16 = vpack.c.bf16 %v3989_v20, %v3988_v37  ;;  %v4004_v59 = vmul.f32 %v6587_v22, %v3685_v5 }
 0x2ba   : > { %v3407_v50 = vpop.f32.mrb[217].mxu1  ;;  %v4024_v0 = vadd.f32 %v6595_v32, %v4022_v53  ;;  %v4023_v3 = vmul.f32 %v6587_v22, %v3688_v15 }
 0x2bb   : > { %v3408_v57 = vpop.f32.mrb[218].mxu1  ;;  %4608 = vst [vmem:[%s6616_s29 + $0x60] sm:$0xff] %v4580_v16   ;;  %v4006_v10 = vadd.f32 %v6595_v32, %v4004_v59  ;;  %v4898_v34 = vpop.f32.mrb[204].mxu0 }
 0x2bc   : > { %v3410_v60 = vpop.f32.mrb[219].mxu1  ;;  %v4025_v41 = vadd.f32 %v6595_v32, %v4023_v3  ;;  %v3630_v12 = vpop.f32.mrb[205].mxu0  ;;  %v4026_v19 = vmax.f32 %v4024_v0, 0.0 }
 0x2bd   : > { %v4008_v42 = vmax.f32 %v4006_v10, 0.0  ;;  %v4899_v6 = vpop.f32.mrb[206].mxu0 }
 0x2be   : > { %v4027_v35 = vmax.f32 %v4025_v41, 0.0  ;;  %v3633_v49 = vpop.f32.mrb[207].mxu0 }
 0x2bf   : > { %v4585_v39 = vpack.c.bf16 %v4008_v42, %v4007_v36  ;;  %v3634_v13 = vadd.f32 %v3633_v49, %v3408_v57 }
 0x2c0   : > { %v4590_v8 = vpack.c.bf16 %v4027_v35, %v4026_v19 }
 0x2c1   : > { %v3413_v58 = vpop.f32.mrb[220].mxu1  ;;  %4609 = vst [vmem:[%s6616_s29 + $0x68] sm:$0xff] %v4585_v39   ;;  %v3690_v47 = vadd.f32 %v3634_v13, %v6579_v55 }
 0x2c2   : > { %v3639_v26 = vadd.f32 %v4898_v34, %v3413_v58  ;;  %v3415_v33 = vpop.f32.mrb[221].mxu1  ;;  %4610 = vst [vmem:[%s6616_s29 + $0x70] sm:$0xff] %v4590_v8  }
 0x2c3   : > { %v3416_v52 = vpop.f32.mrb[222].mxu1  ;;  %v4041_v56 = vmul.f32 %v6587_v22, %v3690_v47 }
 0x2c4   : > { %v3691_v45 = vadd.f32 %v3639_v26, %v6573_v30  ;;  %v3418_v27 = vpop.f32.mrb[223].mxu1 }
 0x2c5   : > { %v4043_v28 = vadd.f32 %v6595_v32, %v4041_v56 }
 0x2c6   : > { %v4042_v9 = vmul.f32 %v6587_v22, %v3691_v45 }
 0x2c7   : > { %v4045_v48 = vmax.f32 %v4043_v28, 0.0 }
 0x2c8   : > { %v4044_v43 = vadd.f32 %v6595_v32, %v4042_v9 }
 0x2ca   : > { %v4046_v25 = vmax.f32 %v4044_v43, 0.0 }
 0x2cc   : > { %v4595_v2 = vpack.c.bf16 %v4046_v25, %v4045_v48 }
 0x2ce   : > { %4611 = vst [vmem:[%s6616_s29 + $0x78] sm:$0xff] %v4595_v2  }
 0x2cf PF: > { %s14_s17 = sadd.s32 1, %s5077_s17   ;;  %s6866_s15 = smov %s5073_s16 }
 0x2d0   : > { %p11_p5 = scmp.ge.s32.totalorder %s14_s17, 4   ;;  %s6867_s16 = smov %s6869_s18 }
 0x2d2   :  { %13 = sbr.rel (!%p11_p5) target bundleno = 2 (0x2), region = 111 }

</bundles_post_ra>
